<compile_context>
chip_gen: v7x
topology: tpu7x:2x2x1
jax: 0.10.0
libtpu: 0.0.40
codegen_flags: <defaults>
</compile_context>

<pallas_src>
import jax
import jax.numpy as jnp
from jax.experimental import pallas as pl
from jax.experimental.pallas import tpu as pltpu

NEG_SLOPE = 0.01       # nn.LeakyReLU() default
IN_FEATURES = 784
IN_PADDED = 896        # 7 * 128  (784 padded up to a lane multiple)
HIDDEN = 1024


def _round_up(x, m):
    return (x + m - 1) // m * m


def dis_model_kernel(x_ref, w1_ref, b1_ref, w2_ref, b2_ref, o_ref):
    # Hidden layer on the MXU: (TB, 896) bf16 @ (896, 1024) bf16 -> f32 acc.
    h = jnp.dot(x_ref[...], w1_ref[...], preferred_element_type=jnp.float32)
    h = h + b1_ref[...]                              # (1, 1024) broadcasts
    h = jnp.where(h > 0, h, NEG_SLOPE * h)           # LeakyReLU (VPU)
    # Output layer has N=1: VPU mul + cross-lane reduce instead of MXU matmul.
    out = jnp.sum(h * w2_ref[...], axis=-1, keepdims=True)   # (TB, 1)
    o_ref[...] = (out + b2_ref[0, 0]).astype(o_ref.dtype)


def dis_model_forward(x, w1, b1, w2, b2):
    """x: (B, 784) f32. w1: (784, 1024), b1: (1024,), w2: (1024, 1), b2: (1,).
    Returns (B, 1) f32 — same semantics as PyTorch Dis_Model.forward."""
    B = x.shape[0]

    # Batch tile: up to 128 rows, multiple of 16 (bf16 sublane packing).
    tb = min(128, _round_up(B, 16))
    bp = _round_up(B, tb)
    grid = (bp // tb,)

    # bf16 inputs for the MXU; zero-pad batch and the contraction dim.
    xp = jnp.pad(x.astype(jnp.bfloat16),
                 ((0, bp - B), (0, IN_PADDED - IN_FEATURES)))
    w1p = jnp.pad(w1.astype(jnp.bfloat16),
                  ((0, IN_PADDED - IN_FEATURES), (0, 0)))

    b1r = b1.reshape(1, HIDDEN).astype(jnp.float32)
    w2r = w2.reshape(1, HIDDEN).astype(jnp.float32)   # row vector for the VPU
    b2r = b2.reshape(1, 1).astype(jnp.float32)

    out = pl.pallas_call(
        dis_model_kernel,
        out_shape=jax.ShapeDtypeStruct((bp, 1), jnp.float32),
        grid=grid,
        in_specs=[
            pl.BlockSpec((tb, IN_PADDED), lambda i: (i, 0)),        # x tile
            pl.BlockSpec((IN_PADDED, HIDDEN), lambda i: (0, 0)),    # W1 (const)
            pl.BlockSpec((1, HIDDEN), lambda i: (0, 0)),            # b1 (const)
            pl.BlockSpec((1, HIDDEN), lambda i: (0, 0)),            # w2 row (const)
            pl.BlockSpec((1, 1), lambda i: (0, 0),
                         memory_space=pltpu.MemorySpace.SMEM),      # b2 scalar
        ],
        out_specs=pl.BlockSpec((tb, 1), lambda i: (i, 0)),
        compiler_params=pltpu.CompilerParams(
            dimension_semantics=("parallel",)),
    )(xp, w1p, b1r, w2r, b2r)
    return out[:B]


def init_params(key):
    """PyTorch nn.Linear default init: U[-1/sqrt(fan_in), +1/sqrt(fan_in)]."""
    k1, k2, k3, k4 = jax.random.split(key, 4)
    lim1 = 1.0 / jnp.sqrt(784.0)
    lim2 = 1.0 / jnp.sqrt(1024.0)
    w1 = jax.random.uniform(k1, (784, 1024), jnp.float32, -lim1, lim1)
    b1 = jax.random.uniform(k2, (1024,), jnp.float32, -lim1, lim1)
    w2 = jax.random.uniform(k3, (1024, 1), jnp.float32, -lim2, lim2)
    b2 = jax.random.uniform(k4, (1,), jnp.float32, -lim2, lim2)
    return w1, b1, w2, b2


if __name__ == "__main__":
    key = jax.random.PRNGKey(0)
    k_x, k_p = jax.random.split(key)

    B = 256  # amortize the W1 read over a full MXU-height batch (2 grid tiles)
    x = jax.random.normal(k_x, (B, 784), jnp.float32)
    w1, b1, w2, b2 = init_params(k_p)

    out = dis_model_forward(x, w1, b1, w2, b2)
    out = jax.block_until_ready(out)
    assert out.shape == (B, 1)

    # Reference with the same bf16 input quantization and f32 math (tight check).
    xb = x.astype(jnp.bfloat16).astype(jnp.float32)
    w1b = w1.astype(jnp.bfloat16).astype(jnp.float32)
    h_ref = jnp.dot(xb, w1b, precision=jax.lax.Precision.HIGHEST) + b1
    h_ref = jnp.where(h_ref > 0, h_ref, NEG_SLOPE * h_ref)
    ref_q = jnp.dot(h_ref, w2, precision=jax.lax.Precision.HIGHEST) + b2
    assert jnp.allclose(out, ref_q, atol=1e-2, rtol=1e-2)

    # Loose check against the full-f32 PyTorch-semantics reference
    # (bf16 weights/activations lose mantissa bits, so tolerance is relaxed).
    h_f32 = x @ w1 + b1
    h_f32 = jnp.where(h_f32 > 0, h_f32, NEG_SLOPE * h_f32)
    ref_f32 = h_f32 @ w2 + b2
    assert jnp.allclose(out, ref_f32, atol=5e-2, rtol=5e-2)

    print("KERNEL_OK")
</pallas_src>

<mosaic_0001>
module attributes {stable_mosaic.version = 11 : i64} {
  func.func @dis_model_kernel(%arg0: i32, %arg1: memref<128x896xbf16, #tpu.memory_space<vmem>>, %arg2: memref<896x1024xbf16, #tpu.memory_space<vmem>>, %arg3: memref<1x1024xf32, #tpu.memory_space<vmem>>, %arg4: memref<1x1024xf32, #tpu.memory_space<vmem>>, %arg5: memref<1x1xf32, #tpu.memory_space<smem>>, %arg6: memref<128x1xf32, #tpu.memory_space<vmem>>) attributes {dimension_semantics = [#tpu.dimension_semantics<parallel>], iteration_bounds = array<i64: 2>, scalar_prefetch = 0 : i64, scratch_operands = 0 : i64, tpu.core_type = #tpu.core_type<tc>, window_params = [{transform_indices = @transform_0, window_bounds = array<i64: 128, 896>}, {pipeline_mode = #tpu.pipeline_mode<synchronous>, transform_indices = @transform_1, window_bounds = array<i64: 896, 1024>}, {pipeline_mode = #tpu.pipeline_mode<synchronous>, transform_indices = @transform_2, window_bounds = array<i64: 1, 1024>}, {pipeline_mode = #tpu.pipeline_mode<synchronous>, transform_indices = @transform_3, window_bounds = array<i64: 1, 1024>}, {transform_indices = @transform_4, window_bounds = array<i64: 1, 1>}, {transform_indices = @transform_5, window_bounds = array<i64: 128, 1>}]} {
    %c0 = arith.constant 0 : index
    %c0_0 = arith.constant 0 : index
    %0 = vector.load %arg1[%c0, %c0_0] : memref<128x896xbf16, #tpu.memory_space<vmem>>, vector<128x896xbf16>
    %c0_1 = arith.constant 0 : index
    %c0_2 = arith.constant 0 : index
    %1 = vector.load %arg2[%c0_1, %c0_2] : memref<896x1024xbf16, #tpu.memory_space<vmem>>, vector<896x1024xbf16>
    %cst = arith.constant dense<0.000000e+00> : vector<128x1024xf32>
    %2 = tpu.matmul %0, %1, %cst {dimension_numbers = #tpu.dot_dimension_numbers<[1], [0], [0], [1], [0, 0, 1, 1], [], []>} : vector<128x896xbf16>, vector<896x1024xbf16>, vector<128x1024xf32> -> vector<128x1024xf32>
    %c0_3 = arith.constant 0 : index
    %c0_4 = arith.constant 0 : index
    %3 = vector.load %arg3[%c0_3, %c0_4] : memref<1x1024xf32, #tpu.memory_space<vmem>>, vector<1x1024xf32>
    %4 = vector.broadcast %3 : vector<1x1024xf32> to vector<128x1024xf32>
    %5 = arith.addf %2, %4 : vector<128x1024xf32>
    %cst_5 = arith.constant 0.000000e+00 : f32
    %6 = vector.broadcast %cst_5 : f32 to vector<128x1024xf32>
    %7 = arith.cmpf ogt, %5, %6 : vector<128x1024xf32>
    %cst_6 = arith.constant 0.00999999977 : f32
    %8 = vector.broadcast %cst_6 : f32 to vector<128x1024xf32>
    %9 = arith.mulf %8, %5 : vector<128x1024xf32>
    %10 = arith.select %7, %5, %9 : vector<128x1024xi1>, vector<128x1024xf32>
    %c0_7 = arith.constant 0 : index
    %c0_8 = arith.constant 0 : index
    %11 = vector.load %arg4[%c0_7, %c0_8] : memref<1x1024xf32, #tpu.memory_space<vmem>>, vector<1x1024xf32>
    %12 = vector.broadcast %11 : vector<1x1024xf32> to vector<128x1024xf32>
    %13 = arith.mulf %10, %12 : vector<128x1024xf32>
    %cst_9 = arith.constant dense<0.000000e+00> : vector<128xf32>
    %14 = vector.multi_reduction <add>, %13, %cst_9 [1] : vector<128x1024xf32> to vector<128xf32>
    %15 = vector.shape_cast %14 : vector<128xf32> to vector<128x1xf32>
    %c0_10 = arith.constant 0 : index
    %c0_11 = arith.constant 0 : index
    %16 = memref.load %arg5[%c0_10, %c0_11] : memref<1x1xf32, #tpu.memory_space<smem>>
    %17 = vector.broadcast %16 : f32 to vector<128x1xf32>
    %18 = arith.addf %15, %17 : vector<128x1xf32>
    %c0_12 = arith.constant 0 : index
    %c0_13 = arith.constant 0 : index
    %19 = vector.load %arg6[%c0_12, %c0_13] : memref<128x1xf32, #tpu.memory_space<vmem>>, vector<128x1xf32>
    tpu.vector_store %arg6[%c0_12, %c0_13], %18 {strides = array<i32>} : memref<128x1xf32, #tpu.memory_space<vmem>>, vector<128x1xf32>,
    return
  }
  func.func @transform_0(%arg0: i32) -> (i32, i32) {
    %c0_i32 = arith.constant 0 : i32
    %c0_i32_0 = arith.constant 0 : i32
    return %arg0, %c0_i32 : i32, i32
  }
  func.func @transform_1(%arg0: i32) -> (i32, i32) {
    %c0_i32 = arith.constant 0 : i32
    %c0_i32_0 = arith.constant 0 : i32
    %c0_i32_1 = arith.constant 0 : i32
    return %c0_i32, %c0_i32_0 : i32, i32
  }
  func.func @transform_2(%arg0: i32) -> (i32, i32) {
    %c0_i32 = arith.constant 0 : i32
    %c0_i32_0 = arith.constant 0 : i32
    %c0_i32_1 = arith.constant 0 : i32
    return %c0_i32, %c0_i32_0 : i32, i32
  }
  func.func @transform_3(%arg0: i32) -> (i32, i32) {
    %c0_i32 = arith.constant 0 : i32
    %c0_i32_0 = arith.constant 0 : i32
    %c0_i32_1 = arith.constant 0 : i32
    return %c0_i32, %c0_i32_0 : i32, i32
  }
  func.func @transform_4(%arg0: i32) -> (i32, i32) {
    %c0_i32 = arith.constant 0 : i32
    %c0_i32_0 = arith.constant 0 : i32
    %c0_i32_1 = arith.constant 0 : i32
    return %c0_i32, %c0_i32_0 : i32, i32
  }
  func.func @transform_5(%arg0: i32) -> (i32, i32) {
    %c0_i32 = arith.constant 0 : i32
    %c0_i32_0 = arith.constant 0 : i32
    return %arg0, %c0_i32 : i32, i32
  }
}

</mosaic_0001>

<bundles_post_ra>
// kernel: tpu_custom_call.1
= control target key start
LH: loop header
LB: loop body
LE: loop exit
PB: predicated region body
PF: predicated region fallthrough
CT: control target
= control target key end

     0   :  { %s8732_s0 = inlined_call_operand.hbm [shape: bf16[256,896], index: 0, kind: input, shape index: {}]   ;;  %s8733_s1 = inlined_call_operand.hbm [shape: bf16[896,1024], index: 1, kind: input, shape index: {}]   ;;  %s8734_s2 = inlined_call_operand.hbm [shape: f32[1,1024], index: 2, kind: input, shape index: {}]   ;;  %s8735_s3 = inlined_call_operand.hbm [shape: f32[1,1024], index: 3, kind: input, shape index: {}]   ;;  %s8736_s4 = inlined_call_operand.<no memory space> [shape: f32[1,1], index: 4, kind: input, shape index: {}]   ;;  %s8737_s5 = inlined_call_operand.vmem [shape: f32[256,1], index: 5, kind: output, shape index: {}]  }
   0x1   :  { %10 = sst [smem:[#allocation2]] %s8736_s4 }
   0x2   :  { %11 = vsyncpa [#allocation4], 0 }
   0x3   :  { %13 = vsyncpa [#allocation4 + $0x1], 0 }
   0x4   :  { %14 = vsyncpa [#allocation6], 0 }
   0x5   :  { %15 = vsyncpa [#allocation9], 0  ;;  %s7459_s20 = smov 0   ;;  %s7461_s21 = smov 0  }
   0x6   :  { %s7463_s22 = smov 0   ;;  %s7465_s23 = smov 0  }
   0x7 LB: > { %s6009_s4 = sadd.s32 4294967295, %s7415_s23   ;;  %p41_p0 = scmp.ne.s32.totalorder %s7407_s21, %s7403_s20  ;;  %s7415_s23 = sphi %s7465_s23, %s8762_s23   ;;  %s7411_s22 = sphi %s7463_s22, %s8761_s22   ;;  %s7407_s21 = sphi %s7461_s21, %s8760_s21   ;;  %s7403_s20 = sphi %s7459_s20, %s8759_s20  }
   0x8   : > { %p7481_p1 = scmp.eq.s32.totalorder %s6009_s4, 0  ;;  %p6011_p2 = scmp.ge.s32.totalorder %s7415_s23, 1 }
   0x9   : > { %p162_p3 = scmp.lt.s32.totalorder %s7415_s23, 3  ;;  %s7417_s27 = smov [#allocation5]  }
   0xa   : > { %s8742_s24 = scalar_select %p7481_p1, 1, 0 }
   0xb   : > { %p7489_p4 = por %p7481_p1, %p41_p0  ;;  %p7493_p5 = pnand %p6011_p2, %p162_p3 }
   0xc   : > { %s174_s28 = sshll.u32 %s7417_s27, 4  ;;  %s7418_s30 = smov [#allocation7]   ;;  %s7497_s28 = int_to_ptr.vmem [resolvable:$true] %s174_s28 }
   0xd   : > { %s8743_s25 = scalar_select %p7489_p4, 1, 0 }
   0xe   : > { %s8744_s26 = scalar_select %p7493_p5, 1, 0 }
   0xf   : > { %p7060_p6 = pneg %p7493_p5  ;;  %s188_s6 = sshll.u32 %s7418_s30, 4  ;;  %s7507_s6 = int_to_ptr.vmem [resolvable:$true] %s188_s6 }
  0x10   : > { %s7419_s7 = smov [#allocation8]   ;;  %s7259_s11 = scalar_lea.hbm %s8733_s1, 57344 }
  0x11   : > { %p7503_p7 = pnand %p7060_p6, %p7481_p1  ;;  %s7509_s8 = sshll.u32 %s7419_s7, 4  ;;  %s200_s8 = int_to_ptr.vmem [resolvable:$true] %s7509_s8 }
  0x12   : > { %p7260_p8 = scmp.ne.s32.totalorder %s8733_s1, %s7259_s11  ;;  %p7266_p12 = scmp.lt.u32.totalorder %s7259_s11, %s8733_s1 }
  0x13   : > { %p7519_p9 = pneg %p7503_p7 }
  0x15   : > { %p7262_p10 = pnand %p7519_p9, %p7260_p8 }
  0x17   : > { %p7263_p11 = pneg %p7262_p10 }
  0x19   : > { %p7268_p13 = pnand %p7266_p12, %p7263_p11 }
  0x1b   : > { %7271 = shalt.err (!%p7268_p13)
}
  0x1c   : > { %s7272_s17 = scalar_lea.vmem %s7497_s28, 57344  ;;  %p7280_p6 = scmp.lt.s32.totalorder %s7497_s28, %s7497_s28 }
  0x1d   : > { %p7273_p0 = scmp.ne.s32.totalorder %s7497_s28, %s7272_s17  ;;  %p7281_p1 = scmp.lt.s32.totalorder %s7272_s17, %s7272_s17 }
  0x1f   : > { %p7275_p2 = pnand %p7273_p0, %p7519_p9  ;;  %p7282_p8 = por %p7281_p1, %p7280_p6 }
  0x21   : > { %p7276_p3 = pneg %p7275_p2 }
  0x23   : > { %p7283_p10 = pnand %p7282_p8, %p7276_p3 }
  0x25   : > { %7286 = shalt.err (!%p7283_p10)
}
  0x26   : > { %s7420_s18 = smov 512   ;;  %s7421_s19 = smov 32  }
  0x27   : > { %7063 = dma.hbm_to_vmem [thread:$0]  (!%p7503_p7), %s8733_s1, 57344, %s7497_s28, [#allocation6], %s7420_s18, %s7420_s18, %s7421_s19  }
  0x28   : > { %s7287_s9 = scalar_lea.hbm %s8734_s2, 128 }
  0x29   : > { %p7288_p1 = scmp.ne.s32.totalorder %s8734_s2, %s7287_s9  ;;  %p7294_p13 = scmp.lt.u32.totalorder %s7287_s9, %s8734_s2 }
  0x2b   : > { %p7290_p11 = pnand %p7288_p1, %p7519_p9 }
  0x2d   : > { %p7291_p12 = pneg %p7290_p11 }
  0x2f   : > { %p7296_p0 = pnand %p7294_p13, %p7291_p12 }
  0x31   : > { %7299 = shalt.err (!%p7296_p0)
}
  0x32   : > { %s7300_s28 = scalar_lea.vmem %s7507_s6, 128  ;;  %p7308_p8 = scmp.lt.s32.totalorder %s7507_s6, %s7507_s6 }
  0x33   : > { %p7301_p2 = scmp.ne.s32.totalorder %s7507_s6, %s7300_s28  ;;  %p7309_p10 = scmp.lt.s32.totalorder %s7300_s28, %s7300_s28 }
  0x35   : > { %p7303_p3 = pnand %p7301_p2, %p7519_p9  ;;  %p7310_p1 = por %p7309_p10, %p7308_p8 }
  0x37   : > { %p7304_p6 = pneg %p7303_p3 }
  0x39   : > { %p7311_p11 = pnand %p7310_p1, %p7304_p6 }
  0x3b   : > { %7314 = shalt.err (!%p7311_p11)
}
  0x3c   : > { %7066 = dma.hbm_to_vmem [thread:$0]  (!%p7503_p7), %s8734_s2, 128, %s7507_s6, [#allocation6]  }
  0x3d   : > { %s7315_s19 = scalar_lea.hbm %s8735_s3, 128 }
  0x3e   : > { %p7316_p12 = scmp.ne.s32.totalorder %s8735_s3, %s7315_s19  ;;  %p7322_p2 = scmp.lt.u32.totalorder %s7315_s19, %s8735_s3 }
  0x40   : > { %p7318_p13 = pnand %p7316_p12, %p7519_p9 }
  0x42   : > { %p7319_p0 = pneg %p7318_p13 }
  0x44   : > { %p7324_p3 = pnand %p7322_p2, %p7319_p0 }
  0x46   : > { %7327 = shalt.err (!%p7324_p3)
}
  0x47   : > { %s7328_s9 = scalar_lea.vmem %s200_s8, 128  ;;  %p7336_p1 = scmp.lt.s32.totalorder %s200_s8, %s200_s8 }
  0x48   : > { %p7329_p6 = scmp.ne.s32.totalorder %s200_s8, %s7328_s9  ;;  %p7337_p11 = scmp.lt.s32.totalorder %s7328_s9, %s7328_s9 }
  0x4a   : > { %p7331_p8 = pnand %p7329_p6, %p7519_p9  ;;  %p7338_p4 = por %p7337_p11, %p7336_p1 }
  0x4c   : > { %p7332_p10 = pneg %p7331_p8 }
  0x4e   : > { %p7339_p5 = pnand %p7338_p4, %p7332_p10 }
  0x50   : > { %7342 = shalt.err (!%p7339_p5)
}
  0x51   : > { %7069 = dma.hbm_to_vmem [thread:$0]  (!%p7503_p7), %s8735_s3, 128, %s200_s8, [#allocation9]  }
  0x52   : > { %s7583_s14 = sadd.s32 1, %s7415_s23   ;;  %s28_s12 = sadd.s32 1, %s7411_s22 }
  0x53   : > { %s25_s11 = ssub.s32 %s7415_s23, %s7583_s14  ;;  %p35_p5 = scmp.ne.s32.totalorder %s7411_s22, %s7407_s21 }
  0x54   : > { %p26_p4 = scmp.eq.s32.totalorder %s25_s11, 0  ;;  %p36_p9 = scmp.eq.s32.totalorder %s7415_s23, 0 }
  0x55   : > { %p7077_p12 = scmp.lt.s32.totalorder %s7415_s23, 2  ;;  %s213_s13 = sand.u32 1, %s7411_s22  }
  0x56   : > { %s7593_s29 = scalar_select %p26_p4, %s7411_s22, %s28_s12  }
  0x57   : > { %p37_p13 = por %p36_p9, %p35_p5  ;;  %s7043_s28 = smul.u32 448, %s213_s13 }
  0x58   : > { %s7044_s15 = smul.u32 7168, %s7415_s23  ;;  %s7608_s27 = scalar_lea.sflag [#allocation4], %s213_s13 }
  0x59   : > { %p7597_p0 = pnand %p7077_p12, %p37_p13  ;;  %s217_s19 = scalar_lea.vmem [#allocation3], %s7043_s28 }
  0x5a   : > { %s7604_s18 = scalar_lea.hbm %s8732_s0, %s7044_s15  ;;  %s225_s20 = sshll.u32 %s217_s19, 4  ;;  %s7606_s20 = int_to_ptr.vmem [resolvable:$true] %s225_s20 }
  0x5b   : > { %s7343_s30 = scalar_lea.hbm %s7604_s18, 7168  ;;  %p7345_p2 = pneg %p7597_p0 }
  0x5c   : > { %p7344_p7 = scmp.ne.s32.totalorder %s7604_s18, %s7343_s30  ;;  %s7348_s6 = scalar_lea.hbm %s8732_s0, 14336 }
  0x5d   : > { %p7349_p8 = scmp.lt.u32.totalorder %s7604_s18, %s8732_s0  ;;  %p7350_p10 = scmp.lt.u32.totalorder %s7348_s6, %s7343_s30 }
  0x5e   : > { %p7346_p3 = pnand %p7345_p2, %p7344_p7  ;;  %p7352_p11 = scmp.lt.u32.totalorder %s7343_s30, %s7604_s18 }
  0x5f   : > { %p7351_p1 = por %p7350_p10, %p7349_p8 }
  0x60   : > { %p7347_p6 = pneg %p7346_p3 }
  0x61   : > { %p7353_p4 = por %p7352_p11, %p7351_p1 }
  0x63   : > { %p7354_p5 = pnand %p7353_p4, %p7347_p6 }
  0x65   : > { %7357 = shalt.err (!%p7354_p5)
}
  0x66   : > { %s7358_s12 = scalar_lea.vmem %s7606_s20, 7168  ;;  %s7422_s13 = smov [#allocation3]  }
  0x67   : > { %p7359_p9 = scmp.ne.s32.totalorder %s7606_s20, %s7358_s12  ;;  %s7363_s28 = sshll.u32 %s7422_s13, 4  ;;  %s7364_s28 = int_to_ptr.vmem [resolvable:$false] %s7363_s28 }
  0x68   : > { %s7365_s15 = scalar_lea.vmem %s7364_s28, 14336  ;;  %p7366_p7 = scmp.lt.s32.totalorder %s7606_s20, %s7364_s28 }
  0x69   : > { %p7361_p12 = pnand %p7359_p9, %p7345_p2  ;;  %p7367_p3 = scmp.lt.s32.totalorder %s7365_s15, %s7358_s12 }
  0x6b   : > { %p7362_p13 = pneg %p7361_p12  ;;  %p7368_p8 = por %p7367_p3, %p7366_p7 }
  0x6d   : > { %p7369_p10 = pnand %p7368_p8, %p7362_p13 }
  0x6f   : > { %7372 = shalt.err (!%p7369_p10)
}
  0x70   : > { %s7423_s8 = smov 448   ;;  %s7424_s17 = smov 28  }
  0x71   : > { %7073 = dma.hbm_to_vmem [thread:$0]  (!%p7597_p0), %s7604_s18, 7168, %s7606_s20, %s7608_s27, %s7423_s8, %s7423_s8, %s7424_s17  }
  0x72   : > { %p8748_p2 = scmp.ne.s32.totalorder %s8744_s26, 0 }
  0x74   : > { %237 = sbr.rel (%p8748_p2) target bundleno = 1108 (0x454), region = 40 }
  0x7b   : > { %s239_s19 = sand.u32 1, %s7407_s21   ;;  %p8749_p6 = scmp.ne.s32.totalorder %s8743_s25, 0 }
  0x7c   : > { %s7045_s30 = smul.u32 448, %s239_s19  ;;  %s240_s7 = scalar_lea.sflag [#allocation4], %s239_s19 }
  0x7e   : > { %s7639_s9 = scalar_lea.vmem [#allocation3], %s7045_s30 }
  0x7f   : > { %7390 = dma.done.wait (%p8749_p6), %s240_s7, 7168  }
  0x80   : > { %7392 = vsyncadd (%p8749_p6), %s240_s7, 4294960128  ;;  %p8750_p1 = scmp.ne.s32.totalorder %s8742_s24, 0 }
  0x82   : > { %7394 = dma.done.wait (%p8750_p1), [#allocation6], 57472  }
  0x83   : > { %7396 = vsyncadd (%p8750_p1), [#allocation6], 4294909824 }
  0x84   : > { %7398 = dma.done.wait (%p8750_p1), [#allocation9], 128  }
  0x85   : > { %7400 = vsyncadd (%p8750_p1), [#allocation9], 4294967168  ;;  %v354_v0 = vld [vmem:[#allocation5] sm:$0xff]  ;;  %v355_v2 = vld [vmem:[#allocation5 + $0x8] sm:$0xff]  ;;  %s6023_s24 = sshll.u32 %s6009_s4, 4  ;;  %s5878_s25 = sld [smem:[#allocation2]] }
  0x86   : > { %v358_v1 = vld [vmem:[#allocation5 + $0x20] sm:$0xff]  ;;  %v359_v4 = vld [vmem:[#allocation5 + $0x28] sm:$0xff]  ;;  %p284_p0 = scmp.lt.s32.totalorder %s6023_s24, 31 }
  0x87   : > { %v6082_v3 = vcombine.high %v354_v0, %v358_v1  ;;  %v6081_v5 = vcombine.low %v354_v0, %v358_v1  ;;  %v362_v6 = vld [vmem:[#allocation5 + $0x40] sm:$0xff]  ;;  %v6084_v8 = vcombine.high %v355_v2, %v359_v4  ;;  %v6083_v9 = vcombine.low %v355_v2, %v359_v4  ;;  %v363_v11 = vld [vmem:[#allocation5 + $0x48] sm:$0xff] }
  0x88   : > { %v366_v7 = vld [vmem:[#allocation5 + $0x60] sm:$0xff]  ;;  %v367_v12 = vld [vmem:[#allocation5 + $0x68] sm:$0xff]  ;;  %s8764_s24 = smov (!%p284_p0, %s6023_s24), 31 }
  0x89   : > { %v6090_v10 = vcombine.high %v362_v6, %v366_v7  ;;  %v370_v13 = vld [vmem:[#allocation5 + $0x80] sm:$0xff]  ;;  %3372 = vmatprep.subr.bf16.mxu0 %v6082_v3  ;;  %v6092_v14 = vcombine.high %v363_v11, %v367_v12  ;;  %v371_v16 = vld [vmem:[#allocation5 + $0x88] sm:$0xff]  ;;  %3824 = vmatprep.subr.bf16.mxu1 %v6084_v8  ;;  %v6089_v18 = vcombine.low %v362_v6, %v366_v7  ;;  %s6024_s26 = sshll.u32 %s8764_s24, 3 }
  0x8a   : > { %v374_v15 = vld [vmem:[#allocation5 + $0xa0] sm:$0xff]  ;;  %v375_v17 = vld [vmem:[#allocation5 + $0xa8] sm:$0xff]  ;;  %3373 = vmatpush1.bf16.msra.mxu0 %v6081_v5  ;;  %3825 = vmatpush1.bf16.msra.mxu1 %v6083_v9  ;;  %v6091_v19 = vcombine.low %v363_v11, %v367_v12  ;;  %s8685_s20 = scalar_lea.vmem %s8737_s5, %s6024_s26 }
  0x8b   : > { %3374 = vmatprep.subr.bf16.mxu0 %v6090_v10  ;;  %v6098_v20 = vcombine.high %v370_v13, %v374_v15  ;;  %3826 = vmatprep.subr.bf16.mxu1 %v6092_v14  ;;  %v6100_v21 = vcombine.high %v371_v16, %v375_v17  ;;  %v378_v22 = vld [vmem:[#allocation5 + $0xc0] sm:$0xff]  ;;  %v379_v24 = vld [vmem:[#allocation5 + $0xc8] sm:$0xff]  ;;  %v6097_v26 = vcombine.low %v370_v13, %v374_v15 }
  0x8c   : > { %v382_v23 = vld [vmem:[#allocation5 + $0xe0] sm:$0xff]  ;;  %v383_v25 = vld [vmem:[#allocation5 + $0xe8] sm:$0xff]  ;;  %v6099_v27 = vcombine.low %v371_v16, %v375_v17 }
  0x8d   : > { %v6106_v28 = vcombine.high %v378_v22, %v382_v23  ;;  %v6108_v29 = vcombine.high %v379_v24, %v383_v25  ;;  %v386_v30 = vld [vmem:[#allocation5 + $0x100] sm:$0xff]  ;;  %v387_v32 = vld [vmem:[#allocation5 + $0x108] sm:$0xff]  ;;  %v6105_v34 = vcombine.low %v378_v22, %v382_v23  ;;  %v6107_v35 = vcombine.low %v379_v24, %v383_v25 }
  0x8e   : > { %3375 = vmatpush1.bf16.msra.mxu0 %v6089_v18  ;;  %3827 = vmatpush1.bf16.msra.mxu1 %v6091_v19  ;;  %v390_v31 = vld [vmem:[#allocation5 + $0x120] sm:$0xff]  ;;  %v391_v33 = vld [vmem:[#allocation5 + $0x128] sm:$0xff] }
  0x8f   : > { %3376 = vmatprep.subr.bf16.mxu0 %v6098_v20  ;;  %3828 = vmatprep.subr.bf16.mxu1 %v6100_v21  ;;  %v6114_v36 = vcombine.high %v386_v30, %v390_v31  ;;  %v6116_v37 = vcombine.high %v387_v32, %v391_v33  ;;  %v394_v38 = vld [vmem:[#allocation5 + $0x140] sm:$0xff]  ;;  %v395_v40 = vld [vmem:[#allocation5 + $0x148] sm:$0xff]  ;;  %v6113_v42 = vcombine.low %v386_v30, %v390_v31 }
  0x90   : > { %v398_v39 = vld [vmem:[#allocation5 + $0x160] sm:$0xff]  ;;  %v399_v41 = vld [vmem:[#allocation5 + $0x168] sm:$0xff]  ;;  %v6115_v43 = vcombine.low %v387_v32, %v391_v33 }
  0x91   : > { %v6122_v44 = vcombine.high %v394_v38, %v398_v39  ;;  %v6124_v45 = vcombine.high %v395_v40, %v399_v41  ;;  %v402_v46 = vld [vmem:[#allocation5 + $0x180] sm:$0xff]  ;;  %v403_v48 = vld [vmem:[#allocation5 + $0x188] sm:$0xff]  ;;  %v6121_v50 = vcombine.low %v394_v38, %v398_v39  ;;  %v6123_v51 = vcombine.low %v395_v40, %v399_v41 }
  0x92   : > { %3377 = vmatpush1.bf16.msra.mxu0 %v6097_v26  ;;  %3829 = vmatpush1.bf16.msra.mxu1 %v6099_v27  ;;  %v406_v47 = vld [vmem:[#allocation5 + $0x1a0] sm:$0xff]  ;;  %v407_v49 = vld [vmem:[#allocation5 + $0x1a8] sm:$0xff] }
  0x93   : > { %3378 = vmatprep.subr.bf16.mxu0 %v6106_v28  ;;  %3830 = vmatprep.subr.bf16.mxu1 %v6108_v29  ;;  %v6130_v52 = vcombine.high %v402_v46, %v406_v47  ;;  %v6132_v53 = vcombine.high %v403_v48, %v407_v49  ;;  %v410_v54 = vld [vmem:[#allocation5 + $0x1c0] sm:$0xff]  ;;  %v411_v57 = vld [vmem:[#allocation5 + $0x1c8] sm:$0xff]  ;;  %v6129_v59 = vcombine.low %v402_v46, %v406_v47 }
  0x94   : > { %v414_v55 = vld [vmem:[#allocation5 + $0x1e0] sm:$0xff]  ;;  %v415_v58 = vld [vmem:[#allocation5 + $0x1e8] sm:$0xff]  ;;  %v6131_v60 = vcombine.low %v403_v48, %v407_v49 }
  0x95   : > { %v7121_v56 = vld [vmem:[%s7639_s9 + $0x4] ss:$28 sps:$4 sm:$0xff]   ;;  %v6138_v61 = vcombine.high %v410_v54, %v414_v55  ;;  %v6140_v62 = vcombine.high %v411_v57, %v415_v58  ;;  %v419_v1 = vld [vmem:[#allocation5 + $0x208] sm:$0xff]  ;;  %v6137_v3 = vcombine.low %v410_v54, %v414_v55  ;;  %v6139_v4 = vcombine.low %v411_v57, %v415_v58 }
  0x96   : > { %3379 = vmatpush1.bf16.msra.mxu0 %v6105_v34  ;;  %3831 = vmatpush1.bf16.msra.mxu1 %v6107_v35  ;;  %v418_v63 = vld [vmem:[#allocation5 + $0x200] sm:$0xff]  ;;  %v423_v2 = vld [vmem:[#allocation5 + $0x228] sm:$0xff] }
  0x97   : > { %3380 = vmatprep.subr.bf16.mxu0 %v6114_v36  ;;  %3832 = vmatprep.subr.bf16.mxu1 %v6116_v37  ;;  %v422_v0 = vld [vmem:[#allocation5 + $0x220] sm:$0xff]  ;;  %v6148_v6 = vcombine.high %v419_v1, %v423_v2  ;;  %v427_v9 = vld [vmem:[#allocation5 + $0x248] sm:$0xff]  ;;  %v6147_v12 = vcombine.low %v419_v1, %v423_v2 }
  0x98   : > { %3404 = vmatprep.mubr.bf16.mxu0 %v7121_v56  ;;  %3856 = vmatprep.mubr.bf16.mxu1 %v7121_v56  ;;  %v6146_v5 = vcombine.high %v418_v63, %v422_v0  ;;  %v426_v7 = vld [vmem:[#allocation5 + $0x240] sm:$0xff]  ;;  %v431_v10 = vld [vmem:[#allocation5 + $0x268] sm:$0xff]  ;;  %v6145_v11 = vcombine.low %v418_v63, %v422_v0 }
  0x99   : > { %v430_v8 = vld [vmem:[#allocation5 + $0x260] sm:$0xff]  ;;  %v6156_v14 = vcombine.high %v427_v9, %v431_v10  ;;  %v435_v17 = vld [vmem:[#allocation5 + $0x288] sm:$0xff]  ;;  %v6155_v20 = vcombine.low %v427_v9, %v431_v10 }
  0x9a   : > { %3381 = vmatpush1.bf16.msra.mxu0 %v6113_v42  ;;  %3833 = vmatpush1.bf16.msra.mxu1 %v6115_v43  ;;  %v6154_v13 = vcombine.high %v426_v7, %v430_v8  ;;  %v434_v15 = vld [vmem:[#allocation5 + $0x280] sm:$0xff]  ;;  %v439_v18 = vld [vmem:[#allocation5 + $0x2a8] sm:$0xff]  ;;  %v6153_v19 = vcombine.low %v426_v7, %v430_v8 }
  0x9b   : > { %3382 = vmatprep.subr.bf16.mxu0 %v6122_v44  ;;  %3834 = vmatprep.subr.bf16.mxu1 %v6124_v45  ;;  %v438_v16 = vld [vmem:[#allocation5 + $0x2a0] sm:$0xff]  ;;  %v6164_v22 = vcombine.high %v435_v17, %v439_v18  ;;  %v443_v25 = vld [vmem:[#allocation5 + $0x2c8] sm:$0xff]  ;;  %v6163_v28 = vcombine.low %v435_v17, %v439_v18 }
  0x9c   : > { %v6162_v21 = vcombine.high %v434_v15, %v438_v16  ;;  %v442_v23 = vld [vmem:[#allocation5 + $0x2c0] sm:$0xff]  ;;  %v447_v26 = vld [vmem:[#allocation5 + $0x2e8] sm:$0xff]  ;;  %v6161_v27 = vcombine.low %v434_v15, %v438_v16  ;;  %v7124_v16 = vld [vmem:[%s7639_s9 + $0x3c] ss:$28 sps:$4 sm:$0xff]  }
  0x9d   : > { %v446_v24 = vld [vmem:[#allocation5 + $0x2e0] sm:$0xff]  ;;  %v6172_v30 = vcombine.high %v443_v25, %v447_v26  ;;  %v451_v33 = vld [vmem:[#allocation5 + $0x308] sm:$0xff]  ;;  %v6171_v36 = vcombine.low %v443_v25, %v447_v26 }
  0x9e   : > { %3383 = vmatpush1.bf16.msra.mxu0 %v6121_v50  ;;  %3835 = vmatpush1.bf16.msra.mxu1 %v6123_v51  ;;  %v6170_v29 = vcombine.high %v442_v23, %v446_v24  ;;  %v450_v31 = vld [vmem:[#allocation5 + $0x300] sm:$0xff]  ;;  %v455_v34 = vld [vmem:[#allocation5 + $0x328] sm:$0xff]  ;;  %v6169_v35 = vcombine.low %v442_v23, %v446_v24 }
  0x9f   : > { %3384 = vmatprep.subr.bf16.mxu0 %v6130_v52  ;;  %3836 = vmatprep.subr.bf16.mxu1 %v6132_v53  ;;  %v454_v32 = vld [vmem:[#allocation5 + $0x320] sm:$0xff]  ;;  %v6180_v38 = vcombine.high %v451_v33, %v455_v34  ;;  %v459_v41 = vld [vmem:[#allocation5 + $0x348] sm:$0xff]  ;;  %v6179_v44 = vcombine.low %v451_v33, %v455_v34  ;;  %v7127_v34 = vld [vmem:[%s7639_s9 + $0x74] ss:$28 sps:$4 sm:$0xff]  }
  0xa0   : > { %v6178_v37 = vcombine.high %v450_v31, %v454_v32  ;;  %v458_v39 = vld [vmem:[#allocation5 + $0x340] sm:$0xff]  ;;  %v463_v42 = vld [vmem:[#allocation5 + $0x368] sm:$0xff]  ;;  %v6177_v43 = vcombine.low %v450_v31, %v454_v32 }
  0xa1   : > { %v462_v40 = vld [vmem:[#allocation5 + $0x360] sm:$0xff]  ;;  %v6188_v46 = vcombine.high %v459_v41, %v463_v42  ;;  %v467_v49 = vld [vmem:[#allocation5 + $0x388] sm:$0xff]  ;;  %v6187_v52 = vcombine.low %v459_v41, %v463_v42 }
  0xa2   : > { %3385 = vmatpush1.bf16.msra.mxu0 %v6129_v59  ;;  %3837 = vmatpush1.bf16.msra.mxu1 %v6131_v60  ;;  %v6186_v45 = vcombine.high %v458_v39, %v462_v40  ;;  %v466_v47 = vld [vmem:[#allocation5 + $0x380] sm:$0xff]  ;;  %v471_v50 = vld [vmem:[#allocation5 + $0x3a8] sm:$0xff]  ;;  %v6185_v51 = vcombine.low %v458_v39, %v462_v40 }
  0xa3   : > { %3386 = vmatprep.subr.bf16.mxu0 %v6138_v61  ;;  %3838 = vmatprep.subr.bf16.mxu1 %v6140_v62  ;;  %v470_v48 = vld [vmem:[#allocation5 + $0x3a0] sm:$0xff]  ;;  %v6196_v54 = vcombine.high %v467_v49, %v471_v50  ;;  %v475_v57 = vld [vmem:[#allocation5 + $0x3c8] sm:$0xff]  ;;  %v6195_v60 = vcombine.low %v467_v49, %v471_v50 }
  0xa4   : > { %v6194_v53 = vcombine.high %v466_v47, %v470_v48  ;;  %v474_v55 = vld [vmem:[#allocation5 + $0x3c0] sm:$0xff]  ;;  %v479_v58 = vld [vmem:[#allocation5 + $0x3e8] sm:$0xff]  ;;  %v6193_v59 = vcombine.low %v466_v47, %v470_v48 }
  0xa5   : > { %v478_v56 = vld [vmem:[#allocation5 + $0x3e0] sm:$0xff]  ;;  %v6204_v62 = vcombine.high %v475_v57, %v479_v58  ;;  %v483_v1 = vld [vmem:[#allocation5 + $0x408] sm:$0xff] }
  0xa6   : > { %3387 = vmatpush1.bf16.msra.mxu0 %v6137_v3  ;;  %3839 = vmatpush1.bf16.msra.mxu1 %v6139_v4  ;;  %v6202_v61 = vcombine.high %v474_v55, %v478_v56  ;;  %v482_v63 = vld [vmem:[#allocation5 + $0x400] sm:$0xff]  ;;  %v487_v2 = vld [vmem:[#allocation5 + $0x428] sm:$0xff]  ;;  %v6201_v3 = vcombine.low %v474_v55, %v478_v56  ;;  %v6203_v4 = vcombine.low %v475_v57, %v479_v58 }
  0xa7   : > { %3388 = vmatprep.subr.bf16.mxu0 %v6146_v5  ;;  %3840 = vmatprep.subr.bf16.mxu1 %v6148_v6  ;;  %v486_v0 = vld [vmem:[#allocation5 + $0x420] sm:$0xff]  ;;  %v6212_v6 = vcombine.high %v483_v1, %v487_v2  ;;  %v491_v10 = vld [vmem:[#allocation5 + $0x448] sm:$0xff] }
  0xa8   : > { %v6210_v5 = vcombine.high %v482_v63, %v486_v0  ;;  %v490_v7 = vld [vmem:[#allocation5 + $0x440] sm:$0xff]  ;;  %v527_v47 = vld [vmem:[#allocation5 + $0x568] sm:$0xff] }
  0xa9   : > { %v494_v8 = vld [vmem:[#allocation5 + $0x460] sm:$0xff]  ;;  %v531_v55 = vld [vmem:[#allocation5 + $0x588] sm:$0xff] }
  0xaa   : > { %3389 = vmatpush1.bf16.msra.mxu0 %v6145_v11  ;;  %3841 = vmatpush1.bf16.msra.mxu1 %v6147_v12  ;;  %v7123_v9 = vld [vmem:[%s7639_s9] ss:$28 sps:$4 sm:$0xff]   ;;  %v495_v11 = vld [vmem:[#allocation5 + $0x468] sm:$0xff]  ;;  %v6209_v12 = vcombine.low %v482_v63, %v486_v0 }
  0xab   : > { %3390 = vmatprep.subr.bf16.mxu0 %v6154_v13  ;;  %3842 = vmatprep.subr.bf16.mxu1 %v6156_v14  ;;  %v6211_v13 = vcombine.low %v483_v1, %v487_v2  ;;  %v6218_v14 = vcombine.high %v490_v7, %v494_v8  ;;  %v6220_v15 = vcombine.high %v491_v10, %v495_v11  ;;  %v498_v17 = vld [vmem:[#allocation5 + $0x480] sm:$0xff]  ;;  %v535_v56 = vld [vmem:[#allocation5 + $0x5a8] sm:$0xff] }
  0xac   : > { %v502_v18 = vld [vmem:[#allocation5 + $0x4a0] sm:$0xff]  ;;  %v539_v0 = vld [vmem:[#allocation5 + $0x5c8] sm:$0xff] }
  0xad   : > { %v6226_v23 = vcombine.high %v498_v17, %v502_v18  ;;  %v506_v25 = vld [vmem:[#allocation5 + $0x4c0] sm:$0xff]  ;;  %v543_v1 = vld [vmem:[#allocation5 + $0x5e8] sm:$0xff] }
  0xae   : > { %3391 = vmatpush1.bf16.msra.mxu0 %v6153_v19  ;;  %3843 = vmatpush1.bf16.msra.mxu1 %v6155_v20  ;;  %v499_v19 = vld [vmem:[#allocation5 + $0x488] sm:$0xff]  ;;  %v510_v26 = vld [vmem:[#allocation5 + $0x4e0] sm:$0xff] }
  0xaf   : > { %3392 = vmatprep.subr.bf16.mxu0 %v6162_v21  ;;  %3844 = vmatprep.subr.bf16.mxu1 %v6164_v22  ;;  %v503_v20 = vld [vmem:[#allocation5 + $0x4a8] sm:$0xff]  ;;  %v6217_v21 = vcombine.low %v490_v7, %v494_v8  ;;  %v6219_v22 = vcombine.low %v491_v10, %v495_v11  ;;  %v6234_v32 = vcombine.high %v506_v25, %v510_v26  ;;  %v546_v7 = vld [vmem:[#allocation5 + $0x600] sm:$0xff] }
  0xb0   : > { %v6228_v24 = vcombine.high %v499_v19, %v503_v20  ;;  %v6227_v31 = vcombine.low %v499_v19, %v503_v20  ;;  %v6233_v39 = vcombine.low %v506_v25, %v510_v26  ;;  %v7132_v63 = vld [vmem:[%s7639_s9 + $0xa8] ss:$28 sps:$4 sm:$0xff]  }
  0xb1   : > { %v550_v8 = vld [vmem:[#allocation5 + $0x620] sm:$0xff]  ;;  %v551_v10 = vld [vmem:[#allocation5 + $0x628] sm:$0xff] }
  0xb2   : > { %3393 = vmatpush1.bf16.msra.mxu0 %v6161_v27  ;;  %3845 = vmatpush1.bf16.msra.mxu1 %v6163_v28  ;;  %v7126_v27 = vld [vmem:[%s7639_s9 + $0x38] ss:$28 sps:$4 sm:$0xff]   ;;  %v507_v28 = vld [vmem:[#allocation5 + $0x4c8] sm:$0xff]  ;;  %v6273_v20 = vcombine.low %v546_v7, %v550_v8  ;;  %v566_v25 = vld [vmem:[#allocation5 + $0x6a0] sm:$0xff] }
  0xb3   : > { %3394 = vmatprep.subr.bf16.mxu0 %v6170_v29  ;;  %3846 = vmatprep.subr.bf16.mxu1 %v6172_v30  ;;  %v511_v29 = vld [vmem:[#allocation5 + $0x4e8] sm:$0xff]  ;;  %v6225_v30 = vcombine.low %v498_v17, %v502_v18  ;;  %v7135_v17 = vld [vmem:[%s7639_s9 + $0xe0] ss:$28 sps:$4 sm:$0xff]  }
  0xb4   : > { %v6236_v33 = vcombine.high %v507_v28, %v511_v29  ;;  %v6235_v40 = vcombine.low %v507_v28, %v511_v29  ;;  %v555_v18 = vld [vmem:[#allocation5 + $0x648] sm:$0xff] }
  0xb5   : > { %v559_v19 = vld [vmem:[#allocation5 + $0x668] sm:$0xff] }
  0xb6   : > { %3395 = vmatpush1.bf16.msra.mxu0 %v6169_v35  ;;  %3847 = vmatpush1.bf16.msra.mxu1 %v6171_v36  ;;  %v514_v35 = vld [vmem:[#allocation5 + $0x500] sm:$0xff]  ;;  %v6284_v26 = vcombine.high %v555_v18, %v559_v19  ;;  %v567_v28 = vld [vmem:[#allocation5 + $0x6a8] sm:$0xff] }
  0xb7   : > { %3396 = vmatprep.subr.bf16.mxu0 %v6178_v37  ;;  %3848 = vmatprep.subr.bf16.mxu1 %v6180_v38  ;;  %v518_v36 = vld [vmem:[#allocation5 + $0x520] sm:$0xff]  ;;  %v515_v37 = vld [vmem:[#allocation5 + $0x508] sm:$0xff] }
  0xb8   : > { %v519_v38 = vld [vmem:[#allocation5 + $0x528] sm:$0xff]  ;;  %v6242_v41 = vcombine.high %v514_v35, %v518_v36  ;;  %v6241_v48 = vcombine.low %v514_v35, %v518_v36 }
  0xb9   : > { %v6244_v42 = vcombine.high %v515_v37, %v519_v38  ;;  %v6243_v49 = vcombine.low %v515_v37, %v519_v38  ;;  %v571_v35 = vld [vmem:[#allocation5 + $0x6c8] sm:$0xff] }
  0xba   : > { %3397 = vmatpush1.bf16.msra.mxu0 %v6177_v43  ;;  %3849 = vmatpush1.bf16.msra.mxu1 %v6179_v44  ;;  %v522_v43 = vld [vmem:[#allocation5 + $0x540] sm:$0xff]  ;;  %v575_v36 = vld [vmem:[#allocation5 + $0x6e8] sm:$0xff] }
  0xbb   : > { %3398 = vmatprep.subr.bf16.mxu0 %v6186_v45  ;;  %3850 = vmatprep.subr.bf16.mxu1 %v6188_v46  ;;  %v526_v44 = vld [vmem:[#allocation5 + $0x560] sm:$0xff]  ;;  %v7129_v45 = vld [vmem:[%s7639_s9 + $0x70] ss:$28 sps:$4 sm:$0xff]  }
  0xbc   : > { %v523_v46 = vld [vmem:[#allocation5 + $0x548] sm:$0xff]  ;;  %v6250_v50 = vcombine.high %v522_v43, %v526_v44  ;;  %v6249_v57 = vcombine.low %v522_v43, %v526_v44  ;;  %v6300_v43 = vcombine.high %v571_v35, %v575_v36  ;;  %v582_v44 = vld [vmem:[#allocation5 + $0x720] sm:$0xff] }
  0xbd   : > { %v6251_v58 = vcombine.low %v523_v46, %v527_v47 }
  0xbe   : > { %3399 = vmatpush1.bf16.msra.mxu0 %v6185_v51  ;;  %3851 = vmatpush1.bf16.msra.mxu1 %v6187_v52  ;;  %v6252_v51 = vcombine.high %v523_v46, %v527_v47  ;;  %v7130_v52 = vld [vmem:[%s7639_s9 + $0xac] ss:$28 sps:$4 sm:$0xff]  }
  0xbf   : > { %3400 = vmatprep.subr.bf16.mxu0 %v6194_v53  ;;  %3852 = vmatprep.subr.bf16.mxu1 %v6196_v54  ;;  %v530_v53 = vld [vmem:[#allocation5 + $0x580] sm:$0xff]  ;;  %v583_v46 = vld [vmem:[#allocation5 + $0x728] sm:$0xff] }
  0xc0   : > { %v534_v54 = vld [vmem:[#allocation5 + $0x5a0] sm:$0xff] }
  0xc1   : > { %v6257_v2 = vcombine.low %v530_v53, %v534_v54 }
  0xc2   : > { %3401 = vmatpush1.bf16.msra.mxu0 %v6193_v59  ;;  %3853 = vmatpush1.bf16.msra.mxu1 %v6195_v60  ;;  %v6258_v59 = vcombine.high %v530_v53, %v534_v54  ;;  %v6260_v60 = vcombine.high %v531_v55, %v535_v56  ;;  %v7141_v53 = vld [vmem:[%s7639_s9 + $0x150] ss:$28 sps:$4 sm:$0xff]  }
  0xc3   : > { %3402 = vmatprep.subr.bf16.mxu0 %v6202_v61  ;;  %3854 = vmatprep.subr.bf16.mxu1 %v6204_v62  ;;  %v538_v61 = vld [vmem:[#allocation5 + $0x5c0] sm:$0xff]  ;;  %v587_v54 = vld [vmem:[#allocation5 + $0x748] sm:$0xff] }
  0xc4   : > { %v542_v62 = vld [vmem:[#allocation5 + $0x5e0] sm:$0xff] }
  0xc5   : > { %v6265_v11 = vcombine.low %v538_v61, %v542_v62 }
  0xc6   : > { %3403 = vmatpush1.bf16.msra.mxu0 %v6201_v3  ;;  %3855 = vmatpush1.bf16.msra.mxu1 %v6203_v4  ;;  %v6259_v3 = vcombine.low %v531_v55, %v535_v56  ;;  %v6266_v4 = vcombine.high %v538_v61, %v542_v62  ;;  %v591_v55 = vld [vmem:[#allocation5 + $0x768] sm:$0xff]  ;;  %v594_v61 = vld [vmem:[#allocation5 + $0x780] sm:$0xff] }
  0xc7   : > { %3485 = vmatprep.subr.bf16.mxu0 %v6210_v5  ;;  %3937 = vmatprep.subr.bf16.mxu1 %v6212_v6  ;;  %v7133_v5 = vld [vmem:[%s7639_s9 + $0xe4] ss:$28 sps:$4 sm:$0xff]   ;;  %v6268_v6 = vcombine.high %v539_v0, %v543_v1 }
  0xc8   : > { %v598_v62 = vld [vmem:[#allocation5 + $0x7a0] sm:$0xff] }
  0xc9   : > { %3405 = vmatmul.mubr.bf16.vlgmr.msra.gmra.mrb[0].mxu0 %v7123_v9  ;;  %3857 = vmatmul.mubr.bf16.vlgmr.msra.gmra.mrb[0].mxu1 %v7123_v9  ;;  %v547_v9 = vld [vmem:[#allocation5 + $0x608] sm:$0xff] }
  0xca   : > { %3486 = vmatpush1.bf16.msra.mxu0 %v6209_v12  ;;  %3938 = vmatpush1.bf16.msra.mxu1 %v6211_v13  ;;  %v6267_v12 = vcombine.low %v539_v0, %v543_v1  ;;  %v6274_v13 = vcombine.high %v546_v7, %v550_v8  ;;  %v599_v0 = vld [vmem:[#allocation5 + $0x7a8] sm:$0xff] }
  0xcb   : > { %3487 = vmatprep.subr.bf16.mxu0 %v6218_v14  ;;  %3939 = vmatprep.subr.bf16.mxu1 %v6220_v15  ;;  %v6276_v14 = vcombine.high %v547_v9, %v551_v10  ;;  %v554_v15 = vld [vmem:[#allocation5 + $0x640] sm:$0xff]  ;;  %v603_v8 = vld [vmem:[#allocation5 + $0x7c8] sm:$0xff] }
  0xcc   : > { %3414 = vmatprep.mubr.bf16.mxu0 %v7124_v16  ;;  %3866 = vmatprep.mubr.bf16.mxu1 %v7124_v16  ;;  %v558_v16 = vld [vmem:[#allocation5 + $0x660] sm:$0xff] }
  0xcd   : > { %v6281_v29 = vcombine.low %v554_v15, %v558_v16  ;;  %v7144_v7 = vld [vmem:[%s7639_s9 + $0x188] ss:$28 sps:$4 sm:$0xff]  }
  0xce   : > { %3488 = vmatpush1.bf16.msra.mxu0 %v6217_v21  ;;  %3940 = vmatpush1.bf16.msra.mxu1 %v6219_v22  ;;  %v7136_v21 = vld [vmem:[%s7639_s9 + $0x11c] ss:$28 sps:$4 sm:$0xff]   ;;  %v562_v22 = vld [vmem:[#allocation5 + $0x680] sm:$0xff] }
  0xcf   : > { %3489 = vmatprep.subr.bf16.mxu0 %v6226_v23  ;;  %3941 = vmatprep.subr.bf16.mxu1 %v6228_v24  ;;  %v6275_v23 = vcombine.low %v547_v9, %v551_v10  ;;  %v6282_v24 = vcombine.high %v554_v15, %v558_v16  ;;  %v6289_v38 = vcombine.low %v562_v22, %v566_v25  ;;  %v607_v9 = vld [vmem:[#allocation5 + $0x7e8] sm:$0xff]  ;;  %v610_v15 = vld [vmem:[#allocation5 + $0x800] sm:$0xff] }
  0xd0   : > { %v6321_v10 = vcombine.low %v594_v61, %v598_v62  ;;  %v614_v16 = vld [vmem:[#allocation5 + $0x820] sm:$0xff] }
  0xd1   : > { %3415 = vmatmul.mubr.bf16.gmra.mrb[4].mxu0 %v7126_v27  ;;  %3867 = vmatmul.mubr.bf16.gmra.mrb[4].mxu1 %v7126_v27  ;;  %v563_v27 = vld [vmem:[#allocation5 + $0x688] sm:$0xff] }
  0xd2   : > { %3490 = vmatpush1.bf16.msra.mxu0 %v6225_v30  ;;  %3942 = vmatpush1.bf16.msra.mxu1 %v6227_v31  ;;  %v570_v30 = vld [vmem:[#allocation5 + $0x6c0] sm:$0xff]  ;;  %v6292_v37 = vcombine.high %v563_v27, %v567_v28 }
  0xd3   : > { %3491 = vmatprep.subr.bf16.mxu0 %v6234_v32  ;;  %3943 = vmatprep.subr.bf16.mxu1 %v6236_v33  ;;  %v574_v31 = vld [vmem:[#allocation5 + $0x6e0] sm:$0xff]  ;;  %v6283_v32 = vcombine.low %v555_v18, %v559_v19  ;;  %v7138_v33 = vld [vmem:[%s7639_s9 + $0x118] ss:$28 sps:$4 sm:$0xff]   ;;  %v615_v18 = vld [vmem:[#allocation5 + $0x828] sm:$0xff] }
  0xd4   : > { %3424 = vmatprep.mubr.bf16.mxu0 %v7127_v34  ;;  %3876 = vmatprep.mubr.bf16.mxu1 %v7127_v34  ;;  %v6290_v34 = vcombine.high %v562_v22, %v566_v25  ;;  %v6297_v47 = vcombine.low %v570_v30, %v574_v31  ;;  %v7145_v25 = vld [vmem:[%s7639_s9 + $0x8] ss:$28 sps:$4 sm:$0xff]  }
  0xd6   : > { %3492 = vmatpush1.bf16.msra.mxu0 %v6233_v39  ;;  %3944 = vmatpush1.bf16.msra.mxu1 %v6235_v40  ;;  %v7139_v39 = vld [vmem:[%s7639_s9 + $0x154] ss:$28 sps:$4 sm:$0xff]   ;;  %v578_v40 = vld [vmem:[#allocation5 + $0x700] sm:$0xff] }
  0xd7   : > { %3493 = vmatprep.subr.bf16.mxu0 %v6242_v41  ;;  %3945 = vmatprep.subr.bf16.mxu1 %v6244_v42  ;;  %v6291_v41 = vcombine.low %v563_v27, %v567_v28  ;;  %v6298_v42 = vcombine.high %v570_v30, %v574_v31  ;;  %v6305_v56 = vcombine.low %v578_v40, %v582_v44  ;;  %v623_v27 = vld [vmem:[#allocation5 + $0x868] sm:$0xff] }
  0xd8   : > { %v6337_v28 = vcombine.low %v610_v15, %v614_v16 }
  0xd9   : > { %3425 = vmatmul.mubr.bf16.gmra.mrb[8].mxu0 %v7129_v45  ;;  %3877 = vmatmul.mubr.bf16.gmra.mrb[8].mxu1 %v7129_v45  ;;  %v579_v45 = vld [vmem:[#allocation5 + $0x708] sm:$0xff] }
  0xda   : > { %3494 = vmatpush1.bf16.msra.mxu0 %v6241_v48  ;;  %3946 = vmatpush1.bf16.msra.mxu1 %v6243_v49  ;;  %v6299_v48 = vcombine.low %v571_v35, %v575_v36  ;;  %v6306_v49 = vcombine.high %v578_v40, %v582_v44  ;;  %v627_v35 = vld [vmem:[#allocation5 + $0x888] sm:$0xff] }
  0xdb   : > { %3495 = vmatprep.subr.bf16.mxu0 %v6250_v50  ;;  %3947 = vmatprep.subr.bf16.mxu1 %v6252_v51  ;;  %v6308_v50 = vcombine.high %v579_v45, %v583_v46  ;;  %v586_v51 = vld [vmem:[#allocation5 + $0x740] sm:$0xff]  ;;  %v631_v36 = vld [vmem:[#allocation5 + $0x8a8] sm:$0xff] }
  0xdc   : > { %3434 = vmatprep.mubr.bf16.mxu0 %v7130_v52  ;;  %3886 = vmatprep.mubr.bf16.mxu1 %v7130_v52  ;;  %v590_v52 = vld [vmem:[#allocation5 + $0x760] sm:$0xff]  ;;  %v6356_v40 = vcombine.high %v627_v35, %v631_v36  ;;  %v635_v44 = vld [vmem:[#allocation5 + $0x8c8] sm:$0xff] }
  0xdd   : > { %v6313_v1 = vcombine.low %v586_v51, %v590_v52 }
  0xde   : > { %3496 = vmatpush1.bf16.msra.mxu0 %v6249_v57  ;;  %3948 = vmatpush1.bf16.msra.mxu1 %v6251_v58  ;;  %v6307_v57 = vcombine.low %v579_v45, %v583_v46  ;;  %v6314_v58 = vcombine.high %v586_v51, %v590_v52  ;;  %v639_v45 = vld [vmem:[#allocation5 + $0x8e8] sm:$0xff]  ;;  %v642_v51 = vld [vmem:[#allocation5 + $0x900] sm:$0xff] }
  0xdf   : > { %3497 = vmatprep.subr.bf16.mxu0 %v6258_v59  ;;  %3949 = vmatprep.subr.bf16.mxu1 %v6260_v60  ;;  %v6316_v59 = vcombine.high %v587_v54, %v591_v55  ;;  %v7142_v60 = vld [vmem:[%s7639_s9 + $0x18c] ss:$28 sps:$4 sm:$0xff]   ;;  %v646_v52 = vld [vmem:[#allocation5 + $0x920] sm:$0xff] }
  0xe1   : > { %3435 = vmatmul.mubr.bf16.gmra.mrb[12].mxu0 %v7132_v63  ;;  %3887 = vmatmul.mubr.bf16.gmra.mrb[12].mxu1 %v7132_v63  ;;  %v595_v63 = vld [vmem:[#allocation5 + $0x788] sm:$0xff] }
  0xe2   : > { %3498 = vmatpush1.bf16.msra.mxu0 %v6257_v2  ;;  %3950 = vmatpush1.bf16.msra.mxu1 %v6259_v3  ;;  %v6315_v2 = vcombine.low %v587_v54, %v591_v55  ;;  %v6322_v3 = vcombine.high %v594_v61, %v598_v62  ;;  %v647_v54 = vld [vmem:[#allocation5 + $0x928] sm:$0xff]  ;;  %v7153_v61 = vld [vmem:[%s7639_s9 + $0x78] ss:$28 sps:$4 sm:$0xff]  }
  0xe3   : > { %3499 = vmatprep.subr.bf16.mxu0 %v6266_v4  ;;  %3951 = vmatprep.subr.bf16.mxu1 %v6268_v6  ;;  %v6324_v4 = vcombine.high %v595_v63, %v599_v0  ;;  %v606_v6 = vld [vmem:[#allocation5 + $0x7e0] sm:$0xff]  ;;  %v651_v62 = vld [vmem:[#allocation5 + $0x948] sm:$0xff] }
  0xe4   : > { %3444 = vmatprep.mubr.bf16.mxu0 %v7133_v5  ;;  %3896 = vmatprep.mubr.bf16.mxu1 %v7133_v5  ;;  %v602_v5 = vld [vmem:[#allocation5 + $0x7c0] sm:$0xff] }
  0xe5   : > { %v6329_v19 = vcombine.low %v602_v5, %v606_v6 }
  0xe6   : > { %3500 = vmatpush1.bf16.msra.mxu0 %v6265_v11  ;;  %3952 = vmatpush1.bf16.msra.mxu1 %v6267_v12  ;;  %v6323_v11 = vcombine.low %v595_v63, %v599_v0  ;;  %v6330_v12 = vcombine.high %v602_v5, %v606_v6  ;;  %v655_v63 = vld [vmem:[#allocation5 + $0x968] sm:$0xff]  ;;  %v6369_v0 = vcombine.low %v642_v51, %v646_v52  ;;  %v658_v5 = vld [vmem:[#allocation5 + $0x980] sm:$0xff] }
  0xe7   : > { %3501 = vmatprep.subr.bf16.mxu0 %v6274_v13  ;;  %3953 = vmatprep.subr.bf16.mxu1 %v6276_v14  ;;  %v6332_v13 = vcombine.high %v603_v8, %v607_v9  ;;  %v7147_v14 = vld [vmem:[%s7639_s9 + $0xc] ss:$28 sps:$4 sm:$0xff]   ;;  %v662_v6 = vld [vmem:[#allocation5 + $0x9a0] sm:$0xff] }
  0xe9   : > { %3445 = vmatmul.mubr.bf16.gmra.mrb[16].mxu0 %v7135_v17  ;;  %3897 = vmatmul.mubr.bf16.gmra.mrb[16].mxu1 %v7135_v17  ;;  %v611_v17 = vld [vmem:[#allocation5 + $0x808] sm:$0xff] }
  0xea   : > { %3502 = vmatpush1.bf16.msra.mxu0 %v6273_v20  ;;  %3954 = vmatpush1.bf16.msra.mxu1 %v6275_v23  ;;  %v6331_v20 = vcombine.low %v603_v8, %v607_v9  ;;  %v6340_v22 = vcombine.high %v611_v17, %v615_v18  ;;  %v618_v23 = vld [vmem:[#allocation5 + $0x840] sm:$0xff]  ;;  %v663_v8 = vld [vmem:[#allocation5 + $0x9a8] sm:$0xff] }
  0xeb   : > { %3503 = vmatprep.subr.bf16.mxu0 %v6282_v24  ;;  %3955 = vmatprep.subr.bf16.mxu1 %v6284_v26  ;;  %v622_v24 = vld [vmem:[#allocation5 + $0x860] sm:$0xff]  ;;  %v619_v26 = vld [vmem:[#allocation5 + $0x848] sm:$0xff] }
  0xec   : > { %3454 = vmatprep.mubr.bf16.mxu0 %v7136_v21  ;;  %3906 = vmatprep.mubr.bf16.mxu1 %v7136_v21  ;;  %v6338_v21 = vcombine.high %v610_v15, %v614_v16  ;;  %v6346_v30 = vcombine.high %v618_v23, %v622_v24  ;;  %v6348_v31 = vcombine.high %v619_v26, %v623_v27  ;;  %v7156_v15 = vld [vmem:[%s7639_s9 + $0xb0] ss:$28 sps:$4 sm:$0xff]  }
  0xed   : > { %v667_v16 = vld [vmem:[#allocation5 + $0x9c8] sm:$0xff] }
  0xee   : > { %3504 = vmatpush1.bf16.msra.mxu0 %v6281_v29  ;;  %3956 = vmatpush1.bf16.msra.mxu1 %v6283_v32  ;;  %v6339_v29 = vcombine.low %v611_v17, %v615_v18  ;;  %v7148_v32 = vld [vmem:[%s7639_s9 + $0x44] ss:$28 sps:$4 sm:$0xff]   ;;  %v671_v17 = vld [vmem:[#allocation5 + $0x9e8] sm:$0xff]  ;;  %v6385_v18 = vcombine.low %v658_v5, %v662_v6 }
  0xef   : > { %3505 = vmatprep.subr.bf16.mxu0 %v6290_v34  ;;  %3957 = vmatprep.subr.bf16.mxu1 %v6292_v37  ;;  %v630_v34 = vld [vmem:[#allocation5 + $0x8a0] sm:$0xff]  ;;  %v6345_v37 = vcombine.low %v618_v23, %v622_v24 }
  0xf0   : > { %v674_v23 = vld [vmem:[#allocation5 + $0xa00] sm:$0xff] }
  0xf1   : > { %3455 = vmatmul.mubr.bf16.gmra.mrb[20].mxu0 %v7138_v33  ;;  %3907 = vmatmul.mubr.bf16.gmra.mrb[20].mxu1 %v7138_v33  ;;  %v626_v33 = vld [vmem:[#allocation5 + $0x880] sm:$0xff] }
  0xf2   : > { %3506 = vmatpush1.bf16.msra.mxu0 %v6289_v38  ;;  %3958 = vmatpush1.bf16.msra.mxu1 %v6291_v41  ;;  %v6347_v38 = vcombine.low %v619_v26, %v623_v27  ;;  %v634_v41 = vld [vmem:[#allocation5 + $0x8c0] sm:$0xff]  ;;  %v6353_v46 = vcombine.low %v626_v33, %v630_v34  ;;  %v679_v26 = vld [vmem:[#allocation5 + $0xa28] sm:$0xff] }
  0xf3   : > { %3507 = vmatprep.subr.bf16.mxu0 %v6298_v42  ;;  %3959 = vmatprep.subr.bf16.mxu1 %v6300_v43  ;;  %v638_v42 = vld [vmem:[#allocation5 + $0x8e0] sm:$0xff] }
  0xf4   : > { %3464 = vmatprep.mubr.bf16.mxu0 %v7139_v39  ;;  %3916 = vmatprep.mubr.bf16.mxu1 %v7139_v39  ;;  %v6354_v39 = vcombine.high %v626_v33, %v630_v34  ;;  %v7150_v43 = vld [vmem:[%s7639_s9 + $0x40] ss:$28 sps:$4 sm:$0xff]   ;;  %v6361_v55 = vcombine.low %v634_v41, %v638_v42  ;;  %v7159_v33 = vld [vmem:[%s7639_s9 + $0xe8] ss:$28 sps:$4 sm:$0xff]  }
  0xf5   : > { %v678_v24 = vld [vmem:[#allocation5 + $0xa20] sm:$0xff]  ;;  %v683_v34 = vld [vmem:[#allocation5 + $0xa48] sm:$0xff] }
  0xf6   : > { %3508 = vmatpush1.bf16.msra.mxu0 %v6297_v47  ;;  %3960 = vmatpush1.bf16.msra.mxu1 %v6299_v48  ;;  %v6355_v47 = vcombine.low %v627_v35, %v631_v36  ;;  %v6362_v48 = vcombine.high %v634_v41, %v638_v42  ;;  %v687_v35 = vld [vmem:[#allocation5 + $0xa68] sm:$0xff]  ;;  %v6401_v36 = vcombine.low %v674_v23, %v678_v24  ;;  %v690_v41 = vld [vmem:[#allocation5 + $0xa80] sm:$0xff] }
  0xf7   : > { %3509 = vmatprep.subr.bf16.mxu0 %v6306_v49  ;;  %3961 = vmatprep.subr.bf16.mxu1 %v6308_v50  ;;  %v6364_v49 = vcombine.high %v635_v44, %v639_v45  ;;  %v7151_v50 = vld [vmem:[%s7639_s9 + $0x7c] ss:$28 sps:$4 sm:$0xff]   ;;  %v694_v42 = vld [vmem:[#allocation5 + $0xaa0] sm:$0xff] }
  0xf9   : > { %3465 = vmatmul.mubr.bf16.gmra.mrb[24].mxu0 %v7141_v53  ;;  %3917 = vmatmul.mubr.bf16.gmra.mrb[24].mxu1 %v7141_v53  ;;  %v643_v53 = vld [vmem:[#allocation5 + $0x908] sm:$0xff] }
  0xfa   : > { %3510 = vmatpush1.bf16.msra.mxu0 %v6305_v56  ;;  %3962 = vmatpush1.bf16.msra.mxu1 %v6307_v57  ;;  %v6363_v56 = vcombine.low %v635_v44, %v639_v45  ;;  %v6370_v57 = vcombine.high %v642_v51, %v646_v52  ;;  %v695_v44 = vld [vmem:[#allocation5 + $0xaa8] sm:$0xff]  ;;  %v7162_v51 = vld [vmem:[%s7639_s9 + $0x120] ss:$28 sps:$4 sm:$0xff]  }
  0xfb   : > { %3511 = vmatprep.subr.bf16.mxu0 %v6314_v58  ;;  %3963 = vmatprep.subr.bf16.mxu1 %v6316_v59  ;;  %v6372_v58 = vcombine.high %v643_v53, %v647_v54  ;;  %v650_v59 = vld [vmem:[#allocation5 + $0x940] sm:$0xff]  ;;  %v699_v52 = vld [vmem:[#allocation5 + $0xac8] sm:$0xff] }
  0xfc   : > { %3474 = vmatprep.mubr.bf16.mxu0 %v7142_v60  ;;  %3926 = vmatprep.mubr.bf16.mxu1 %v7142_v60  ;;  %v654_v60 = vld [vmem:[#allocation5 + $0x960] sm:$0xff] }
  0xfd   : > { %v6377_v9 = vcombine.low %v650_v59, %v654_v60 }
  0xfe   : > { %3512 = vmatpush1.bf16.msra.mxu0 %v6313_v1  ;;  %3964 = vmatpush1.bf16.msra.mxu1 %v6315_v2  ;;  %v6371_v1 = vcombine.low %v643_v53, %v647_v54  ;;  %v6378_v2 = vcombine.high %v650_v59, %v654_v60  ;;  %v703_v53 = vld [vmem:[#allocation5 + $0xae8] sm:$0xff]  ;;  %v6417_v54 = vcombine.low %v690_v41, %v694_v42  ;;  %v706_v59 = vld [vmem:[#allocation5 + $0xb00] sm:$0xff] }
  0xff   : > { %3513 = vmatprep.subr.bf16.mxu0 %v6322_v3  ;;  %3965 = vmatprep.subr.bf16.mxu1 %v6324_v4  ;;  %v6380_v3 = vcombine.high %v651_v62, %v655_v63  ;;  %v7154_v4 = vld [vmem:[%s7639_s9 + $0xb4] ss:$28 sps:$4 sm:$0xff]   ;;  %v710_v60 = vld [vmem:[#allocation5 + $0xb20] sm:$0xff] }
 0x101   : > { %3475 = vmatmul.mubr.bf16.gmra.mrb[28].mxu0 %v7144_v7  ;;  %3927 = vmatmul.mubr.bf16.gmra.mrb[28].mxu1 %v7144_v7  ;;  %v659_v7 = vld [vmem:[#allocation5 + $0x988] sm:$0xff] }
 0x102   : > { %3514 = vmatpush1.bf16.msra.mxu0 %v6321_v10  ;;  %3966 = vmatpush1.bf16.msra.mxu1 %v6323_v11  ;;  %v6379_v10 = vcombine.low %v651_v62, %v655_v63  ;;  %v6386_v11 = vcombine.high %v658_v5, %v662_v6  ;;  %v711_v62 = vld [vmem:[#allocation5 + $0xb28] sm:$0xff]  ;;  %v7165_v5 = vld [vmem:[%s7639_s9 + $0x158] ss:$28 sps:$4 sm:$0xff]  }
 0x103   : > { %3515 = vmatprep.subr.bf16.mxu0 %v6330_v12  ;;  %3967 = vmatprep.subr.bf16.mxu1 %v6332_v13  ;;  %v6388_v12 = vcombine.high %v659_v7, %v663_v8  ;;  %v666_v13 = vld [vmem:[#allocation5 + $0x9c0] sm:$0xff]  ;;  %v715_v6 = vld [vmem:[#allocation5 + $0xb48] sm:$0xff] }
 0x104   : > { %3517 = vmatprep.mubr.bf16.mxu0 %v7147_v14  ;;  %3969 = vmatprep.mubr.bf16.mxu1 %v7147_v14  ;;  %v670_v14 = vld [vmem:[#allocation5 + $0x9e0] sm:$0xff] }
 0x105   : > { %v6393_v27 = vcombine.low %v666_v13, %v670_v14 }
 0x106   : > { %3516 = vmatpush1.bf16.msra.mxu0 %v6329_v19  ;;  %3968 = vmatpush1.bf16.msra.mxu1 %v6331_v20  ;;  %v6387_v19 = vcombine.low %v659_v7, %v663_v8  ;;  %v6394_v20 = vcombine.high %v666_v13, %v670_v14  ;;  %v719_v7 = vld [vmem:[#allocation5 + $0xb68] sm:$0xff]  ;;  %v6433_v8 = vcombine.low %v706_v59, %v710_v60  ;;  %v722_v13 = vld [vmem:[#allocation5 + $0xb80] sm:$0xff] }
 0x107   : > { %3598 = vmatprep.subr.bf16.mxu0 %v6338_v21  ;;  %4050 = vmatprep.subr.bf16.mxu1 %v6340_v22  ;;  %v6396_v21 = vcombine.high %v667_v16, %v671_v17  ;;  %v7157_v22 = vld [vmem:[%s7639_s9 + $0xec] ss:$28 sps:$4 sm:$0xff]   ;;  %v726_v14 = vld [vmem:[#allocation5 + $0xba0] sm:$0xff] }
 0x109   : > { %3518 = vmatmul.mubr.bf16.vlgmr.msra.gmra.mrb[0].mxu0 %v7145_v25  ;;  %3970 = vmatmul.mubr.bf16.vlgmr.msra.gmra.mrb[0].mxu1 %v7145_v25  ;;  %v675_v25 = vld [vmem:[#allocation5 + $0xa08] sm:$0xff] }
 0x10a   : > { %3599 = vmatpush1.bf16.msra.mxu0 %v6337_v28  ;;  %4051 = vmatpush1.bf16.msra.mxu1 %v6339_v29  ;;  %v6395_v28 = vcombine.low %v667_v16, %v671_v17  ;;  %v6402_v29 = vcombine.high %v674_v23, %v678_v24  ;;  %v727_v16 = vld [vmem:[#allocation5 + $0xba8] sm:$0xff] }
 0x10b   : > { %3600 = vmatprep.subr.bf16.mxu0 %v6346_v30  ;;  %4052 = vmatprep.subr.bf16.mxu1 %v6348_v31  ;;  %v6404_v30 = vcombine.high %v675_v25, %v679_v26  ;;  %v682_v31 = vld [vmem:[#allocation5 + $0xa40] sm:$0xff]  ;;  %v7168_v23 = vld [vmem:[%s7639_s9 + $0x190] ss:$28 sps:$4 sm:$0xff]  }
 0x10c   : > { %3527 = vmatprep.mubr.bf16.mxu0 %v7148_v32  ;;  %3979 = vmatprep.mubr.bf16.mxu1 %v7148_v32  ;;  %v686_v32 = vld [vmem:[#allocation5 + $0xa60] sm:$0xff]  ;;  %v731_v24 = vld [vmem:[#allocation5 + $0xbc8] sm:$0xff] }
 0x10d   : > { %v6409_v45 = vcombine.low %v682_v31, %v686_v32 }
 0x10e   : > { %3601 = vmatpush1.bf16.msra.mxu0 %v6345_v37  ;;  %4053 = vmatpush1.bf16.msra.mxu1 %v6347_v38  ;;  %v6403_v37 = vcombine.low %v675_v25, %v679_v26  ;;  %v6410_v38 = vcombine.high %v682_v31, %v686_v32  ;;  %v735_v25 = vld [vmem:[#allocation5 + $0xbe8] sm:$0xff]  ;;  %v6449_v26 = vcombine.low %v722_v13, %v726_v14  ;;  %v738_v31 = vld [vmem:[#allocation5 + $0xc00] sm:$0xff] }
 0x10f   : > { %3602 = vmatprep.subr.bf16.mxu0 %v6354_v39  ;;  %4054 = vmatprep.subr.bf16.mxu1 %v6356_v40  ;;  %v6412_v39 = vcombine.high %v683_v34, %v687_v35  ;;  %v7160_v40 = vld [vmem:[%s7639_s9 + $0x124] ss:$28 sps:$4 sm:$0xff]  }
 0x110   : > { %v742_v32 = vld [vmem:[#allocation5 + $0xc20] sm:$0xff] }
 0x111   : > { %3528 = vmatmul.mubr.bf16.gmra.mrb[4].mxu0 %v7150_v43  ;;  %3980 = vmatmul.mubr.bf16.gmra.mrb[4].mxu1 %v7150_v43  ;;  %v691_v43 = vld [vmem:[#allocation5 + $0xa88] sm:$0xff] }
 0x112   : > { %3603 = vmatpush1.bf16.msra.mxu0 %v6353_v46  ;;  %4055 = vmatpush1.bf16.msra.mxu1 %v6355_v47  ;;  %v6411_v46 = vcombine.low %v683_v34, %v687_v35  ;;  %v6418_v47 = vcombine.high %v690_v41, %v694_v42  ;;  %v743_v34 = vld [vmem:[#allocation5 + $0xc28] sm:$0xff]  ;;  %v750_v41 = vld [vmem:[#allocation5 + $0xc60] sm:$0xff]  ;;  %v6465_v42 = vcombine.low %v738_v31, %v742_v32 }
 0x113   : > { %3604 = vmatprep.subr.bf16.mxu0 %v6362_v48  ;;  %4056 = vmatprep.subr.bf16.mxu1 %v6364_v49  ;;  %v6420_v48 = vcombine.high %v691_v43, %v695_v44  ;;  %v698_v49 = vld [vmem:[#allocation5 + $0xac0] sm:$0xff] }
 0x114   : > { %3537 = vmatprep.mubr.bf16.mxu0 %v7151_v50  ;;  %3989 = vmatprep.mubr.bf16.mxu1 %v7151_v50  ;;  %v702_v50 = vld [vmem:[#allocation5 + $0xae0] sm:$0xff] }
 0x115   : > { %v6425_v63 = vcombine.low %v698_v49, %v702_v50 }
 0x116   : > { %3605 = vmatpush1.bf16.msra.mxu0 %v6361_v55  ;;  %4057 = vmatpush1.bf16.msra.mxu1 %v6363_v56  ;;  %v6419_v55 = vcombine.low %v691_v43, %v695_v44  ;;  %v6426_v56 = vcombine.high %v698_v49, %v702_v50  ;;  %v747_v43 = vld [vmem:[#allocation5 + $0xc48] sm:$0xff]  ;;  %v758_v49 = vld [vmem:[#allocation5 + $0xca0] sm:$0xff] }
 0x117   : > { %3606 = vmatprep.subr.bf16.mxu0 %v6370_v57  ;;  %4058 = vmatprep.subr.bf16.mxu1 %v6372_v58  ;;  %v6428_v57 = vcombine.high %v699_v52, %v703_v53  ;;  %v7163_v58 = vld [vmem:[%s7639_s9 + $0x15c] ss:$28 sps:$4 sm:$0xff]   ;;  %v751_v44 = vld [vmem:[#allocation5 + $0xc68] sm:$0xff] }
 0x118   : > { %v6476_v50 = vcombine.high %v747_v43, %v751_v44 }
 0x119   : > { %3538 = vmatmul.mubr.bf16.gmra.mrb[8].mxu0 %v7153_v61  ;;  %3990 = vmatmul.mubr.bf16.gmra.mrb[8].mxu1 %v7153_v61  ;;  %v707_v61 = vld [vmem:[#allocation5 + $0xb08] sm:$0xff] }
 0x11a   : > { %3607 = vmatpush1.bf16.msra.mxu0 %v6369_v0  ;;  %4059 = vmatpush1.bf16.msra.mxu1 %v6371_v1  ;;  %v6427_v0 = vcombine.low %v699_v52, %v703_v53  ;;  %v6434_v1 = vcombine.high %v706_v59, %v710_v60  ;;  %v759_v52 = vld [vmem:[#allocation5 + $0xca8] sm:$0xff]  ;;  %v766_v59 = vld [vmem:[#allocation5 + $0xce0] sm:$0xff] }
 0x11b   : > { %3608 = vmatprep.subr.bf16.mxu0 %v6378_v2  ;;  %4060 = vmatprep.subr.bf16.mxu1 %v6380_v3  ;;  %v6436_v2 = vcombine.high %v707_v61, %v711_v62  ;;  %v714_v3 = vld [vmem:[#allocation5 + $0xb40] sm:$0xff] }
 0x11c   : > { %3547 = vmatprep.mubr.bf16.mxu0 %v7154_v4  ;;  %3999 = vmatprep.mubr.bf16.mxu1 %v7154_v4  ;;  %v718_v4 = vld [vmem:[#allocation5 + $0xb60] sm:$0xff] }
 0x11d   : > { %v6441_v17 = vcombine.low %v714_v3, %v718_v4  ;;  %v7175_v60 = vld [vmem:[%s7639_s9 + $0x84] ss:$28 sps:$4 sm:$0xff]  }
 0x11e   : > { %3609 = vmatpush1.bf16.msra.mxu0 %v6377_v9  ;;  %4061 = vmatpush1.bf16.msra.mxu1 %v6379_v10  ;;  %v6435_v9 = vcombine.low %v707_v61, %v711_v62  ;;  %v6442_v10 = vcombine.high %v714_v3, %v718_v4  ;;  %v763_v61 = vld [vmem:[#allocation5 + $0xcc8] sm:$0xff]  ;;  %v770_v3 = vld [vmem:[#allocation5 + $0xd00] sm:$0xff] }
 0x11f   : > { %3610 = vmatprep.subr.bf16.mxu0 %v6386_v11  ;;  %4062 = vmatprep.subr.bf16.mxu1 %v6388_v12  ;;  %v6444_v11 = vcombine.high %v715_v6, %v719_v7  ;;  %v7166_v12 = vld [vmem:[%s7639_s9 + $0x194] ss:$28 sps:$4 sm:$0xff]   ;;  %v767_v62 = vld [vmem:[#allocation5 + $0xce8] sm:$0xff]  ;;  %v774_v4 = vld [vmem:[#allocation5 + $0xd20] sm:$0xff] }
 0x121   : > { %3548 = vmatmul.mubr.bf16.gmra.mrb[12].mxu0 %v7156_v15  ;;  %4000 = vmatmul.mubr.bf16.gmra.mrb[12].mxu1 %v7156_v15  ;;  %v723_v15 = vld [vmem:[#allocation5 + $0xb88] sm:$0xff] }
 0x122   : > { %3611 = vmatpush1.bf16.msra.mxu0 %v6385_v18  ;;  %4063 = vmatpush1.bf16.msra.mxu1 %v6387_v19  ;;  %v6443_v18 = vcombine.low %v715_v6, %v719_v7  ;;  %v6450_v19 = vcombine.high %v722_v13, %v726_v14  ;;  %v775_v6 = vld [vmem:[#allocation5 + $0xd28] sm:$0xff]  ;;  %v782_v13 = vld [vmem:[#allocation5 + $0xd60] sm:$0xff]  ;;  %v7178_v14 = vld [vmem:[%s7639_s9 + $0xbc] ss:$28 sps:$4 sm:$0xff]  }
 0x123   : > { %3612 = vmatprep.subr.bf16.mxu0 %v6394_v20  ;;  %4064 = vmatprep.subr.bf16.mxu1 %v6396_v21  ;;  %v6452_v20 = vcombine.high %v723_v15, %v727_v16  ;;  %v730_v21 = vld [vmem:[#allocation5 + $0xbc0] sm:$0xff] }
 0x124   : > { %3557 = vmatprep.mubr.bf16.mxu0 %v7157_v22  ;;  %4009 = vmatprep.mubr.bf16.mxu1 %v7157_v22  ;;  %v734_v22 = vld [vmem:[#allocation5 + $0xbe0] sm:$0xff] }
 0x125   : > { %v6457_v35 = vcombine.low %v730_v21, %v734_v22 }
 0x126   : > { %3613 = vmatpush1.bf16.msra.mxu0 %v6393_v27  ;;  %4065 = vmatpush1.bf16.msra.mxu1 %v6395_v28  ;;  %v6451_v27 = vcombine.low %v723_v15, %v727_v16  ;;  %v6458_v28 = vcombine.high %v730_v21, %v734_v22  ;;  %v779_v15 = vld [vmem:[#allocation5 + $0xd48] sm:$0xff]  ;;  %v786_v21 = vld [vmem:[#allocation5 + $0xd80] sm:$0xff] }
 0x127   : > { %3614 = vmatprep.subr.bf16.mxu0 %v6402_v29  ;;  %4066 = vmatprep.subr.bf16.mxu1 %v6404_v30  ;;  %v6460_v29 = vcombine.high %v731_v24, %v735_v25  ;;  %v7171_v30 = vld [vmem:[%s7639_s9 + $0x14] ss:$28 sps:$4 sm:$0xff]   ;;  %v783_v16 = vld [vmem:[#allocation5 + $0xd68] sm:$0xff]  ;;  %v790_v22 = vld [vmem:[#allocation5 + $0xda0] sm:$0xff] }
 0x129   : > { %3558 = vmatmul.mubr.bf16.gmra.mrb[16].mxu0 %v7159_v33  ;;  %4010 = vmatmul.mubr.bf16.gmra.mrb[16].mxu1 %v7159_v33  ;;  %v739_v33 = vld [vmem:[#allocation5 + $0xc08] sm:$0xff] }
 0x12a   : > { %3615 = vmatpush1.bf16.msra.mxu0 %v6401_v36  ;;  %4067 = vmatpush1.bf16.msra.mxu1 %v6403_v37  ;;  %v6459_v36 = vcombine.low %v731_v24, %v735_v25  ;;  %v6466_v37 = vcombine.high %v738_v31, %v742_v32  ;;  %v791_v24 = vld [vmem:[#allocation5 + $0xda8] sm:$0xff]  ;;  %v798_v31 = vld [vmem:[#allocation5 + $0xde0] sm:$0xff]  ;;  %v7181_v32 = vld [vmem:[%s7639_s9 + $0xf4] ss:$28 sps:$4 sm:$0xff]  }
 0x12b   : > { %3616 = vmatprep.subr.bf16.mxu0 %v6410_v38  ;;  %4068 = vmatprep.subr.bf16.mxu1 %v6412_v39  ;;  %v6468_v38 = vcombine.high %v739_v33, %v743_v34  ;;  %v7169_v39 = vld [vmem:[%s7639_s9 + $0x10] ss:$28 sps:$4 sm:$0xff]  }
 0x12c   : > { %3567 = vmatprep.mubr.bf16.mxu0 %v7160_v40  ;;  %4019 = vmatprep.mubr.bf16.mxu1 %v7160_v40  ;;  %v746_v40 = vld [vmem:[#allocation5 + $0xc40] sm:$0xff] }
 0x12d   : > { %v6473_v53 = vcombine.low %v746_v40, %v750_v41 }
 0x12e   : > { %3617 = vmatpush1.bf16.msra.mxu0 %v6409_v45  ;;  %4069 = vmatpush1.bf16.msra.mxu1 %v6411_v46  ;;  %v6467_v45 = vcombine.low %v739_v33, %v743_v34  ;;  %v7172_v46 = vld [vmem:[%s7639_s9 + $0x4c] ss:$28 sps:$4 sm:$0xff]  }
 0x12f   : > { %3618 = vmatprep.subr.bf16.mxu0 %v6418_v47  ;;  %4070 = vmatprep.subr.bf16.mxu1 %v6420_v48  ;;  %v6474_v47 = vcombine.high %v746_v40, %v750_v41  ;;  %v754_v48 = vld [vmem:[#allocation5 + $0xc80] sm:$0xff]  ;;  %v795_v33 = vld [vmem:[#allocation5 + $0xdc8] sm:$0xff]  ;;  %v360_v40 = vld [vmem:[#allocation5 + $0x30] sm:$0xff] }
 0x130   : > { %v799_v34 = vld [vmem:[#allocation5 + $0xde8] sm:$0xff]  ;;  %v357_v41 = vld [vmem:[#allocation5 + $0x18] sm:$0xff] }
 0x131   : > { %3568 = vmatmul.mubr.bf16.gmra.mrb[20].mxu0 %v7162_v51  ;;  %4020 = vmatmul.mubr.bf16.gmra.mrb[20].mxu1 %v7162_v51  ;;  %v755_v51 = vld [vmem:[#allocation5 + $0xc88] sm:$0xff] }
 0x132   : > { %3619 = vmatpush1.bf16.msra.mxu0 %v6417_v54  ;;  %4071 = vmatpush1.bf16.msra.mxu1 %v6419_v55  ;;  %v6475_v54 = vcombine.low %v747_v43, %v751_v44  ;;  %v6482_v55 = vcombine.high %v754_v48, %v758_v49  ;;  %v6523_v44 = vcombine.low %v795_v33, %v799_v34 }
 0x133   : > { %3620 = vmatprep.subr.bf16.mxu0 %v6426_v56  ;;  %4072 = vmatprep.subr.bf16.mxu1 %v6428_v57  ;;  %v6484_v56 = vcombine.high %v755_v51, %v759_v52  ;;  %v7174_v57 = vld [vmem:[%s7639_s9 + $0x48] ss:$28 sps:$4 sm:$0xff]  }
 0x134   : > { %3577 = vmatprep.mubr.bf16.mxu0 %v7163_v58  ;;  %4029 = vmatprep.mubr.bf16.mxu1 %v7163_v58  ;;  %v762_v58 = vld [vmem:[#allocation5 + $0xcc0] sm:$0xff] }
 0x135   : > { %v6489_v7 = vcombine.low %v762_v58, %v766_v59 }
 0x136   : > { %3621 = vmatpush1.bf16.msra.mxu0 %v6425_v63  ;;  %4073 = vmatpush1.bf16.msra.mxu1 %v6427_v0  ;;  %v6481_v63 = vcombine.low %v754_v48, %v758_v49  ;;  %v6483_v0 = vcombine.low %v755_v51, %v759_v52  ;;  %v7184_v48 = vld [vmem:[%s7639_s9 + $0x12c] ss:$28 sps:$4 sm:$0xff]   ;;  %v7189_v51 = vld [vmem:[%s7639_s9 + $0x160] ss:$28 sps:$4 sm:$0xff]  }
 0x137   : > { %3622 = vmatprep.subr.bf16.mxu0 %v6434_v1  ;;  %4074 = vmatprep.subr.bf16.mxu1 %v6436_v2  ;;  %v6490_v1 = vcombine.high %v762_v58, %v766_v59  ;;  %v6492_v2 = vcombine.high %v763_v61, %v767_v62  ;;  %v7186_v49 = vld [vmem:[%s7639_s9 + $0x128] ss:$28 sps:$4 sm:$0xff]   ;;  %v7190_v52 = vld [vmem:[%s7639_s9 + $0x19c] ss:$28 sps:$4 sm:$0xff]  }
 0x138   : > { %v365_v58 = vld [vmem:[#allocation5 + $0x58] sm:$0xff] }
 0x139   : > { %3578 = vmatmul.mubr.bf16.gmra.mrb[24].mxu0 %v7165_v5  ;;  %4030 = vmatmul.mubr.bf16.gmra.mrb[24].mxu1 %v7165_v5  ;;  %v771_v5 = vld [vmem:[#allocation5 + $0xd08] sm:$0xff]  ;;  %v369_v59 = vld [vmem:[#allocation5 + $0x78] sm:$0xff] }
 0x13a   : > { %3623 = vmatpush1.bf16.msra.mxu0 %v6433_v8  ;;  %4075 = vmatpush1.bf16.msra.mxu1 %v6435_v9  ;;  %v6491_v8 = vcombine.low %v763_v61, %v767_v62  ;;  %v6498_v9 = vcombine.high %v770_v3, %v774_v4 }
 0x13b   : > { %3624 = vmatprep.subr.bf16.mxu0 %v6442_v10  ;;  %4076 = vmatprep.subr.bf16.mxu1 %v6444_v11  ;;  %v7177_v10 = vld [vmem:[%s7639_s9 + $0x80] ss:$28 sps:$4 sm:$0xff]   ;;  %v6500_v11 = vcombine.high %v771_v5, %v775_v6 }
 0x13c   : > { %3587 = vmatprep.mubr.bf16.mxu0 %v7166_v12  ;;  %4039 = vmatprep.mubr.bf16.mxu1 %v7166_v12  ;;  %v778_v12 = vld [vmem:[#allocation5 + $0xd40] sm:$0xff] }
 0x13d   : > { %v6505_v25 = vcombine.low %v778_v12, %v782_v13 }
 0x13e   : > { %3625 = vmatpush1.bf16.msra.mxu0 %v6441_v17  ;;  %4077 = vmatpush1.bf16.msra.mxu1 %v6443_v18  ;;  %v6497_v17 = vcombine.low %v770_v3, %v774_v4  ;;  %v6499_v18 = vcombine.low %v771_v5, %v775_v6  ;;  %v377_v3 = vld [vmem:[#allocation5 + $0xb8] sm:$0xff]  ;;  %v6095_v5 = vcombine.low %v365_v58, %v369_v59 }
 0x13f   : > { %3626 = vmatprep.subr.bf16.mxu0 %v6450_v19  ;;  %4078 = vmatprep.subr.bf16.mxu1 %v6452_v20  ;;  %v6506_v19 = vcombine.high %v778_v12, %v782_v13  ;;  %v6508_v20 = vcombine.high %v779_v15, %v783_v16  ;;  %v385_v12 = vld [vmem:[#allocation5 + $0xf8] sm:$0xff] }
 0x141   : > { %3588 = vmatmul.mubr.bf16.gmra.mrb[28].mxu0 %v7168_v23  ;;  %4040 = vmatmul.mubr.bf16.gmra.mrb[28].mxu1 %v7168_v23  ;;  %v787_v23 = vld [vmem:[#allocation5 + $0xd88] sm:$0xff] }
 0x142   : > { %3627 = vmatpush1.bf16.msra.mxu0 %v6449_v26  ;;  %4079 = vmatpush1.bf16.msra.mxu1 %v6451_v27  ;;  %v6507_v26 = vcombine.low %v779_v15, %v783_v16  ;;  %v6514_v27 = vcombine.high %v786_v21, %v790_v22 }
 0x143   : > { %3628 = vmatprep.subr.bf16.mxu0 %v6458_v28  ;;  %4080 = vmatprep.subr.bf16.mxu1 %v6460_v29  ;;  %v7180_v28 = vld [vmem:[%s7639_s9 + $0xb8] ss:$28 sps:$4 sm:$0xff]   ;;  %v6516_v29 = vcombine.high %v787_v23, %v791_v24 }
 0x144   : > { %3630 = vmatprep.mubr.bf16.mxu0 %v7171_v30  ;;  %4082 = vmatprep.mubr.bf16.mxu1 %v7171_v30  ;;  %v794_v30 = vld [vmem:[#allocation5 + $0xdc0] sm:$0xff] }
 0x145   : > { %v6521_v43 = vcombine.low %v794_v30, %v798_v31 }
 0x146   : > { %3629 = vmatpush1.bf16.msra.mxu0 %v6457_v35  ;;  %4081 = vmatpush1.bf16.msra.mxu1 %v6459_v36  ;;  %v6513_v35 = vcombine.low %v786_v21, %v790_v22  ;;  %v6515_v36 = vcombine.low %v787_v23, %v791_v24 }
 0x147   : > { %3711 = vmatprep.subr.bf16.mxu0 %v6466_v37  ;;  %4163 = vmatprep.subr.bf16.mxu1 %v6468_v38  ;;  %v6522_v37 = vcombine.high %v794_v30, %v798_v31  ;;  %v6524_v38 = vcombine.high %v795_v33, %v799_v34  ;;  %v404_v34 = vld [vmem:[#allocation5 + $0x190] sm:$0xff] }
 0x149   : > { %3631 = vmatmul.mubr.bf16.vlgmr.msra.gmra.mrb[0].mxu0 %v7169_v39  ;;  %4083 = vmatmul.mubr.bf16.vlgmr.msra.gmra.mrb[0].mxu1 %v7169_v39  ;;  %v356_v39 = vld [vmem:[#allocation5 + $0x10] sm:$0xff] }
 0x14a   : > { %3712 = vmatpush1.bf16.msra.mxu0 %v6465_v42  ;;  %4164 = vmatpush1.bf16.msra.mxu1 %v6467_v45  ;;  %v361_v42 = vld [vmem:[#allocation5 + $0x38] sm:$0xff]  ;;  %v6086_v45 = vcombine.high %v356_v39, %v360_v40 }
 0x14b   : > { %3640 = vmatprep.mubr.bf16.mxu0 %v7172_v46  ;;  %4092 = vmatprep.mubr.bf16.mxu1 %v7172_v46  ;;  %v7183_v46 = vld [vmem:[%s7639_s9 + $0xf0] ss:$28 sps:$4 sm:$0xff]   ;;  %v6087_v61 = vcombine.low %v357_v41, %v361_v42 }
 0x14c   : > { %3713 = vmatprep.subr.bf16.mxu0 %v6474_v47  ;;  %4165 = vmatprep.subr.bf16.mxu1 %v6476_v50  ;;  %v6088_v47 = vcombine.high %v357_v41, %v361_v42  ;;  %v7187_v50 = vld [vmem:[%s7639_s9 + $0x164] ss:$28 sps:$4 sm:$0xff]   ;;  %v412_v42 = vld [vmem:[#allocation5 + $0x1d0] sm:$0xff] }
 0x14e   : > { %3714 = vmatpush1.bf16.msra.mxu0 %v6473_v53  ;;  %4166 = vmatpush1.bf16.msra.mxu1 %v6475_v54  ;;  %v7192_v53 = vld [vmem:[%s7639_s9 + $0x198] ss:$28 sps:$4 sm:$0xff]   ;;  %v7425_v54 = vmov 0  }
 0x14f   : > { %3715 = vmatprep.subr.bf16.mxu0 %v6482_v55  ;;  %4167 = vmatprep.subr.bf16.mxu1 %v6484_v56  ;;  %v364_v55 = vld [vmem:[#allocation5 + $0x50] sm:$0xff] }
 0x150   : > { %v368_v56 = vld [vmem:[#allocation5 + $0x70] sm:$0xff] }
 0x151   : > { %3641 = vmatmul.mubr.bf16.gmra.mrb[4].mxu0 %v7174_v57  ;;  %4093 = vmatmul.mubr.bf16.gmra.mrb[4].mxu1 %v7174_v57  ;;  %v7193_v57 = vld [vmem:[%s7639_s9 + $0x18] ss:$28 sps:$4 sm:$0xff]   ;;  %v6094_v62 = vcombine.high %v364_v55, %v368_v56  ;;  %v6093_v4 = vcombine.low %v364_v55, %v368_v56 }
 0x152   : > { %3650 = vmatprep.mubr.bf16.mxu0 %v7175_v60  ;;  %4102 = vmatprep.mubr.bf16.mxu1 %v7175_v60  ;;  %v6085_v60 = vcombine.low %v356_v39, %v360_v40  ;;  %v425_v55 = vld [vmem:[#allocation5 + $0x238] sm:$0xff] }
 0x153   : > { %3716 = vmatpush1.bf16.msra.mxu0 %v6481_v63  ;;  %4168 = vmatpush1.bf16.msra.mxu1 %v6483_v0  ;;  %v6096_v63 = vcombine.high %v365_v58, %v369_v59  ;;  %v372_v0 = vld [vmem:[#allocation5 + $0x90] sm:$0xff] }
 0x154   : > { %3717 = vmatprep.subr.bf16.mxu0 %v6490_v1  ;;  %4169 = vmatprep.subr.bf16.mxu1 %v6492_v2  ;;  %v376_v1 = vld [vmem:[#allocation5 + $0xb0] sm:$0xff]  ;;  %v373_v2 = vld [vmem:[#allocation5 + $0x98] sm:$0xff] }
 0x155   : > { %v6102_v6 = vcombine.high %v372_v0, %v376_v1  ;;  %v6101_v13 = vcombine.low %v372_v0, %v376_v1  ;;  %v433_v0 = vld [vmem:[#allocation5 + $0x278] sm:$0xff] }
 0x157   : > { %3718 = vmatpush1.bf16.msra.mxu0 %v6489_v7  ;;  %4170 = vmatpush1.bf16.msra.mxu1 %v6491_v8  ;;  %v6104_v7 = vcombine.high %v373_v2, %v377_v3  ;;  %v380_v8 = vld [vmem:[#allocation5 + $0xd0] sm:$0xff] }
 0x158   : > { %3719 = vmatprep.subr.bf16.mxu0 %v6498_v9  ;;  %4171 = vmatprep.subr.bf16.mxu1 %v6500_v11  ;;  %v384_v9 = vld [vmem:[#allocation5 + $0xf0] sm:$0xff]  ;;  %v381_v11 = vld [vmem:[#allocation5 + $0xd8] sm:$0xff] }
 0x159   : > { %3651 = vmatmul.mubr.bf16.gmra.mrb[8].mxu0 %v7177_v10  ;;  %4103 = vmatmul.mubr.bf16.gmra.mrb[8].mxu1 %v7177_v10  ;;  %v7194_v10 = vld [vmem:[%s7639_s9 + $0x50] ss:$28 sps:$4 sm:$0xff]   ;;  %v6110_v15 = vcombine.high %v380_v8, %v384_v9  ;;  %v6112_v16 = vcombine.high %v381_v11, %v385_v12  ;;  %v6109_v21 = vcombine.low %v380_v8, %v384_v9  ;;  %v441_v8 = vld [vmem:[#allocation5 + $0x2b8] sm:$0xff] }
 0x15a   : > { %3660 = vmatprep.mubr.bf16.mxu0 %v7178_v14  ;;  %4112 = vmatprep.mubr.bf16.mxu1 %v7178_v14  ;;  %v6103_v14 = vcombine.low %v373_v2, %v377_v3  ;;  %v6111_v22 = vcombine.low %v381_v11, %v385_v12 }
 0x15b   : > { %3720 = vmatpush1.bf16.msra.mxu0 %v6497_v17  ;;  %4172 = vmatpush1.bf16.msra.mxu1 %v6499_v18  ;;  %v388_v17 = vld [vmem:[#allocation5 + $0x110] sm:$0xff] }
 0x15c   : > { %3721 = vmatprep.subr.bf16.mxu0 %v6506_v19  ;;  %4173 = vmatprep.subr.bf16.mxu1 %v6508_v20  ;;  %v392_v18 = vld [vmem:[#allocation5 + $0x130] sm:$0xff]  ;;  %v389_v19 = vld [vmem:[#allocation5 + $0x118] sm:$0xff] }
 0x15d   : > { %v393_v20 = vld [vmem:[#allocation5 + $0x138] sm:$0xff]  ;;  %v6118_v23 = vcombine.high %v388_v17, %v392_v18  ;;  %v6117_v30 = vcombine.low %v388_v17, %v392_v18 }
 0x15e   : > { %v6120_v24 = vcombine.high %v389_v19, %v393_v20  ;;  %v6119_v31 = vcombine.low %v389_v19, %v393_v20  ;;  %v449_v17 = vld [vmem:[#allocation5 + $0x2f8] sm:$0xff] }
 0x15f   : > { %3722 = vmatpush1.bf16.msra.mxu0 %v6505_v25  ;;  %4174 = vmatpush1.bf16.msra.mxu1 %v6507_v26  ;;  %v396_v25 = vld [vmem:[#allocation5 + $0x150] sm:$0xff] }
 0x160   : > { %3723 = vmatprep.subr.bf16.mxu0 %v6514_v27  ;;  %4175 = vmatprep.subr.bf16.mxu1 %v6516_v29  ;;  %v400_v26 = vld [vmem:[#allocation5 + $0x170] sm:$0xff]  ;;  %v7195_v27 = vld [vmem:[%s7639_s9 + $0x88] ss:$28 sps:$4 sm:$0xff]   ;;  %v401_v29 = vld [vmem:[#allocation5 + $0x178] sm:$0xff] }
 0x161   : > { %3661 = vmatmul.mubr.bf16.gmra.mrb[12].mxu0 %v7180_v28  ;;  %4113 = vmatmul.mubr.bf16.gmra.mrb[12].mxu1 %v7180_v28  ;;  %v397_v28 = vld [vmem:[#allocation5 + $0x158] sm:$0xff] }
 0x162   : > { %3670 = vmatprep.mubr.bf16.mxu0 %v7181_v32  ;;  %4122 = vmatprep.mubr.bf16.mxu1 %v7181_v32  ;;  %v6126_v32 = vcombine.high %v396_v25, %v400_v26  ;;  %v6128_v33 = vcombine.high %v397_v28, %v401_v29  ;;  %v6127_v39 = vcombine.low %v397_v28, %v401_v29 }
 0x163   : > { %3724 = vmatpush1.bf16.msra.mxu0 %v6513_v35  ;;  %4176 = vmatpush1.bf16.msra.mxu1 %v6515_v36  ;;  %v408_v35 = vld [vmem:[#allocation5 + $0x1b0] sm:$0xff]  ;;  %v405_v36 = vld [vmem:[#allocation5 + $0x198] sm:$0xff] }
 0x164   : > { %3725 = vmatprep.subr.bf16.mxu0 %v6522_v37  ;;  %4177 = vmatprep.subr.bf16.mxu1 %v6524_v38  ;;  %v409_v37 = vld [vmem:[#allocation5 + $0x1b8] sm:$0xff]  ;;  %v6125_v38 = vcombine.low %v396_v25, %v400_v26  ;;  %v6134_v40 = vcombine.high %v404_v34, %v408_v35 }
 0x165   : > { %v6136_v41 = vcombine.high %v405_v36, %v409_v37  ;;  %v457_v25 = vld [vmem:[#allocation5 + $0x338] sm:$0xff] }
 0x167   : > { %3726 = vmatpush1.bf16.msra.mxu0 %v6521_v43  ;;  %4178 = vmatpush1.bf16.msra.mxu1 %v6523_v44  ;;  %v416_v43 = vld [vmem:[#allocation5 + $0x1f0] sm:$0xff]  ;;  %v7196_v44 = vld [vmem:[%s7639_s9 + $0xc0] ss:$28 sps:$4 sm:$0xff]  }
 0x168   : > { %4276 = vmatprep.subr.bf16.mxu0 %v6086_v45  ;;  %4728 = vmatprep.subr.bf16.mxu1 %v6088_v47  ;;  %v413_v45 = vld [vmem:[#allocation5 + $0x1d8] sm:$0xff]  ;;  %v6133_v47 = vcombine.low %v404_v34, %v408_v35  ;;  %v6141_v56 = vcombine.low %v412_v42, %v416_v43 }
 0x169   : > { %3671 = vmatmul.mubr.bf16.gmra.mrb[16].mxu0 %v7183_v46  ;;  %4123 = vmatmul.mubr.bf16.gmra.mrb[16].mxu1 %v7183_v46  ;;  %v417_v46 = vld [vmem:[#allocation5 + $0x1f8] sm:$0xff] }
 0x16a   : > { %3680 = vmatprep.mubr.bf16.mxu0 %v7184_v48  ;;  %4132 = vmatprep.mubr.bf16.mxu1 %v7184_v48  ;;  %v6135_v48 = vcombine.low %v405_v36, %v409_v37  ;;  %v465_v34 = vld [vmem:[#allocation5 + $0x378] sm:$0xff] }
 0x171   : > { %3681 = vmatmul.mubr.bf16.gmra.mrb[20].mxu0 %v7186_v49  ;;  %4133 = vmatmul.mubr.bf16.gmra.mrb[20].mxu1 %v7186_v49  ;;  %v6142_v49 = vcombine.high %v412_v42, %v416_v43  ;;  %v473_v42 = vld [vmem:[#allocation5 + $0x3b8] sm:$0xff] }
 0x172   : > { %3690 = vmatprep.mubr.bf16.mxu0 %v7187_v50  ;;  %4142 = vmatprep.mubr.bf16.mxu1 %v7187_v50  ;;  %v6144_v50 = vcombine.high %v413_v45, %v417_v46 }
 0x179   : > { %3691 = vmatmul.mubr.bf16.gmra.mrb[24].mxu0 %v7189_v51  ;;  %4143 = vmatmul.mubr.bf16.gmra.mrb[24].mxu1 %v7189_v51  ;;  %v420_v51 = vld [vmem:[#allocation5 + $0x210] sm:$0xff] }
 0x17a   : > { %3700 = vmatprep.mubr.bf16.mxu0 %v7190_v52  ;;  %4152 = vmatprep.mubr.bf16.mxu1 %v7190_v52  ;;  %v424_v52 = vld [vmem:[#allocation5 + $0x230] sm:$0xff] }
 0x17b   : > { %v6150_v58 = vcombine.high %v420_v51, %v424_v52  ;;  %v6149_v1 = vcombine.low %v420_v51, %v424_v52  ;;  %v481_v51 = vld [vmem:[#allocation5 + $0x3f8] sm:$0xff] }
 0x181   : > { %3701 = vmatmul.mubr.bf16.gmra.mrb[28].mxu0 %v7192_v53  ;;  %4153 = vmatmul.mubr.bf16.gmra.mrb[28].mxu1 %v7192_v53  ;;  %v421_v53 = vld [vmem:[#allocation5 + $0x218] sm:$0xff] }
 0x182   : > { %3743 = vmatprep.mubr.bf16.mxu0 %v7425_v54  ;;  %4195 = vmatprep.mubr.bf16.mxu1 %v7425_v54  ;;  %v6152_v59 = vcombine.high %v421_v53, %v425_v55  ;;  %v6151_v2 = vcombine.low %v421_v53, %v425_v55 }
 0x189   : > { %3744 = vmatmul.mubr.bf16.vlgmr.msra.gmra.mrb[0].mxu0 %v7193_v57  ;;  %4196 = vmatmul.mubr.bf16.vlgmr.msra.gmra.mrb[0].mxu1 %v7193_v57  ;;  %v6143_v57 = vcombine.low %v413_v45, %v417_v46 }
 0x18a   : > { %4277 = vmatpush1.bf16.msra.mxu0 %v6085_v60  ;;  %4729 = vmatpush1.bf16.msra.mxu1 %v6087_v61  ;;  %v428_v60 = vld [vmem:[#allocation5 + $0x250] sm:$0xff] }
 0x18b   : > { %4278 = vmatprep.subr.bf16.mxu0 %v6094_v62  ;;  %4730 = vmatprep.subr.bf16.mxu1 %v6096_v63  ;;  %v432_v61 = vld [vmem:[#allocation5 + $0x270] sm:$0xff]  ;;  %v429_v63 = vld [vmem:[#allocation5 + $0x258] sm:$0xff] }
 0x18c   : > { %3753 = vmatprep.mubr.bf16.mxu0 %v7425_v54  ;;  %4205 = vmatprep.mubr.bf16.mxu1 %v7425_v54  ;;  %v7197_v62 = vld [vmem:[%s7639_s9 + $0xf8] ss:$28 sps:$4 sm:$0xff]   ;;  %v6158_v3 = vcombine.high %v428_v60, %v432_v61  ;;  %v6157_v9 = vcombine.low %v428_v60, %v432_v61 }
 0x18d   : > { %v489_v60 = vld [vmem:[#allocation5 + $0x438] sm:$0xff] }
 0x18e   : > { %4279 = vmatpush1.bf16.msra.mxu0 %v6093_v4  ;;  %4731 = vmatpush1.bf16.msra.mxu1 %v6095_v5  ;;  %v6160_v4 = vcombine.high %v429_v63, %v433_v0  ;;  %v436_v5 = vld [vmem:[#allocation5 + $0x290] sm:$0xff] }
 0x18f   : > { %4280 = vmatprep.subr.bf16.mxu0 %v6102_v6  ;;  %4732 = vmatprep.subr.bf16.mxu1 %v6104_v7  ;;  %v440_v6 = vld [vmem:[#allocation5 + $0x2b0] sm:$0xff]  ;;  %v437_v7 = vld [vmem:[#allocation5 + $0x298] sm:$0xff] }
 0x190   : > { %v6166_v11 = vcombine.high %v436_v5, %v440_v6  ;;  %v6168_v12 = vcombine.high %v437_v7, %v441_v8  ;;  %v6165_v18 = vcombine.low %v436_v5, %v440_v6  ;;  %v6167_v19 = vcombine.low %v437_v7, %v441_v8  ;;  %v497_v5 = vld [vmem:[#allocation5 + $0x478] sm:$0xff] }
 0x191   : > { %3754 = vmatmul.mubr.bf16.gmra.mrb[4].mxu0 %v7194_v10  ;;  %4206 = vmatmul.mubr.bf16.gmra.mrb[4].mxu1 %v7194_v10  ;;  %v6159_v10 = vcombine.low %v429_v63, %v433_v0  ;;  %v7201_v0 = vld [vmem:[%s7639_s9 + $0x4] ss:$28 sps:$4 sm:$0xff]  }
 0x192   : > { %4281 = vmatpush1.bf16.msra.mxu0 %v6101_v13  ;;  %4733 = vmatpush1.bf16.msra.mxu1 %v6103_v14  ;;  %v444_v13 = vld [vmem:[#allocation5 + $0x2d0] sm:$0xff] }
 0x193   : > { %4282 = vmatprep.subr.bf16.mxu0 %v6110_v15  ;;  %4734 = vmatprep.subr.bf16.mxu1 %v6112_v16  ;;  %v448_v14 = vld [vmem:[#allocation5 + $0x2f0] sm:$0xff]  ;;  %v445_v16 = vld [vmem:[#allocation5 + $0x2d8] sm:$0xff] }
 0x194   : > { %3763 = vmatprep.mubr.bf16.mxu0 %v7425_v54  ;;  %4215 = vmatprep.mubr.bf16.mxu1 %v7425_v54  ;;  %v7198_v15 = vld [vmem:[%s7639_s9 + $0x130] ss:$28 sps:$4 sm:$0xff]   ;;  %v6174_v20 = vcombine.high %v444_v13, %v448_v14  ;;  %v6173_v26 = vcombine.low %v444_v13, %v448_v14  ;;  %v501_v13 = vld [vmem:[#allocation5 + $0x498] sm:$0xff] }
 0x195   : > { %v505_v14 = vld [vmem:[#allocation5 + $0x4b8] sm:$0xff] }
 0x196   : > { %4283 = vmatpush1.bf16.msra.mxu0 %v6109_v21  ;;  %4735 = vmatpush1.bf16.msra.mxu1 %v6111_v22  ;;  %v6176_v21 = vcombine.high %v445_v16, %v449_v17  ;;  %v452_v22 = vld [vmem:[#allocation5 + $0x310] sm:$0xff] }
 0x197   : > { %4284 = vmatprep.subr.bf16.mxu0 %v6118_v23  ;;  %4736 = vmatprep.subr.bf16.mxu1 %v6120_v24  ;;  %v456_v23 = vld [vmem:[#allocation5 + $0x330] sm:$0xff]  ;;  %v453_v24 = vld [vmem:[#allocation5 + $0x318] sm:$0xff] }
 0x198   : > { %v6182_v28 = vcombine.high %v452_v22, %v456_v23  ;;  %v6184_v29 = vcombine.high %v453_v24, %v457_v25  ;;  %v6181_v35 = vcombine.low %v452_v22, %v456_v23  ;;  %v6183_v36 = vcombine.low %v453_v24, %v457_v25  ;;  %v509_v22 = vld [vmem:[#allocation5 + $0x4d8] sm:$0xff] }
 0x199   : > { %3764 = vmatmul.mubr.bf16.gmra.mrb[8].mxu0 %v7195_v27  ;;  %4216 = vmatmul.mubr.bf16.gmra.mrb[8].mxu1 %v7195_v27  ;;  %v6175_v27 = vcombine.low %v445_v16, %v449_v17  ;;  %v513_v23 = vld [vmem:[#allocation5 + $0x4f8] sm:$0xff]  ;;  %v6231_v25 = vcombine.low %v501_v13, %v505_v14 }
 0x19a   : > { %4285 = vmatpush1.bf16.msra.mxu0 %v6117_v30  ;;  %4737 = vmatpush1.bf16.msra.mxu1 %v6119_v31  ;;  %v460_v30 = vld [vmem:[#allocation5 + $0x350] sm:$0xff] }
 0x19b   : > { %4286 = vmatprep.subr.bf16.mxu0 %v6126_v32  ;;  %4738 = vmatprep.subr.bf16.mxu1 %v6128_v33  ;;  %v464_v31 = vld [vmem:[#allocation5 + $0x370] sm:$0xff]  ;;  %v7199_v32 = vld [vmem:[%s7639_s9 + $0x168] ss:$28 sps:$4 sm:$0xff]   ;;  %v461_v33 = vld [vmem:[#allocation5 + $0x358] sm:$0xff] }
 0x19c   : > { %3773 = vmatprep.mubr.bf16.mxu0 %v7425_v54  ;;  %4225 = vmatprep.mubr.bf16.mxu1 %v7425_v54  ;;  %v6190_v37 = vcombine.high %v460_v30, %v464_v31  ;;  %v6189_v43 = vcombine.low %v460_v30, %v464_v31  ;;  %v7204_v30 = vld [vmem:[%s7639_s9 + $0x38] ss:$28 sps:$4 sm:$0xff]  }
 0x19d   : > { %v517_v31 = vld [vmem:[#allocation5 + $0x518] sm:$0xff] }
 0x19e   : > { %4287 = vmatpush1.bf16.msra.mxu0 %v6125_v38  ;;  %4739 = vmatpush1.bf16.msra.mxu1 %v6127_v39  ;;  %v6192_v38 = vcombine.high %v461_v33, %v465_v34  ;;  %v468_v39 = vld [vmem:[#allocation5 + $0x390] sm:$0xff] }
 0x19f   : > { %4288 = vmatprep.subr.bf16.mxu0 %v6134_v40  ;;  %4740 = vmatprep.subr.bf16.mxu1 %v6136_v41  ;;  %v472_v40 = vld [vmem:[#allocation5 + $0x3b0] sm:$0xff]  ;;  %v469_v41 = vld [vmem:[#allocation5 + $0x398] sm:$0xff] }
 0x1a0   : > { %v6198_v45 = vcombine.high %v468_v39, %v472_v40  ;;  %v6200_v46 = vcombine.high %v469_v41, %v473_v42  ;;  %v6197_v52 = vcombine.low %v468_v39, %v472_v40  ;;  %v6199_v53 = vcombine.low %v469_v41, %v473_v42  ;;  %v528_v39 = vld [vmem:[#allocation5 + $0x570] sm:$0xff]  ;;  %v525_v40 = vld [vmem:[#allocation5 + $0x558] sm:$0xff] }
 0x1a1   : > { %3774 = vmatmul.mubr.bf16.gmra.mrb[12].mxu0 %v7196_v44  ;;  %4226 = vmatmul.mubr.bf16.gmra.mrb[12].mxu1 %v7196_v44  ;;  %v6191_v44 = vcombine.low %v461_v33, %v465_v34  ;;  %v6239_v34 = vcombine.low %v509_v22, %v513_v23  ;;  %v529_v41 = vld [vmem:[#allocation5 + $0x578] sm:$0xff] }
 0x1a2   : > { %4289 = vmatpush1.bf16.msra.mxu0 %v6133_v47  ;;  %4741 = vmatpush1.bf16.msra.mxu1 %v6135_v48  ;;  %v476_v47 = vld [vmem:[#allocation5 + $0x3d0] sm:$0xff] }
 0x1a3   : > { %4290 = vmatprep.subr.bf16.mxu0 %v6142_v49  ;;  %4742 = vmatprep.subr.bf16.mxu1 %v6144_v50  ;;  %v480_v48 = vld [vmem:[#allocation5 + $0x3f0] sm:$0xff]  ;;  %v7200_v49 = vld [vmem:[%s7639_s9 + $0x1a0] ss:$28 sps:$4 sm:$0xff]  }
 0x1a4   : > { %3783 = vmatprep.mubr.bf16.mxu0 %v7425_v54  ;;  %4235 = vmatprep.mubr.bf16.mxu1 %v7425_v54  ;;  %v477_v50 = vld [vmem:[#allocation5 + $0x3d8] sm:$0xff]  ;;  %v6206_v55 = vcombine.high %v476_v47, %v480_v48  ;;  %v6205_v61 = vcombine.low %v476_v47, %v480_v48  ;;  %v536_v47 = vld [vmem:[#allocation5 + $0x5b0] sm:$0xff] }
 0x1a5   : > { %v7206_v48 = vld [vmem:[%s7639_s9 + $0x70] ss:$28 sps:$4 sm:$0xff]  }
 0x1a6   : > { %4291 = vmatpush1.bf16.msra.mxu0 %v6141_v56  ;;  %4743 = vmatpush1.bf16.msra.mxu1 %v6143_v57  ;;  %v6208_v56 = vcombine.high %v477_v50, %v481_v51  ;;  %v484_v57 = vld [vmem:[#allocation5 + $0x410] sm:$0xff] }
 0x1a7   : > { %4292 = vmatprep.subr.bf16.mxu0 %v6150_v58  ;;  %4744 = vmatprep.subr.bf16.mxu1 %v6152_v59  ;;  %v488_v58 = vld [vmem:[#allocation5 + $0x430] sm:$0xff]  ;;  %v485_v59 = vld [vmem:[#allocation5 + $0x418] sm:$0xff] }
 0x1a8   : > { %v6214_v63 = vcombine.high %v484_v57, %v488_v58  ;;  %v6213_v6 = vcombine.low %v484_v57, %v488_v58  ;;  %v6215_v7 = vcombine.low %v485_v59, %v489_v60  ;;  %v540_v57 = vld [vmem:[#allocation5 + $0x5d0] sm:$0xff] }
 0x1a9   : > { %3784 = vmatmul.mubr.bf16.gmra.mrb[16].mxu0 %v7197_v62  ;;  %4236 = vmatmul.mubr.bf16.gmra.mrb[16].mxu1 %v7197_v62  ;;  %v6207_v62 = vcombine.low %v477_v50, %v481_v51  ;;  %v537_v50 = vld [vmem:[#allocation5 + $0x5b8] sm:$0xff]  ;;  %v544_v58 = vld [vmem:[#allocation5 + $0x5f0] sm:$0xff] }
 0x1aa   : > { %4293 = vmatpush1.bf16.msra.mxu0 %v6149_v1  ;;  %4745 = vmatpush1.bf16.msra.mxu1 %v6151_v2  ;;  %v6216_v1 = vcombine.high %v485_v59, %v489_v60  ;;  %v492_v2 = vld [vmem:[#allocation5 + $0x450] sm:$0xff]  ;;  %v541_v59 = vld [vmem:[#allocation5 + $0x5d8] sm:$0xff] }
 0x1ab   : > { %4294 = vmatprep.subr.bf16.mxu0 %v6158_v3  ;;  %4746 = vmatprep.subr.bf16.mxu1 %v6160_v4  ;;  %v496_v3 = vld [vmem:[#allocation5 + $0x470] sm:$0xff]  ;;  %v493_v4 = vld [vmem:[#allocation5 + $0x458] sm:$0xff] }
 0x1ac   : > { %3793 = vmatprep.mubr.bf16.mxu0 %v7425_v54  ;;  %4245 = vmatprep.mubr.bf16.mxu1 %v7425_v54  ;;  %v6222_v8 = vcombine.high %v492_v2, %v496_v3  ;;  %v6223_v16 = vcombine.low %v493_v4, %v497_v5  ;;  %v545_v60 = vld [vmem:[#allocation5 + $0x5f8] sm:$0xff] }
 0x1ae   : > { %4295 = vmatpush1.bf16.msra.mxu0 %v6157_v9  ;;  %4747 = vmatpush1.bf16.msra.mxu1 %v6159_v10  ;;  %v6224_v9 = vcombine.high %v493_v4, %v497_v5  ;;  %v500_v10 = vld [vmem:[#allocation5 + $0x490] sm:$0xff]  ;;  %v549_v4 = vld [vmem:[#allocation5 + $0x618] sm:$0xff] }
 0x1af   : > { %4296 = vmatprep.subr.bf16.mxu0 %v6166_v11  ;;  %4748 = vmatprep.subr.bf16.mxu1 %v6168_v12  ;;  %v504_v11 = vld [vmem:[#allocation5 + $0x4b0] sm:$0xff]  ;;  %v7202_v12 = vld [vmem:[%s7639_s9] ss:$28 sps:$4 sm:$0xff]  }
 0x1b0   : > { %v6230_v17 = vcombine.high %v500_v10, %v504_v11  ;;  %v6229_v24 = vcombine.low %v500_v10, %v504_v11  ;;  %v553_v5 = vld [vmem:[#allocation5 + $0x638] sm:$0xff]  ;;  %v556_v11 = vld [vmem:[#allocation5 + $0x650] sm:$0xff] }
 0x1b1   : > { %3794 = vmatmul.mubr.bf16.gmra.mrb[20].mxu0 %v7198_v15  ;;  %4246 = vmatmul.mubr.bf16.gmra.mrb[20].mxu1 %v7198_v15  ;;  %v6221_v15 = vcombine.low %v492_v2, %v496_v3  ;;  %v552_v2 = vld [vmem:[#allocation5 + $0x630] sm:$0xff]  ;;  %v7208_v3 = vld [vmem:[%s7639_s9 + $0xa8] ss:$28 sps:$4 sm:$0xff]   ;;  %v6280_v10 = vcombine.high %v549_v4, %v553_v5 }
 0x1b2   : > { %4297 = vmatpush1.bf16.msra.mxu0 %v6165_v18  ;;  %4749 = vmatpush1.bf16.msra.mxu1 %v6167_v19  ;;  %v7203_v18 = vld [vmem:[%s7639_s9 + $0x3c] ss:$28 sps:$4 sm:$0xff]   ;;  %v6232_v19 = vcombine.high %v501_v13, %v505_v14 }
 0x1b3   : > { %4298 = vmatprep.subr.bf16.mxu0 %v6174_v20  ;;  %4750 = vmatprep.subr.bf16.mxu1 %v6176_v21  ;;  %v508_v20 = vld [vmem:[#allocation5 + $0x4d0] sm:$0xff]  ;;  %v557_v13 = vld [vmem:[#allocation5 + $0x658] sm:$0xff] }
 0x1b4   : > { %3803 = vmatprep.mubr.bf16.mxu0 %v7425_v54  ;;  %4255 = vmatprep.mubr.bf16.mxu1 %v7425_v54  ;;  %v512_v21 = vld [vmem:[#allocation5 + $0x4f0] sm:$0xff]  ;;  %v561_v14 = vld [vmem:[#allocation5 + $0x678] sm:$0xff] }
 0x1b5   : > { %v6237_v33 = vcombine.low %v508_v20, %v512_v21 }
 0x1b6   : > { %4299 = vmatpush1.bf16.msra.mxu0 %v6173_v26  ;;  %4751 = vmatpush1.bf16.msra.mxu1 %v6175_v27  ;;  %v6238_v26 = vcombine.high %v508_v20, %v512_v21  ;;  %v6240_v27 = vcombine.high %v509_v22, %v513_v23  ;;  %v568_v20 = vld [vmem:[#allocation5 + $0x6b0] sm:$0xff]  ;;  %v7210_v21 = vld [vmem:[%s7639_s9 + $0xe0] ss:$28 sps:$4 sm:$0xff]  }
 0x1b7   : > { %4300 = vmatprep.subr.bf16.mxu0 %v6182_v28  ;;  %4752 = vmatprep.subr.bf16.mxu1 %v6184_v29  ;;  %v516_v28 = vld [vmem:[#allocation5 + $0x510] sm:$0xff]  ;;  %v565_v22 = vld [vmem:[#allocation5 + $0x698] sm:$0xff] }
 0x1b8   : > { %v520_v29 = vld [vmem:[#allocation5 + $0x530] sm:$0xff]  ;;  %v569_v23 = vld [vmem:[#allocation5 + $0x6b8] sm:$0xff] }
 0x1b9   : > { %3804 = vmatmul.mubr.bf16.gmra.mrb[24].mxu0 %v7199_v32  ;;  %4256 = vmatmul.mubr.bf16.gmra.mrb[24].mxu1 %v7199_v32  ;;  %v521_v32 = vld [vmem:[#allocation5 + $0x538] sm:$0xff]  ;;  %v6245_v42 = vcombine.low %v516_v28, %v520_v29 }
 0x1ba   : > { %4301 = vmatpush1.bf16.msra.mxu0 %v6181_v35  ;;  %4753 = vmatpush1.bf16.msra.mxu1 %v6183_v36  ;;  %v6246_v35 = vcombine.high %v516_v28, %v520_v29  ;;  %v7205_v36 = vld [vmem:[%s7639_s9 + $0x74] ss:$28 sps:$4 sm:$0xff]   ;;  %v6296_v28 = vcombine.high %v565_v22, %v569_v23 }
 0x1bb   : > { %4302 = vmatprep.subr.bf16.mxu0 %v6190_v37  ;;  %4754 = vmatprep.subr.bf16.mxu1 %v6192_v38  ;;  %v6248_v37 = vcombine.high %v517_v31, %v521_v32  ;;  %v524_v38 = vld [vmem:[#allocation5 + $0x550] sm:$0xff] }
 0x1bc   : > { %3813 = vmatprep.mubr.bf16.mxu0 %v7425_v54  ;;  %4265 = vmatprep.mubr.bf16.mxu1 %v7425_v54  ;;  %v6253_v51 = vcombine.low %v524_v38, %v528_v39  ;;  %v572_v29 = vld [vmem:[#allocation5 + $0x6d0] sm:$0xff] }
 0x1be   : > { %4303 = vmatpush1.bf16.msra.mxu0 %v6189_v43  ;;  %4755 = vmatpush1.bf16.msra.mxu1 %v6191_v44  ;;  %v6247_v43 = vcombine.low %v517_v31, %v521_v32  ;;  %v6254_v44 = vcombine.high %v524_v38, %v528_v39  ;;  %v573_v31 = vld [vmem:[#allocation5 + $0x6d8] sm:$0xff]  ;;  %v584_v38 = vld [vmem:[#allocation5 + $0x730] sm:$0xff] }
 0x1bf   : > { %4304 = vmatprep.subr.bf16.mxu0 %v6198_v45  ;;  %4756 = vmatprep.subr.bf16.mxu1 %v6200_v46  ;;  %v6256_v45 = vcombine.high %v525_v40, %v529_v41  ;;  %v532_v46 = vld [vmem:[#allocation5 + $0x590] sm:$0xff]  ;;  %v577_v32 = vld [vmem:[#allocation5 + $0x6f8] sm:$0xff] }
 0x1c0   : > { %v7212_v39 = vld [vmem:[%s7639_s9 + $0x118] ss:$28 sps:$4 sm:$0xff]  }
 0x1c1   : > { %3814 = vmatmul.mubr.bf16.gmra.mrb[28].mxu0 %v7200_v49  ;;  %4266 = vmatmul.mubr.bf16.gmra.mrb[28].mxu1 %v7200_v49  ;;  %v533_v49 = vld [vmem:[#allocation5 + $0x598] sm:$0xff] }
 0x1c2   : > { %4305 = vmatpush1.bf16.msra.mxu0 %v6197_v52  ;;  %4757 = vmatpush1.bf16.msra.mxu1 %v6199_v53  ;;  %v6255_v52 = vcombine.low %v525_v40, %v529_v41  ;;  %v6262_v53 = vcombine.high %v532_v46, %v536_v47  ;;  %v581_v40 = vld [vmem:[#allocation5 + $0x718] sm:$0xff] }
 0x1c3   : > { %4306 = vmatprep.subr.bf16.mxu0 %v6206_v55  ;;  %4758 = vmatprep.subr.bf16.mxu1 %v6208_v56  ;;  %v7207_v55 = vld [vmem:[%s7639_s9 + $0xac] ss:$28 sps:$4 sm:$0xff]   ;;  %v6264_v56 = vcombine.high %v533_v49, %v537_v50  ;;  %v585_v41 = vld [vmem:[#allocation5 + $0x738] sm:$0xff] }
 0x1c4   : > { %4308 = vmatprep.mubr.bf16.mxu0 %v7201_v0  ;;  %4760 = vmatprep.mubr.bf16.mxu1 %v7201_v0  ;;  %v6272_v0 = vcombine.high %v541_v59, %v545_v60 }
 0x1c6   : > { %4307 = vmatpush1.bf16.msra.mxu0 %v6205_v61  ;;  %4759 = vmatpush1.bf16.msra.mxu1 %v6207_v62  ;;  %v6261_v61 = vcombine.low %v532_v46, %v536_v47  ;;  %v6263_v62 = vcombine.low %v533_v49, %v537_v50  ;;  %v6312_v46 = vcombine.high %v581_v40, %v585_v41  ;;  %v588_v47 = vld [vmem:[#allocation5 + $0x750] sm:$0xff]  ;;  %v589_v49 = vld [vmem:[#allocation5 + $0x758] sm:$0xff] }
 0x1c7   : > { %4389 = vmatprep.subr.bf16.mxu0 %v6214_v63  ;;  %4841 = vmatprep.subr.bf16.mxu1 %v6216_v1  ;;  %v6270_v63 = vcombine.high %v540_v57, %v544_v58  ;;  %v548_v1 = vld [vmem:[#allocation5 + $0x610] sm:$0xff]  ;;  %v593_v50 = vld [vmem:[#allocation5 + $0x778] sm:$0xff] }
 0x1c9   : > { %4309 = vmatmul.mubr.bf16.vlgmr.msra.gmra.mrb[32].mxu0 %v7202_v12  ;;  %4761 = vmatmul.mubr.bf16.vlgmr.msra.gmra.mrb[32].mxu1 %v7202_v12  ;;  %v560_v12 = vld [vmem:[#allocation5 + $0x670] sm:$0xff] }
 0x1ca   : > { %4390 = vmatpush1.bf16.msra.mxu0 %v6213_v6  ;;  %4842 = vmatpush1.bf16.msra.mxu1 %v6215_v7  ;;  %v6269_v6 = vcombine.low %v540_v57, %v544_v58  ;;  %v6271_v7 = vcombine.low %v541_v59, %v545_v60  ;;  %v600_v57 = vld [vmem:[#allocation5 + $0x7b0] sm:$0xff]  ;;  %v597_v59 = vld [vmem:[#allocation5 + $0x798] sm:$0xff] }
 0x1cb   : > { %4391 = vmatprep.subr.bf16.mxu0 %v6222_v8  ;;  %4843 = vmatprep.subr.bf16.mxu1 %v6224_v9  ;;  %v6278_v8 = vcombine.high %v548_v1, %v552_v2  ;;  %v7209_v9 = vld [vmem:[%s7639_s9 + $0xe4] ss:$28 sps:$4 sm:$0xff]   ;;  %v7214_v58 = vld [vmem:[%s7639_s9 + $0x150] ss:$28 sps:$4 sm:$0xff]   ;;  %v601_v60 = vld [vmem:[#allocation5 + $0x7b8] sm:$0xff] }
 0x1cc   : > { %4318 = vmatprep.mubr.bf16.mxu0 %v7203_v18  ;;  %4770 = vmatprep.mubr.bf16.mxu1 %v7203_v18  ;;  %v6288_v18 = vcombine.high %v557_v13, %v561_v14 }
 0x1ce   : > { %4392 = vmatpush1.bf16.msra.mxu0 %v6221_v15  ;;  %4844 = vmatpush1.bf16.msra.mxu1 %v6223_v16  ;;  %v6277_v15 = vcombine.low %v548_v1, %v552_v2  ;;  %v6279_v16 = vcombine.low %v549_v4, %v553_v5  ;;  %v6328_v1 = vcombine.high %v597_v59, %v601_v60  ;;  %v604_v2 = vld [vmem:[#allocation5 + $0x7d0] sm:$0xff]  ;;  %v605_v4 = vld [vmem:[#allocation5 + $0x7d8] sm:$0xff] }
 0x1cf   : > { %4393 = vmatprep.subr.bf16.mxu0 %v6230_v17  ;;  %4845 = vmatprep.subr.bf16.mxu1 %v6232_v19  ;;  %v6286_v17 = vcombine.high %v556_v11, %v560_v12  ;;  %v564_v19 = vld [vmem:[#allocation5 + $0x690] sm:$0xff]  ;;  %v609_v5 = vld [vmem:[#allocation5 + $0x7f8] sm:$0xff] }
 0x1d1   : > { %4319 = vmatmul.mubr.bf16.gmra.mrb[36].mxu0 %v7204_v30  ;;  %4771 = vmatmul.mubr.bf16.gmra.mrb[36].mxu1 %v7204_v30  ;;  %v576_v30 = vld [vmem:[#allocation5 + $0x6f0] sm:$0xff] }
 0x1d2   : > { %4394 = vmatpush1.bf16.msra.mxu0 %v6229_v24  ;;  %4846 = vmatpush1.bf16.msra.mxu1 %v6231_v25  ;;  %v6285_v24 = vcombine.low %v556_v11, %v560_v12  ;;  %v6287_v25 = vcombine.low %v557_v13, %v561_v14  ;;  %v616_v11 = vld [vmem:[#allocation5 + $0x830] sm:$0xff]  ;;  %v7216_v12 = vld [vmem:[%s7639_s9 + $0x188] ss:$28 sps:$4 sm:$0xff]   ;;  %v613_v13 = vld [vmem:[#allocation5 + $0x818] sm:$0xff] }
 0x1d3   : > { %4395 = vmatprep.subr.bf16.mxu0 %v6238_v26  ;;  %4847 = vmatprep.subr.bf16.mxu1 %v6240_v27  ;;  %v6294_v26 = vcombine.high %v564_v19, %v568_v20  ;;  %v7211_v27 = vld [vmem:[%s7639_s9 + $0x11c] ss:$28 sps:$4 sm:$0xff]  }
 0x1d4   : > { %4328 = vmatprep.mubr.bf16.mxu0 %v7205_v36  ;;  %4780 = vmatprep.mubr.bf16.mxu1 %v7205_v36  ;;  %v6304_v36 = vcombine.high %v573_v31, %v577_v32  ;;  %v617_v14 = vld [vmem:[#allocation5 + $0x838] sm:$0xff] }
 0x1d6   : > { %4396 = vmatpush1.bf16.msra.mxu0 %v6237_v33  ;;  %4848 = vmatpush1.bf16.msra.mxu1 %v6239_v34  ;;  %v6293_v33 = vcombine.low %v564_v19, %v568_v20  ;;  %v6295_v34 = vcombine.low %v565_v22, %v569_v23  ;;  %v6344_v19 = vcombine.high %v613_v13, %v617_v14  ;;  %v620_v20 = vld [vmem:[#allocation5 + $0x850] sm:$0xff]  ;;  %v621_v22 = vld [vmem:[#allocation5 + $0x858] sm:$0xff] }
 0x1d7   : > { %4397 = vmatprep.subr.bf16.mxu0 %v6246_v35  ;;  %4849 = vmatprep.subr.bf16.mxu1 %v6248_v37  ;;  %v6302_v35 = vcombine.high %v572_v29, %v576_v30  ;;  %v580_v37 = vld [vmem:[#allocation5 + $0x710] sm:$0xff]  ;;  %v625_v23 = vld [vmem:[#allocation5 + $0x878] sm:$0xff] }
 0x1d9   : > { %4329 = vmatmul.mubr.bf16.gmra.mrb[40].mxu0 %v7206_v48  ;;  %4781 = vmatmul.mubr.bf16.gmra.mrb[40].mxu1 %v7206_v48  ;;  %v592_v48 = vld [vmem:[#allocation5 + $0x770] sm:$0xff] }
 0x1da   : > { %4398 = vmatpush1.bf16.msra.mxu0 %v6245_v42  ;;  %4850 = vmatpush1.bf16.msra.mxu1 %v6247_v43  ;;  %v6301_v42 = vcombine.low %v572_v29, %v576_v30  ;;  %v6303_v43 = vcombine.low %v573_v31, %v577_v32  ;;  %v632_v29 = vld [vmem:[#allocation5 + $0x8b0] sm:$0xff]  ;;  %v7218_v30 = vld [vmem:[%s7639_s9 + $0x8] ss:$28 sps:$4 sm:$0xff]   ;;  %v629_v31 = vld [vmem:[#allocation5 + $0x898] sm:$0xff] }
 0x1db   : > { %4399 = vmatprep.subr.bf16.mxu0 %v6254_v44  ;;  %4851 = vmatprep.subr.bf16.mxu1 %v6256_v45  ;;  %v6310_v44 = vcombine.high %v580_v37, %v584_v38  ;;  %v7213_v45 = vld [vmem:[%s7639_s9 + $0x154] ss:$28 sps:$4 sm:$0xff]   ;;  %v633_v32 = vld [vmem:[#allocation5 + $0x8b8] sm:$0xff] }
 0x1dc   : > { %4338 = vmatprep.mubr.bf16.mxu0 %v7207_v55  ;;  %4790 = vmatprep.mubr.bf16.mxu1 %v7207_v55  ;;  %v6320_v55 = vcombine.high %v589_v49, %v593_v50 }
 0x1de   : > { %4400 = vmatpush1.bf16.msra.mxu0 %v6253_v51  ;;  %4852 = vmatpush1.bf16.msra.mxu1 %v6255_v52  ;;  %v6309_v51 = vcombine.low %v580_v37, %v584_v38  ;;  %v6311_v52 = vcombine.low %v581_v40, %v585_v41  ;;  %v6360_v37 = vcombine.high %v629_v31, %v633_v32  ;;  %v636_v38 = vld [vmem:[#allocation5 + $0x8d0] sm:$0xff]  ;;  %v637_v40 = vld [vmem:[#allocation5 + $0x8d8] sm:$0xff] }
 0x1df   : > { %4401 = vmatprep.subr.bf16.mxu0 %v6262_v53  ;;  %4853 = vmatprep.subr.bf16.mxu1 %v6264_v56  ;;  %v6318_v53 = vcombine.high %v588_v47, %v592_v48  ;;  %v596_v56 = vld [vmem:[#allocation5 + $0x790] sm:$0xff]  ;;  %v641_v41 = vld [vmem:[#allocation5 + $0x8f8] sm:$0xff] }
 0x1e1   : > { %4339 = vmatmul.mubr.bf16.gmra.mrb[44].mxu0 %v7208_v3  ;;  %4791 = vmatmul.mubr.bf16.gmra.mrb[44].mxu1 %v7208_v3  ;;  %v608_v3 = vld [vmem:[#allocation5 + $0x7f0] sm:$0xff] }
 0x1e2   : > { %4402 = vmatpush1.bf16.msra.mxu0 %v6261_v61  ;;  %4854 = vmatpush1.bf16.msra.mxu1 %v6263_v62  ;;  %v6317_v61 = vcombine.low %v588_v47, %v592_v48  ;;  %v6319_v62 = vcombine.low %v589_v49, %v593_v50  ;;  %v648_v47 = vld [vmem:[#allocation5 + $0x930] sm:$0xff]  ;;  %v7220_v48 = vld [vmem:[%s7639_s9 + $0x40] ss:$28 sps:$4 sm:$0xff]  }
 0x1e3   : > { %4403 = vmatprep.subr.bf16.mxu0 %v6270_v63  ;;  %4855 = vmatprep.subr.bf16.mxu1 %v6272_v0  ;;  %v6326_v63 = vcombine.high %v596_v56, %v600_v57  ;;  %v7215_v0 = vld [vmem:[%s7639_s9 + $0x18c] ss:$28 sps:$4 sm:$0xff]   ;;  %v645_v49 = vld [vmem:[#allocation5 + $0x918] sm:$0xff] }
 0x1e4   : > { %4348 = vmatprep.mubr.bf16.mxu0 %v7209_v9  ;;  %4800 = vmatprep.mubr.bf16.mxu1 %v7209_v9  ;;  %v6336_v9 = vcombine.high %v605_v4, %v609_v5  ;;  %v649_v50 = vld [vmem:[#allocation5 + $0x938] sm:$0xff] }
 0x1e6   : > { %4404 = vmatpush1.bf16.msra.mxu0 %v6269_v6  ;;  %4856 = vmatpush1.bf16.msra.mxu1 %v6271_v7  ;;  %v6325_v6 = vcombine.low %v596_v56, %v600_v57  ;;  %v6327_v7 = vcombine.low %v597_v59, %v601_v60  ;;  %v6376_v56 = vcombine.high %v645_v49, %v649_v50  ;;  %v652_v57 = vld [vmem:[#allocation5 + $0x950] sm:$0xff]  ;;  %v653_v59 = vld [vmem:[#allocation5 + $0x958] sm:$0xff] }
 0x1e7   : > { %4405 = vmatprep.subr.bf16.mxu0 %v6278_v8  ;;  %4857 = vmatprep.subr.bf16.mxu1 %v6280_v10  ;;  %v6334_v8 = vcombine.high %v604_v2, %v608_v3  ;;  %v612_v10 = vld [vmem:[#allocation5 + $0x810] sm:$0xff]  ;;  %v657_v60 = vld [vmem:[#allocation5 + $0x978] sm:$0xff] }
 0x1e9   : > { %4349 = vmatmul.mubr.bf16.gmra.mrb[48].mxu0 %v7210_v21  ;;  %4801 = vmatmul.mubr.bf16.gmra.mrb[48].mxu1 %v7210_v21  ;;  %v624_v21 = vld [vmem:[#allocation5 + $0x870] sm:$0xff] }
 0x1ea   : > { %4406 = vmatpush1.bf16.msra.mxu0 %v6277_v15  ;;  %4858 = vmatpush1.bf16.msra.mxu1 %v6279_v16  ;;  %v6333_v15 = vcombine.low %v604_v2, %v608_v3  ;;  %v6335_v16 = vcombine.low %v605_v4, %v609_v5  ;;  %v664_v2 = vld [vmem:[#allocation5 + $0x9b0] sm:$0xff]  ;;  %v661_v4 = vld [vmem:[#allocation5 + $0x998] sm:$0xff] }
 0x1eb   : > { %4407 = vmatprep.subr.bf16.mxu0 %v6286_v17  ;;  %4859 = vmatprep.subr.bf16.mxu1 %v6288_v18  ;;  %v6342_v17 = vcombine.high %v612_v10, %v616_v11  ;;  %v7217_v18 = vld [vmem:[%s7639_s9 + $0xc] ss:$28 sps:$4 sm:$0xff]   ;;  %v7222_v3 = vld [vmem:[%s7639_s9 + $0x78] ss:$28 sps:$4 sm:$0xff]  }
 0x1ec   : > { %4358 = vmatprep.mubr.bf16.mxu0 %v7211_v27  ;;  %4810 = vmatprep.mubr.bf16.mxu1 %v7211_v27  ;;  %v6352_v27 = vcombine.high %v621_v22, %v625_v23  ;;  %v665_v5 = vld [vmem:[#allocation5 + $0x9b8] sm:$0xff] }
 0x1ee   : > { %4408 = vmatpush1.bf16.msra.mxu0 %v6285_v24  ;;  %4860 = vmatpush1.bf16.msra.mxu1 %v6287_v25  ;;  %v6341_v24 = vcombine.low %v612_v10, %v616_v11  ;;  %v6343_v25 = vcombine.low %v613_v13, %v617_v14  ;;  %v6392_v10 = vcombine.high %v661_v4, %v665_v5  ;;  %v668_v11 = vld [vmem:[#allocation5 + $0x9d0] sm:$0xff]  ;;  %v669_v13 = vld [vmem:[#allocation5 + $0x9d8] sm:$0xff] }
 0x1ef   : > { %4409 = vmatprep.subr.bf16.mxu0 %v6294_v26  ;;  %4861 = vmatprep.subr.bf16.mxu1 %v6296_v28  ;;  %v6350_v26 = vcombine.high %v620_v20, %v624_v21  ;;  %v628_v28 = vld [vmem:[#allocation5 + $0x890] sm:$0xff]  ;;  %v673_v14 = vld [vmem:[#allocation5 + $0x9f8] sm:$0xff] }
 0x1f1   : > { %4359 = vmatmul.mubr.bf16.gmra.mrb[52].mxu0 %v7212_v39  ;;  %4811 = vmatmul.mubr.bf16.gmra.mrb[52].mxu1 %v7212_v39  ;;  %v640_v39 = vld [vmem:[#allocation5 + $0x8f0] sm:$0xff] }
 0x1f2   : > { %4410 = vmatpush1.bf16.msra.mxu0 %v6293_v33  ;;  %4862 = vmatpush1.bf16.msra.mxu1 %v6295_v34  ;;  %v6349_v33 = vcombine.low %v620_v20, %v624_v21  ;;  %v6351_v34 = vcombine.low %v621_v22, %v625_v23  ;;  %v680_v20 = vld [vmem:[#allocation5 + $0xa30] sm:$0xff]  ;;  %v677_v22 = vld [vmem:[#allocation5 + $0xa18] sm:$0xff] }
 0x1f3   : > { %4411 = vmatprep.subr.bf16.mxu0 %v6302_v35  ;;  %4863 = vmatprep.subr.bf16.mxu1 %v6304_v36  ;;  %v6358_v35 = vcombine.high %v628_v28, %v632_v29  ;;  %v7219_v36 = vld [vmem:[%s7639_s9 + $0x44] ss:$28 sps:$4 sm:$0xff]   ;;  %v7224_v21 = vld [vmem:[%s7639_s9 + $0xb0] ss:$28 sps:$4 sm:$0xff]   ;;  %v681_v23 = vld [vmem:[#allocation5 + $0xa38] sm:$0xff] }
 0x1f4   : > { %4368 = vmatprep.mubr.bf16.mxu0 %v7213_v45  ;;  %4820 = vmatprep.mubr.bf16.mxu1 %v7213_v45  ;;  %v6368_v45 = vcombine.high %v637_v40, %v641_v41 }
 0x1f6   : > { %4412 = vmatpush1.bf16.msra.mxu0 %v6301_v42  ;;  %4864 = vmatpush1.bf16.msra.mxu1 %v6303_v43  ;;  %v6357_v42 = vcombine.low %v628_v28, %v632_v29  ;;  %v6359_v43 = vcombine.low %v629_v31, %v633_v32  ;;  %v6408_v28 = vcombine.high %v677_v22, %v681_v23  ;;  %v684_v29 = vld [vmem:[#allocation5 + $0xa50] sm:$0xff]  ;;  %v685_v31 = vld [vmem:[#allocation5 + $0xa58] sm:$0xff] }
 0x1f7   : > { %4413 = vmatprep.subr.bf16.mxu0 %v6310_v44  ;;  %4865 = vmatprep.subr.bf16.mxu1 %v6312_v46  ;;  %v6366_v44 = vcombine.high %v636_v38, %v640_v39  ;;  %v644_v46 = vld [vmem:[#allocation5 + $0x910] sm:$0xff]  ;;  %v689_v32 = vld [vmem:[#allocation5 + $0xa78] sm:$0xff] }
 0x1f9   : > { %4369 = vmatmul.mubr.bf16.gmra.mrb[56].mxu0 %v7214_v58  ;;  %4821 = vmatmul.mubr.bf16.gmra.mrb[56].mxu1 %v7214_v58  ;;  %v656_v58 = vld [vmem:[#allocation5 + $0x970] sm:$0xff] }
 0x1fa   : > { %4414 = vmatpush1.bf16.msra.mxu0 %v6309_v51  ;;  %4866 = vmatpush1.bf16.msra.mxu1 %v6311_v52  ;;  %v6365_v51 = vcombine.low %v636_v38, %v640_v39  ;;  %v6367_v52 = vcombine.low %v637_v40, %v641_v41  ;;  %v696_v38 = vld [vmem:[#allocation5 + $0xab0] sm:$0xff]  ;;  %v7226_v39 = vld [vmem:[%s7639_s9 + $0xe8] ss:$28 sps:$4 sm:$0xff]   ;;  %v693_v40 = vld [vmem:[#allocation5 + $0xa98] sm:$0xff] }
 0x1fb   : > { %4415 = vmatprep.subr.bf16.mxu0 %v6318_v53  ;;  %4867 = vmatprep.subr.bf16.mxu1 %v6320_v55  ;;  %v6374_v53 = vcombine.high %v644_v46, %v648_v47  ;;  %v7221_v55 = vld [vmem:[%s7639_s9 + $0x7c] ss:$28 sps:$4 sm:$0xff]  }
 0x1fc   : > { %4378 = vmatprep.mubr.bf16.mxu0 %v7215_v0  ;;  %4830 = vmatprep.mubr.bf16.mxu1 %v7215_v0  ;;  %v6384_v0 = vcombine.high %v653_v59, %v657_v60  ;;  %v697_v41 = vld [vmem:[#allocation5 + $0xab8] sm:$0xff] }
 0x1fe   : > { %4416 = vmatpush1.bf16.msra.mxu0 %v6317_v61  ;;  %4868 = vmatpush1.bf16.msra.mxu1 %v6319_v62  ;;  %v6373_v61 = vcombine.low %v644_v46, %v648_v47  ;;  %v6375_v62 = vcombine.low %v645_v49, %v649_v50  ;;  %v6424_v46 = vcombine.high %v693_v40, %v697_v41  ;;  %v700_v47 = vld [vmem:[#allocation5 + $0xad0] sm:$0xff]  ;;  %v701_v49 = vld [vmem:[#allocation5 + $0xad8] sm:$0xff] }
 0x1ff   : > { %4417 = vmatprep.subr.bf16.mxu0 %v6326_v63  ;;  %4869 = vmatprep.subr.bf16.mxu1 %v6328_v1  ;;  %v6382_v63 = vcombine.high %v652_v57, %v656_v58  ;;  %v660_v1 = vld [vmem:[#allocation5 + $0x990] sm:$0xff]  ;;  %v705_v50 = vld [vmem:[#allocation5 + $0xaf8] sm:$0xff] }
 0x201   : > { %4379 = vmatmul.mubr.bf16.gmra.mrb[60].mxu0 %v7216_v12  ;;  %4831 = vmatmul.mubr.bf16.gmra.mrb[60].mxu1 %v7216_v12  ;;  %v672_v12 = vld [vmem:[#allocation5 + $0x9f0] sm:$0xff] }
 0x202   : > { %4418 = vmatpush1.bf16.msra.mxu0 %v6325_v6  ;;  %4870 = vmatpush1.bf16.msra.mxu1 %v6327_v7  ;;  %v6381_v6 = vcombine.low %v652_v57, %v656_v58  ;;  %v6383_v7 = vcombine.low %v653_v59, %v657_v60  ;;  %v712_v57 = vld [vmem:[#allocation5 + $0xb30] sm:$0xff]  ;;  %v7228_v58 = vld [vmem:[%s7639_s9 + $0x120] ss:$28 sps:$4 sm:$0xff]  }
 0x203   : > { %4419 = vmatprep.subr.bf16.mxu0 %v6334_v8  ;;  %4871 = vmatprep.subr.bf16.mxu1 %v6336_v9  ;;  %v6390_v8 = vcombine.high %v660_v1, %v664_v2  ;;  %v7223_v9 = vld [vmem:[%s7639_s9 + $0xb4] ss:$28 sps:$4 sm:$0xff]   ;;  %v709_v59 = vld [vmem:[#allocation5 + $0xb18] sm:$0xff] }
 0x204   : > { %4421 = vmatprep.mubr.bf16.mxu0 %v7217_v18  ;;  %4873 = vmatprep.mubr.bf16.mxu1 %v7217_v18  ;;  %v6400_v18 = vcombine.high %v669_v13, %v673_v14  ;;  %v713_v60 = vld [vmem:[#allocation5 + $0xb38] sm:$0xff] }
 0x206   : > { %4420 = vmatpush1.bf16.msra.mxu0 %v6333_v15  ;;  %4872 = vmatpush1.bf16.msra.mxu1 %v6335_v16  ;;  %v6389_v15 = vcombine.low %v660_v1, %v664_v2  ;;  %v6391_v16 = vcombine.low %v661_v4, %v665_v5  ;;  %v6440_v1 = vcombine.high %v709_v59, %v713_v60  ;;  %v716_v2 = vld [vmem:[#allocation5 + $0xb50] sm:$0xff]  ;;  %v717_v4 = vld [vmem:[#allocation5 + $0xb58] sm:$0xff] }
 0x207   : > { %4502 = vmatprep.subr.bf16.mxu0 %v6342_v17  ;;  %4954 = vmatprep.subr.bf16.mxu1 %v6344_v19  ;;  %v6398_v17 = vcombine.high %v668_v11, %v672_v12  ;;  %v676_v19 = vld [vmem:[#allocation5 + $0xa10] sm:$0xff]  ;;  %v721_v5 = vld [vmem:[#allocation5 + $0xb78] sm:$0xff] }
 0x209   : > { %4422 = vmatmul.mubr.bf16.vlgmr.msra.gmra.mrb[32].mxu0 %v7218_v30  ;;  %4874 = vmatmul.mubr.bf16.vlgmr.msra.gmra.mrb[32].mxu1 %v7218_v30  ;;  %v688_v30 = vld [vmem:[#allocation5 + $0xa70] sm:$0xff] }
 0x20a   : > { %4503 = vmatpush1.bf16.msra.mxu0 %v6341_v24  ;;  %4955 = vmatpush1.bf16.msra.mxu1 %v6343_v25  ;;  %v6397_v24 = vcombine.low %v668_v11, %v672_v12  ;;  %v6399_v25 = vcombine.low %v669_v13, %v673_v14  ;;  %v728_v11 = vld [vmem:[#allocation5 + $0xbb0] sm:$0xff]  ;;  %v725_v13 = vld [vmem:[#allocation5 + $0xb98] sm:$0xff] }
 0x20b   : > { %4504 = vmatprep.subr.bf16.mxu0 %v6350_v26  ;;  %4956 = vmatprep.subr.bf16.mxu1 %v6352_v27  ;;  %v6406_v26 = vcombine.high %v676_v19, %v680_v20  ;;  %v7225_v27 = vld [vmem:[%s7639_s9 + $0xec] ss:$28 sps:$4 sm:$0xff]   ;;  %v7230_v12 = vld [vmem:[%s7639_s9 + $0x158] ss:$28 sps:$4 sm:$0xff]  }
 0x20c   : > { %4431 = vmatprep.mubr.bf16.mxu0 %v7219_v36  ;;  %4883 = vmatprep.mubr.bf16.mxu1 %v7219_v36  ;;  %v6416_v36 = vcombine.high %v685_v31, %v689_v32  ;;  %v729_v14 = vld [vmem:[#allocation5 + $0xbb8] sm:$0xff] }
 0x20e   : > { %4505 = vmatpush1.bf16.msra.mxu0 %v6349_v33  ;;  %4957 = vmatpush1.bf16.msra.mxu1 %v6351_v34  ;;  %v6405_v33 = vcombine.low %v676_v19, %v680_v20  ;;  %v6407_v34 = vcombine.low %v677_v22, %v681_v23  ;;  %v6456_v19 = vcombine.high %v725_v13, %v729_v14  ;;  %v732_v20 = vld [vmem:[#allocation5 + $0xbd0] sm:$0xff]  ;;  %v733_v22 = vld [vmem:[#allocation5 + $0xbd8] sm:$0xff] }
 0x20f   : > { %4506 = vmatprep.subr.bf16.mxu0 %v6358_v35  ;;  %4958 = vmatprep.subr.bf16.mxu1 %v6360_v37  ;;  %v6414_v35 = vcombine.high %v684_v29, %v688_v30  ;;  %v692_v37 = vld [vmem:[#allocation5 + $0xa90] sm:$0xff]  ;;  %v737_v23 = vld [vmem:[#allocation5 + $0xbf8] sm:$0xff] }
 0x211   : > { %4432 = vmatmul.mubr.bf16.gmra.mrb[36].mxu0 %v7220_v48  ;;  %4884 = vmatmul.mubr.bf16.gmra.mrb[36].mxu1 %v7220_v48  ;;  %v704_v48 = vld [vmem:[#allocation5 + $0xaf0] sm:$0xff] }
 0x212   : > { %4507 = vmatpush1.bf16.msra.mxu0 %v6357_v42  ;;  %4959 = vmatpush1.bf16.msra.mxu1 %v6359_v43  ;;  %v6413_v42 = vcombine.low %v684_v29, %v688_v30  ;;  %v6415_v43 = vcombine.low %v685_v31, %v689_v32  ;;  %v744_v29 = vld [vmem:[#allocation5 + $0xc30] sm:$0xff]  ;;  %v741_v31 = vld [vmem:[#allocation5 + $0xc18] sm:$0xff] }
 0x213   : > { %4508 = vmatprep.subr.bf16.mxu0 %v6366_v44  ;;  %4960 = vmatprep.subr.bf16.mxu1 %v6368_v45  ;;  %v6422_v44 = vcombine.high %v692_v37, %v696_v38  ;;  %v7227_v45 = vld [vmem:[%s7639_s9 + $0x124] ss:$28 sps:$4 sm:$0xff]   ;;  %v7232_v30 = vld [vmem:[%s7639_s9 + $0x190] ss:$28 sps:$4 sm:$0xff]   ;;  %v745_v32 = vld [vmem:[#allocation5 + $0xc38] sm:$0xff] }
 0x214   : > { %4441 = vmatprep.mubr.bf16.mxu0 %v7221_v55  ;;  %4893 = vmatprep.mubr.bf16.mxu1 %v7221_v55  ;;  %v6432_v55 = vcombine.high %v701_v49, %v705_v50 }
 0x216   : > { %4509 = vmatpush1.bf16.msra.mxu0 %v6365_v51  ;;  %4961 = vmatpush1.bf16.msra.mxu1 %v6367_v52  ;;  %v6421_v51 = vcombine.low %v692_v37, %v696_v38  ;;  %v6423_v52 = vcombine.low %v693_v40, %v697_v41  ;;  %v6472_v37 = vcombine.high %v741_v31, %v745_v32  ;;  %v748_v38 = vld [vmem:[#allocation5 + $0xc50] sm:$0xff]  ;;  %v749_v41 = vld [vmem:[#allocation5 + $0xc58] sm:$0xff] }
 0x217   : > { %4510 = vmatprep.subr.bf16.mxu0 %v6374_v53  ;;  %4962 = vmatprep.subr.bf16.mxu1 %v6376_v56  ;;  %v6430_v53 = vcombine.high %v700_v47, %v704_v48  ;;  %v708_v56 = vld [vmem:[#allocation5 + $0xb10] sm:$0xff] }
 0x219   : > { %4442 = vmatmul.mubr.bf16.gmra.mrb[40].mxu0 %v7222_v3  ;;  %4894 = vmatmul.mubr.bf16.gmra.mrb[40].mxu1 %v7222_v3  ;;  %v720_v3 = vld [vmem:[#allocation5 + $0xb70] sm:$0xff] }
 0x21a   : > { %4511 = vmatpush1.bf16.msra.mxu0 %v6373_v61  ;;  %4963 = vmatpush1.bf16.msra.mxu1 %v6375_v62  ;;  %v6429_v61 = vcombine.low %v700_v47, %v704_v48  ;;  %v6431_v62 = vcombine.low %v701_v49, %v705_v50  ;;  %v7234_v47 = vld [vmem:[%s7639_s9 + $0x10] ss:$28 sps:$4 sm:$0xff]   ;;  %v757_v49 = vld [vmem:[#allocation5 + $0xc98] sm:$0xff] }
 0x21b   : > { %4512 = vmatprep.subr.bf16.mxu0 %v6382_v63  ;;  %4964 = vmatprep.subr.bf16.mxu1 %v6384_v0  ;;  %v6438_v63 = vcombine.high %v708_v56, %v712_v57  ;;  %v7229_v0 = vld [vmem:[%s7639_s9 + $0x15c] ss:$28 sps:$4 sm:$0xff]  }
 0x21c   : > { %4451 = vmatprep.mubr.bf16.mxu0 %v7223_v9  ;;  %4903 = vmatprep.mubr.bf16.mxu1 %v7223_v9  ;;  %v6448_v9 = vcombine.high %v717_v4, %v721_v5  ;;  %v761_v50 = vld [vmem:[#allocation5 + $0xcb8] sm:$0xff] }
 0x21e   : > { %4513 = vmatpush1.bf16.msra.mxu0 %v6381_v6  ;;  %4965 = vmatpush1.bf16.msra.mxu1 %v6383_v7  ;;  %v6437_v6 = vcombine.low %v708_v56, %v712_v57  ;;  %v6439_v7 = vcombine.low %v709_v59, %v713_v60  ;;  %v6488_v56 = vcombine.high %v757_v49, %v761_v50  ;;  %v804_v57 = vlaneseq  ;;  %v768_v59 = vld [vmem:[#allocation5 + $0xcf0] sm:$0xff]  ;;  %v765_v60 = vld [vmem:[#allocation5 + $0xcd8] sm:$0xff] }
 0x21f   : > { %4514 = vmatprep.subr.bf16.mxu0 %v6390_v8  ;;  %4966 = vmatprep.subr.bf16.mxu1 %v6392_v10  ;;  %v6446_v8 = vcombine.high %v716_v2, %v720_v3  ;;  %v724_v10 = vld [vmem:[#allocation5 + $0xb90] sm:$0xff] }
 0x221   : > { %4452 = vmatmul.mubr.bf16.gmra.mrb[44].mxu0 %v7224_v21  ;;  %4904 = vmatmul.mubr.bf16.gmra.mrb[44].mxu1 %v7224_v21  ;;  %v736_v21 = vld [vmem:[#allocation5 + $0xbf0] sm:$0xff] }
 0x222   : > { %4515 = vmatpush1.bf16.msra.mxu0 %v6389_v15  ;;  %4967 = vmatpush1.bf16.msra.mxu1 %v6391_v16  ;;  %v6445_v15 = vcombine.low %v716_v2, %v720_v3  ;;  %v6447_v16 = vcombine.low %v717_v4, %v721_v5  ;;  %v7761_v2 = vshrl.u32 %v804_v57, 7  ;;  %v772_v4 = vld [vmem:[#allocation5 + $0xd10] sm:$0xff] }
 0x223   : > { %4516 = vmatprep.subr.bf16.mxu0 %v6398_v17  ;;  %4968 = vmatprep.subr.bf16.mxu1 %v6400_v18  ;;  %v6454_v17 = vcombine.high %v724_v10, %v728_v11  ;;  %v7231_v18 = vld [vmem:[%s7639_s9 + $0x194] ss:$28 sps:$4 sm:$0xff]  }
 0x224   : > { %4461 = vmatprep.mubr.bf16.mxu0 %v7225_v27  ;;  %4913 = vmatprep.mubr.bf16.mxu1 %v7225_v27  ;;  %v6464_v27 = vcombine.high %v733_v22, %v737_v23  ;;  %v776_v5 = vld [vmem:[#allocation5 + $0xd30] sm:$0xff] }
 0x226   : > { %4517 = vmatpush1.bf16.msra.mxu0 %v6397_v24  ;;  %4969 = vmatpush1.bf16.msra.mxu1 %v6399_v25  ;;  %v6453_v24 = vcombine.low %v724_v10, %v728_v11  ;;  %v6455_v25 = vcombine.low %v725_v13, %v729_v14  ;;  %v6502_v11 = vcombine.high %v772_v4, %v776_v5  ;;  %v814_v13 = vsub.s32 2, %v7761_v2 }
 0x227   : > { %4518 = vmatprep.subr.bf16.mxu0 %v6406_v26  ;;  %4970 = vmatprep.subr.bf16.mxu1 %v6408_v28  ;;  %v6462_v26 = vcombine.high %v732_v20, %v736_v21  ;;  %v740_v28 = vld [vmem:[#allocation5 + $0xc10] sm:$0xff] }
 0x228   : > { %v6469_v40 = vcombine.low %v740_v28, %v744_v29 }
 0x229   : > { %4462 = vmatmul.mubr.bf16.gmra.mrb[48].mxu0 %v7226_v39  ;;  %4914 = vmatmul.mubr.bf16.gmra.mrb[48].mxu1 %v7226_v39  ;;  %v752_v39 = vld [vmem:[#allocation5 + $0xc70] sm:$0xff] }
 0x22a   : > { %4519 = vmatpush1.bf16.msra.mxu0 %v6405_v33  ;;  %4971 = vmatpush1.bf16.msra.mxu1 %v6407_v34  ;;  %v6461_v33 = vcombine.low %v732_v20, %v736_v21  ;;  %v6463_v34 = vcombine.low %v733_v22, %v737_v23  ;;  %v7772_v20 = vld [vmem:[#allocation5 + $0xd58] sm:$0xff]  ;;  %v5564_v22 = vld [vmem:[#allocation8] sm:$0xff]  ;;  %v6501_v23 = vcombine.low %v772_v4, %v776_v5 }
 0x22b   : > { %4520 = vmatprep.subr.bf16.mxu0 %v6414_v35  ;;  %4972 = vmatprep.subr.bf16.mxu1 %v6416_v36  ;;  %v6470_v35 = vcombine.high %v740_v28, %v744_v29  ;;  %v7233_v36 = vld [vmem:[%s7639_s9 + $0x14] ss:$28 sps:$4 sm:$0xff]   ;;  %v7774_v21 = vld [vmem:[#allocation5 + $0xd78] sm:$0xff] }
 0x22c   : > { %4471 = vmatprep.mubr.bf16.mxu0 %v7227_v45  ;;  %4923 = vmatprep.mubr.bf16.mxu1 %v7227_v45  ;;  %v756_v45 = vld [vmem:[#allocation5 + $0xc90] sm:$0xff]  ;;  %v6512_v29 = vcombine.high %v7772_v20, %v7774_v21 }
 0x22e   : > { %4521 = vmatpush1.bf16.msra.mxu0 %v6413_v42  ;;  %4973 = vmatpush1.bf16.msra.mxu1 %v6415_v43  ;;  %v753_v42 = vld [vmem:[#allocation5 + $0xc78] sm:$0xff]  ;;  %v6471_v43 = vcombine.low %v741_v31, %v745_v32  ;;  %v7787_v31 = vld [vmem:[#allocation5 + $0xdb0] sm:$0xff] }
 0x22f   : > { %4522 = vmatprep.subr.bf16.mxu0 %v6422_v44  ;;  %4974 = vmatprep.subr.bf16.mxu1 %v6424_v46  ;;  %v6478_v44 = vcombine.high %v748_v38, %v752_v39  ;;  %v760_v46 = vld [vmem:[#allocation5 + $0xcb0] sm:$0xff]  ;;  %v6480_v48 = vcombine.high %v749_v41, %v753_v42 }
 0x231   : > { %4472 = vmatmul.mubr.bf16.gmra.mrb[52].mxu0 %v7228_v58  ;;  %4924 = vmatmul.mubr.bf16.gmra.mrb[52].mxu1 %v7228_v58  ;;  %v764_v58 = vld [vmem:[#allocation5 + $0xcd0] sm:$0xff] }
 0x232   : > { %4523 = vmatpush1.bf16.msra.mxu0 %v6421_v51  ;;  %4975 = vmatpush1.bf16.msra.mxu1 %v6423_v52  ;;  %v6477_v51 = vcombine.low %v748_v38, %v752_v39  ;;  %v7235_v52 = vld [vmem:[%s7639_s9 + $0x4c] ss:$28 sps:$4 sm:$0xff]   ;;  %v7800_v38 = vrot.slane %v5564_v22, %v814_v13 }
 0x233   : > { %4524 = vmatprep.subr.bf16.mxu0 %v6430_v53  ;;  %4976 = vmatprep.subr.bf16.mxu1 %v6432_v55  ;;  %v6479_v53 = vcombine.low %v749_v41, %v753_v42  ;;  %v6486_v55 = vcombine.high %v756_v45, %v760_v46  ;;  %v7806_v41 = vld [vmem:[#allocation5 + $0xdd0] sm:$0xff] }
 0x234   : > { %4481 = vmatprep.mubr.bf16.mxu0 %v7229_v0  ;;  %4933 = vmatprep.mubr.bf16.mxu1 %v7229_v0  ;;  %v6494_v0 = vcombine.high %v764_v58, %v768_v59  ;;  %v7808_v42 = vld [vmem:[#allocation5 + $0xdf0] sm:$0xff] }
 0x236   : > { %4525 = vmatpush1.bf16.msra.mxu0 %v6429_v61  ;;  %4977 = vmatpush1.bf16.msra.mxu1 %v6431_v62  ;;  %v769_v61 = vld [vmem:[#allocation5 + $0xcf8] sm:$0xff]  ;;  %v6485_v62 = vcombine.low %v756_v45, %v760_v46  ;;  %v6511_v45 = vcombine.low %v7772_v20, %v7774_v21 }
 0x237   : > { %4526 = vmatprep.subr.bf16.mxu0 %v6438_v63  ;;  %4978 = vmatprep.subr.bf16.mxu1 %v6440_v1  ;;  %v6487_v63 = vcombine.low %v757_v49, %v761_v50  ;;  %v7236_v1 = vld [vmem:[%s7639_s9 + $0x48] ss:$28 sps:$4 sm:$0xff]   ;;  %v6496_v3 = vcombine.high %v765_v60, %v769_v61  ;;  %v6495_v10 = vcombine.low %v765_v60, %v769_v61  ;;  %v7829_v60 = vld [vmem:[#allocation5 + $0xdd8] sm:$0xff] }
 0x238   : > { %v7831_v61 = vld [vmem:[#allocation5 + $0xdf8] sm:$0xff] }
 0x239   : > { %4482 = vmatmul.mubr.bf16.gmra.mrb[56].mxu0 %v7230_v12  ;;  %4934 = vmatmul.mubr.bf16.gmra.mrb[56].mxu1 %v7230_v12  ;;  %v806_v12 = vsub.s32 0, %v7761_v2 }
 0x23a   : > { %4527 = vmatpush1.bf16.msra.mxu0 %v6437_v6  ;;  %4979 = vmatpush1.bf16.msra.mxu1 %v6439_v7  ;;  %v7237_v6 = vld [vmem:[%s7639_s9 + $0x84] ss:$28 sps:$4 sm:$0xff]   ;;  %v773_v7 = vld [vmem:[#allocation5 + $0xd18] sm:$0xff] }
 0x23b   : > { %4528 = vmatprep.subr.bf16.mxu0 %v6446_v8  ;;  %4980 = vmatprep.subr.bf16.mxu1 %v6448_v9  ;;  %v777_v8 = vld [vmem:[#allocation5 + $0xd38] sm:$0xff]  ;;  %v6493_v9 = vcombine.low %v764_v58, %v768_v59  ;;  %v7789_v32 = vrot.slane %v5564_v22, %v806_v12  ;;  %v6525_v58 = vcombine.low %v7806_v41, %v7808_v42 }
 0x23c   : > { %4491 = vmatprep.mubr.bf16.mxu0 %v7231_v18  ;;  %4943 = vmatprep.mubr.bf16.mxu1 %v7231_v18  ;;  %v6504_v14 = vcombine.high %v773_v7, %v777_v8  ;;  %v810_v18 = vsub.s32 1, %v7761_v2  ;;  %v6526_v59 = vcombine.high %v7806_v41, %v7808_v42 }
 0x23e   : > { %4529 = vmatpush1.bf16.msra.mxu0 %v6445_v15  ;;  %4981 = vmatpush1.bf16.msra.mxu1 %v6447_v16  ;;  %v7766_v15 = vld [vmem:[#allocation5 + $0xd50] sm:$0xff]  ;;  %v7802_v39 = vrot.slane %v5564_v22, %v810_v18 }
 0x23f   : > { %4530 = vmatprep.subr.bf16.mxu0 %v6454_v17  ;;  %4982 = vmatprep.subr.bf16.mxu1 %v6456_v19  ;;  %v7768_v16 = vld [vmem:[#allocation5 + $0xd70] sm:$0xff]  ;;  %v802_v17 = vld [vmem:[#allocation7] sm:$0xff]  ;;  %v818_v19 = vsub.s32 3, %v7761_v2 }
 0x240   : > { %v7781_v28 = vrot.slane %v802_v17, %v814_v13 }
 0x241   : > { %4492 = vmatmul.mubr.bf16.gmra.mrb[60].mxu0 %v7232_v30  ;;  %4944 = vmatmul.mubr.bf16.gmra.mrb[60].mxu1 %v7232_v30  ;;  %v7785_v30 = vld [vmem:[#allocation5 + $0xd90] sm:$0xff] }
 0x242   : > { %4531 = vmatpush1.bf16.msra.mxu0 %v6453_v24  ;;  %4983 = vmatpush1.bf16.msra.mxu1 %v6455_v25  ;;  %v6503_v24 = vcombine.low %v773_v7, %v777_v8  ;;  %v6510_v25 = vcombine.high %v7766_v15, %v7768_v16  ;;  %v6518_v46 = vcombine.high %v7785_v30, %v7787_v31  ;;  %v7240_v8 = vld [vmem:[%s7639_s9 + $0xb8] ss:$28 sps:$4 sm:$0xff]  }
 0x243   : > { %4532 = vmatprep.subr.bf16.mxu0 %v6462_v26  ;;  %4984 = vmatprep.subr.bf16.mxu1 %v6464_v27  ;;  %v7238_v26 = vld [vmem:[%s7639_s9 + $0x80] ss:$28 sps:$4 sm:$0xff]   ;;  %v7779_v27 = vrot.slane %v802_v17, %v806_v12  ;;  %v6517_v50 = vcombine.low %v7785_v30, %v7787_v31 }
 0x244   : > { %4534 = vmatprep.mubr.bf16.mxu0 %v7233_v36  ;;  %4986 = vmatprep.mubr.bf16.mxu1 %v7233_v36  ;;  %v7796_v36 = vld [vmem:[#allocation5 + $0xd98] sm:$0xff] }
 0x246   : > { %4533 = vmatpush1.bf16.msra.mxu0 %v6461_v33  ;;  %4985 = vmatpush1.bf16.msra.mxu1 %v6463_v34  ;;  %v7791_v33 = vrot.slane %v802_v17, %v810_v18  ;;  %v7793_v34 = vrot.slane %v802_v17, %v818_v19 }
 0x247   : > { %4615 = vmatprep.subr.bf16.mxu0 %v6470_v35  ;;  %5067 = vmatprep.subr.bf16.mxu1 %v6472_v37  ;;  %v7239_v35 = vld [vmem:[%s7639_s9 + $0xbc] ss:$28 sps:$4 sm:$0xff]  }
 0x248   : > { %v7798_v37 = vld [vmem:[#allocation5 + $0xdb8] sm:$0xff] }
 0x249   : > { %4535 = vmatmul.mubr.bf16.vlgmr.msra.gmra.mrb[32].mxu0 %v7234_v47  ;;  %4987 = vmatmul.mubr.bf16.vlgmr.msra.gmra.mrb[32].mxu1 %v7234_v47 }
 0x24a   : > { %4616 = vmatpush1.bf16.msra.mxu0 %v6469_v40  ;;  %5068 = vmatpush1.bf16.msra.mxu1 %v6471_v43  ;;  %v6509_v40 = vcombine.low %v7766_v15, %v7768_v16  ;;  %v7241_v15 = vld [vmem:[%s7639_s9 + $0xf4] ss:$28 sps:$4 sm:$0xff]  }
 0x24b   : > { %4544 = vmatprep.mubr.bf16.mxu0 %v7235_v52  ;;  %4996 = vmatprep.mubr.bf16.mxu1 %v7235_v52  ;;  %v6520_v52 = vcombine.high %v7796_v36, %v7798_v37 }
 0x24c   : > { %4617 = vmatprep.subr.bf16.mxu0 %v6478_v44  ;;  %5069 = vmatprep.subr.bf16.mxu1 %v6480_v48  ;;  %v7810_v44 = vrot.slane %v5564_v22, %v818_v19 }
 0x24e   : > { %4618 = vmatpush1.bf16.msra.mxu0 %v6477_v51  ;;  %5070 = vmatpush1.bf16.msra.mxu1 %v6479_v53  ;;  %v6519_v51 = vcombine.low %v7796_v36, %v7798_v37 }
 0x24f   : > { %4619 = vmatprep.subr.bf16.mxu0 %v6486_v55  ;;  %5071 = vmatprep.subr.bf16.mxu1 %v6488_v56 }
 0x251   : > { %4545 = vmatmul.mubr.bf16.gmra.mrb[36].mxu0 %v7236_v1  ;;  %4997 = vmatmul.mubr.bf16.gmra.mrb[36].mxu1 %v7236_v1 }
 0x252   : > { %4554 = vmatprep.mubr.bf16.mxu0 %v7237_v6  ;;  %5006 = vmatprep.mubr.bf16.mxu1 %v7237_v6 }
 0x253   : > { %4620 = vmatpush1.bf16.msra.mxu0 %v6485_v62  ;;  %5072 = vmatpush1.bf16.msra.mxu1 %v6487_v63 }
 0x254   : > { %4621 = vmatprep.subr.bf16.mxu0 %v6494_v0  ;;  %5073 = vmatprep.subr.bf16.mxu1 %v6496_v3 }
 0x257   : > { %4622 = vmatpush1.bf16.msra.mxu0 %v6493_v9  ;;  %5074 = vmatpush1.bf16.msra.mxu1 %v6495_v10  ;;  %v6527_v9 = vcombine.low %v7829_v60, %v7831_v61  ;;  %v6528_v10 = vcombine.high %v7829_v60, %v7831_v61 }
 0x258   : > { %4623 = vmatprep.subr.bf16.mxu0 %v6502_v11  ;;  %5075 = vmatprep.subr.bf16.mxu1 %v6504_v14 }
 0x259   : > { %4555 = vmatmul.mubr.bf16.gmra.mrb[40].mxu0 %v7238_v26  ;;  %5007 = vmatmul.mubr.bf16.gmra.mrb[40].mxu1 %v7238_v26 }
 0x25a   : > { %4564 = vmatprep.mubr.bf16.mxu0 %v7239_v35  ;;  %5016 = vmatprep.mubr.bf16.mxu1 %v7239_v35 }
 0x25b   : > { %4624 = vmatpush1.bf16.msra.mxu0 %v6501_v23  ;;  %5076 = vmatpush1.bf16.msra.mxu1 %v6503_v24 }
 0x25c   : > { %v3745_v43 = vpop.f32.mrb[0].mxu0  ;;  %4625 = vmatprep.subr.bf16.mxu0 %v6510_v25  ;;  %v4197_v48 = vpop.f32.mrb[0].mxu1  ;;  %5077 = vmatprep.subr.bf16.mxu1 %v6512_v29 }
 0x25d   : > { %v6531_v47 = vadd.f32 %v3745_v43, %v7779_v27  ;;  %v3747_v49 = vpop.f32.mrb[1].mxu0  ;;  %v6563_v53 = vadd.f32 %v4197_v48, %v7781_v28  ;;  %v4199_v56 = vpop.f32.mrb[1].mxu1 }
 0x25e   : > { %v6532_v55 = vadd.f32 %v3747_v49, %v7791_v33  ;;  %v3749_v57 = vpop.f32.mrb[2].mxu0  ;;  %v6564_v63 = vadd.f32 %v4199_v56, %v7793_v34  ;;  %v4201_v1 = vpop.f32.mrb[2].mxu1 }
 0x25f   : > { %vm5180_vm0 = vcmp.gt.f32.partialorder %v6531_v47, 0.0  ;;  %v5308_v62 = vmul.f32 0.01, %v6531_v47  ;;  %v6533_v0 = vadd.f32 %v3749_v57, %v7779_v27  ;;  %v3751_v3 = vpop.f32.mrb[3].mxu0  ;;  %4626 = vmatpush1.bf16.msra.mxu0 %v6509_v40  ;;  %vm5182_vm1 = vcmp.gt.f32.partialorder %v6563_v53, 0.0  ;;  %5078 = vmatpush1.bf16.msra.mxu1 %v6511_v45  ;;  %v4203_v7 = vpop.f32.mrb[3].mxu1 }
 0x260   : > { %v5310_v4 = vmul.f32 0.01, %v6563_v53  ;;  %vm5181_vm2 = vcmp.gt.f32.partialorder %v6532_v55, 0.0  ;;  %v5309_v5 = vmul.f32 0.01, %v6532_v55  ;;  %4627 = vmatprep.subr.bf16.mxu0 %v6518_v46  ;;  %5079 = vmatprep.subr.bf16.mxu1 %v6520_v52  ;;  %vm5183_vm4 = vcmp.gt.f32.partialorder %v6564_v63, 0.0 }
 0x261   : > { %v5436_v6 = vsel %vm5180_vm0, %v6531_v47, %v5308_v62  ;;  %vm5188_vm3 = vcmp.gt.f32.partialorder %v6533_v0, 0.0  ;;  %4565 = vmatmul.mubr.bf16.gmra.mrb[44].mxu0 %v7240_v8  ;;  %v5316_v14 = vmul.f32 0.01, %v6533_v0  ;;  %5017 = vmatmul.mubr.bf16.gmra.mrb[44].mxu1 %v7240_v8  ;;  %v5311_v17 = vmul.f32 0.01, %v6564_v63 }
 0x262   : > { %v5606_v11 = vmul.f32 %v7789_v32, %v5436_v6  ;;  %v5438_v12 = vsel %vm5182_vm1, %v6563_v53, %v5310_v4  ;;  %v5437_v13 = vsel %vm5181_vm2, %v6532_v55, %v5309_v5  ;;  %4574 = vmatprep.mubr.bf16.mxu0 %v7241_v15  ;;  %v6565_v18 = vadd.f32 %v4201_v1, %v7781_v28  ;;  %v7243_v62 = vld [vmem:[%s7639_s9 + $0x12c] ss:$28 sps:$4 sm:$0xff]  }
 0x263   : > { %v5607_v16 = vmul.f32 %v7802_v39, %v5437_v13  ;;  %5026 = vmatprep.mubr.bf16.mxu1 %v7241_v15  ;;  %v7845_v19 = vmul.f32 %v7800_v38, %v5438_v12  ;;  %v5444_v20 = vsel %vm5188_vm3, %v6533_v0, %v5316_v14  ;;  %v6534_v21 = vadd.f32 %v3751_v3, %v7791_v33 }
 0x264   : > { %v6566_v22 = vadd.f32 %v4203_v7, %v7793_v34  ;;  %v3755_v23 = vpop.f32.mrb[4].mxu0  ;;  %4628 = vmatpush1.bf16.msra.mxu0 %v6517_v50  ;;  %v5614_v25 = vmul.f32 %v7789_v32, %v5444_v20  ;;  %vm5190_vm5 = vcmp.gt.f32.partialorder %v6565_v18, 0.0  ;;  %v5318_v26 = vmul.f32 0.01, %v6565_v18  ;;  %v4207_v29 = vpop.f32.mrb[4].mxu1  ;;  %5080 = vmatpush1.bf16.msra.mxu1 %v6519_v51 }
 0x265   : > { %v7850_v24 = vadd.f32 %v5607_v16, %v5606_v11  ;;  %v3757_v30 = vpop.f32.mrb[5].mxu0  ;;  %4629 = vmatprep.subr.bf16.mxu0 %v6526_v59  ;;  %vm5189_vm6 = vcmp.gt.f32.partialorder %v6534_v21, 0.0  ;;  %v5317_v31 = vmul.f32 0.01, %v6534_v21  ;;  %5081 = vmatprep.subr.bf16.mxu1 %v6528_v10  ;;  %v6535_v37 = vadd.f32 %v3755_v23, %v7779_v27  ;;  %v4209_v45 = vpop.f32.mrb[5].mxu1 }
 0x266   : > { %vm5191_vm7 = vcmp.gt.f32.partialorder %v6566_v22, 0.0  ;;  %v5319_v35 = vmul.f32 0.01, %v6566_v22  ;;  %v5446_v36 = vsel %vm5190_vm5, %v6565_v18, %v5318_v26  ;;  %v6567_v40 = vadd.f32 %v4207_v29, %v7781_v28  ;;  %v3759_v46 = vpop.f32.mrb[6].mxu0  ;;  %v4211_v51 = vpop.f32.mrb[6].mxu1 }
 0x267   : > { %v6536_v43 = vadd.f32 %v3757_v30, %v7791_v33  ;;  %v5439_v47 = vsel %vm5183_vm4, %v6564_v63, %v5311_v17  ;;  %v5616_v48 = vmul.f32 %v7800_v38, %v5446_v36  ;;  %v5445_v49 = vsel %vm5189_vm6, %v6534_v21, %v5317_v31  ;;  %v3761_v52 = vpop.f32.mrb[7].mxu0  ;;  %v4213_v57 = vpop.f32.mrb[7].mxu1  ;;  %v7242_v59 = vld [vmem:[%s7639_s9 + $0xf0] ss:$28 sps:$4 sm:$0xff]  }
 0x268   : > { %v6568_v50 = vadd.f32 %v4209_v45, %v7793_v34  ;;  %4630 = vmatpush1.bf16.msra.mxu0 %v6525_v58  ;;  %v5615_v53 = vmul.f32 %v7802_v39, %v5445_v49  ;;  %v5447_v55 = vsel %vm5191_vm7, %v6566_v22, %v5319_v35  ;;  %vm5196_vm8 = vcmp.gt.f32.partialorder %v6535_v37, 0.0  ;;  %5082 = vmatpush1.bf16.msra.mxu1 %v6527_v9  ;;  %v7244_v35 = vld [vmem:[%s7639_s9 + $0x128] ss:$28 sps:$4 sm:$0xff]  }
 0x269   : > { %v5324_v56 = vmul.f32 0.01, %v6535_v37  ;;  %4575 = vmatmul.mubr.bf16.gmra.mrb[48].mxu0 %v7242_v59  ;;  %vm5198_vm9 = vcmp.gt.f32.partialorder %v6567_v40, 0.0  ;;  %v5326_v60 = vmul.f32 0.01, %v6567_v40  ;;  %vm5197_vm10 = vcmp.gt.f32.partialorder %v6536_v43, 0.0  ;;  %5027 = vmatmul.mubr.bf16.gmra.mrb[48].mxu1 %v7242_v59 }
 0x26a   : > { %v5325_v61 = vmul.f32 0.01, %v6536_v43  ;;  %4584 = vmatprep.mubr.bf16.mxu0 %v7243_v62  ;;  %v5743_v63 = vadd.f32 %v5615_v53, %v5614_v25  ;;  %vm5199_vm11 = vcmp.gt.f32.partialorder %v6568_v50, 0.0  ;;  %v5327_v42 = vmul.f32 0.01, %v6568_v50  ;;  %5036 = vmatprep.mubr.bf16.mxu1 %v7243_v62 }
 0x26b   : > { %v5452_v41 = vsel %vm5196_vm8, %v6535_v37, %v5324_v56  ;;  %v7867_v58 = vmul.f32 %v7810_v44, %v5439_v47  ;;  %v6537_v3 = vadd.f32 %v3759_v46, %v7779_v27  ;;  %v5617_v5 = vmul.f32 %v7810_v44, %v5447_v55 }
 0x26c   : > { %v5622_v0 = vmul.f32 %v7789_v32, %v5452_v41  ;;  %v5453_v1 = vsel %vm5197_vm10, %v6536_v43, %v5325_v61  ;;  %v3765_v4 = vpop.f32.mrb[8].mxu0  ;;  %v5744_v6 = vadd.f32 %v5743_v63, %v5616_v48  ;;  %v7873_v7 = vsel %vm5198_vm9, %v6567_v40, %v5326_v60  ;;  %v4217_v9 = vpop.f32.mrb[8].mxu1  ;;  %v7245_v43 = vld [vmem:[%s7639_s9 + $0x164] ss:$28 sps:$4 sm:$0xff]  }
 0x26d   : > { %v5623_v8 = vmul.f32 %v7802_v39, %v5453_v1  ;;  %v3767_v10 = vpop.f32.mrb[9].mxu0  ;;  %v7876_v11 = vsel %vm5199_vm11, %v6568_v50, %v5327_v42  ;;  %vm5204_vm12 = vcmp.gt.f32.partialorder %v6537_v3, 0.0  ;;  %v5332_v12 = vmul.f32 0.01, %v6537_v3  ;;  %v4219_v14 = vpop.f32.mrb[9].mxu1 }
 0x26e   : > { %v6569_v13 = vadd.f32 %v4211_v51, %v7781_v28  ;;  %v3769_v15 = vpop.f32.mrb[10].mxu0  ;;  %v7879_v16 = vadd.f32 %v5744_v6, %v5617_v5  ;;  %v6538_v18 = vadd.f32 %v3761_v52, %v7791_v33  ;;  %v6570_v20 = vadd.f32 %v4213_v57, %v7793_v34  ;;  %v4221_v21 = vpop.f32.mrb[10].mxu1 }
 0x26f   : > { %v7881_v17 = vadd.f32 %v5623_v8, %v5622_v0  ;;  %v3771_v22 = vpop.f32.mrb[11].mxu0  ;;  %v5460_v23 = vsel %vm5204_vm12, %v6537_v3, %v5332_v12  ;;  %v6539_v26 = vadd.f32 %v3765_v4, %v7779_v27  ;;  %v7886_v29 = vpop.f32.mrb[11].mxu1  ;;  %v6571_v47 = vadd.f32 %v4217_v9, %v7781_v28 }
 0x270   : > { %vm5206_vm13 = vcmp.gt.f32.partialorder %v6569_v13, 0.0  ;;  %v5334_v25 = vmul.f32 0.01, %v6569_v13  ;;  %v5630_v30 = vmul.f32 %v7789_v32, %v5460_v23  ;;  %vm5205_vm14 = vcmp.gt.f32.partialorder %v6538_v18, 0.0 }
 0x271   : > { %v5333_v31 = vmul.f32 0.01, %v6538_v18  ;;  %vm5207_vm15 = vcmp.gt.f32.partialorder %v6570_v20, 0.0  ;;  %4585 = vmatmul.mubr.bf16.gmra.mrb[52].mxu0 %v7244_v35  ;;  %v5335_v37 = vmul.f32 0.01, %v6570_v20  ;;  %vm5212_vm0 = vcmp.gt.f32.partialorder %v6539_v26, 0.0  ;;  %5037 = vmatmul.mubr.bf16.gmra.mrb[52].mxu1 %v7244_v35 }
 0x272   : > { %v5462_v36 = vsel %vm5206_vm13, %v6569_v13, %v5334_v25  ;;  %v5340_v40 = vmul.f32 0.01, %v6539_v26  ;;  %4594 = vmatprep.mubr.bf16.mxu0 %v7245_v43  ;;  %v6540_v48 = vadd.f32 %v3767_v10, %v7791_v33  ;;  %5046 = vmatprep.mubr.bf16.mxu1 %v7245_v43  ;;  %v6572_v52 = vadd.f32 %v4219_v14, %v7793_v34  ;;  %v7247_v25 = vld [vmem:[%s7639_s9 + $0x19c] ss:$28 sps:$4 sm:$0xff]  }
 0x273   : > { %v5632_v45 = vmul.f32 %v7800_v38, %v5462_v36  ;;  %v5461_v46 = vsel %vm5205_vm14, %v6538_v18, %v5333_v31  ;;  %v5463_v50 = vsel %vm5207_vm15, %v6570_v20, %v5335_v37  ;;  %vm5214_vm1 = vcmp.gt.f32.partialorder %v6571_v47, 0.0  ;;  %v7246_v18 = vld [vmem:[%s7639_s9 + $0x160] ss:$28 sps:$4 sm:$0xff]  }
 0x274   : > { %v5631_v49 = vmul.f32 %v7802_v39, %v5461_v46  ;;  %v5468_v51 = vsel %vm5212_vm0, %v6539_v26, %v5340_v40  ;;  %v3775_v53 = vpop.f32.mrb[12].mxu0  ;;  %v5633_v55 = vmul.f32 %v7810_v44, %v5463_v50  ;;  %v5342_v57 = vmul.f32 0.01, %v6571_v47  ;;  %v4227_v59 = vpop.f32.mrb[12].mxu1 }
 0x275   : > { %v5638_v56 = vmul.f32 %v7789_v32, %v5468_v51  ;;  %v3777_v60 = vpop.f32.mrb[13].mxu0  ;;  %vm5213_vm2 = vcmp.gt.f32.partialorder %v6540_v48, 0.0  ;;  %v5341_v62 = vmul.f32 0.01, %v6540_v48  ;;  %vm5215_vm3 = vcmp.gt.f32.partialorder %v6572_v52, 0.0  ;;  %v4229_v63 = vpop.f32.mrb[13].mxu1 }
 0x276   : > { %v5761_v61 = vadd.f32 %v5631_v49, %v5630_v30  ;;  %v3779_v41 = vpop.f32.mrb[14].mxu0  ;;  %v5470_v42 = vsel %vm5214_vm1, %v6571_v47, %v5342_v57  ;;  %v5343_v0 = vmul.f32 0.01, %v6572_v52  ;;  %v6541_v1 = vadd.f32 %v3769_v15, %v7779_v27  ;;  %v7901_v4 = vpop.f32.mrb[14].mxu1 }
 0x277   : > { %v6573_v3 = vadd.f32 %v4221_v21, %v7781_v28  ;;  %v7903_v5 = vpop.f32.mrb[15].mxu0  ;;  %v5640_v8 = vmul.f32 %v7800_v38, %v5470_v42  ;;  %v5469_v9 = vsel %vm5213_vm2, %v6540_v48, %v5341_v62  ;;  %v6542_v10 = vadd.f32 %v3771_v22, %v7791_v33  ;;  %v7907_v12 = vpop.f32.mrb[15].mxu1 }
 0x278   : > { %v5762_v6 = vadd.f32 %v5761_v61, %v5632_v45  ;;  %v5639_v13 = vmul.f32 %v7802_v39, %v5469_v9  ;;  %v5471_v14 = vsel %vm5215_vm3, %v6572_v52, %v5343_v0  ;;  %vm5220_vm4 = vcmp.gt.f32.partialorder %v6541_v1, 0.0 }
 0x279   : > { %v5348_v15 = vmul.f32 0.01, %v6541_v1  ;;  %4595 = vmatmul.mubr.bf16.gmra.mrb[56].mxu0 %v7246_v18  ;;  %v5641_v21 = vmul.f32 %v7810_v44, %v5471_v14  ;;  %vm5222_vm5 = vcmp.gt.f32.partialorder %v6573_v3, 0.0  ;;  %v5350_v23 = vmul.f32 0.01, %v6573_v3  ;;  %5047 = vmatmul.mubr.bf16.gmra.mrb[56].mxu1 %v7246_v18 }
 0x27a   : > { %v7911_v20 = vadd.f32 %v5762_v6, %v5633_v55  ;;  %4604 = vmatprep.mubr.bf16.mxu0 %v7247_v25  ;;  %v5770_v26 = vadd.f32 %v5639_v13, %v5638_v56  ;;  %vm5221_vm6 = vcmp.gt.f32.partialorder %v6542_v10, 0.0  ;;  %v5349_v30 = vmul.f32 0.01, %v6542_v10  ;;  %5056 = vmatprep.mubr.bf16.mxu1 %v7247_v25 }
 0x27b   : > { %v5476_v22 = vsel %vm5220_vm4, %v6541_v1, %v5348_v15  ;;  %v5478_v35 = vsel %vm5222_vm5, %v6573_v3, %v5350_v23  ;;  %v6574_v36 = vadd.f32 %v7886_v29, %v7793_v34  ;;  %v6543_v37 = vadd.f32 %v3775_v53, %v7779_v27 }
 0x27c   : > { %v5646_v31 = vmul.f32 %v7789_v32, %v5476_v22  ;;  %v3785_v40 = vpop.f32.mrb[16].mxu0  ;;  %v5771_v43 = vadd.f32 %v5770_v26, %v5640_v8  ;;  %v5648_v45 = vmul.f32 %v7800_v38, %v5478_v35  ;;  %v5477_v46 = vsel %vm5221_vm6, %v6542_v10, %v5349_v30  ;;  %v7921_v48 = vpop.f32.mrb[16].mxu1  ;;  %v7248_v10 = vld [vmem:[%s7639_s9 + $0x198] ss:$28 sps:$4 sm:$0xff]  }
 0x27d   : > { %v6575_v47 = vadd.f32 %v4227_v59, %v7781_v28  ;;  %v7923_v49 = vpop.f32.mrb[17].mxu0  ;;  %v5647_v50 = vmul.f32 %v7802_v39, %v5477_v46  ;;  %vm5223_vm7 = vcmp.gt.f32.partialorder %v6574_v36, 0.0  ;;  %v5351_v51 = vmul.f32 0.01, %v6574_v36  ;;  %v7926_v52 = vpop.f32.mrb[17].mxu1 }
 0x27e   : > { %vm5228_vm8 = vcmp.gt.f32.partialorder %v6543_v37, 0.0  ;;  %v7928_v29 = vpop.f32.mrb[18].mxu0  ;;  %v7930_v53 = vadd.f32 %v5771_v43, %v5641_v21  ;;  %v5356_v55 = vmul.f32 0.01, %v6543_v37  ;;  %v7932_v57 = vpop.f32.mrb[18].mxu1  ;;  %v6544_v62 = vadd.f32 %v3777_v60, %v7791_v33 }
 0x27f   : > { %vm5230_vm9 = vcmp.gt.f32.partialorder %v6575_v47, 0.0  ;;  %v5358_v56 = vmul.f32 0.01, %v6575_v47  ;;  %v5779_v59 = vadd.f32 %v5647_v50, %v5646_v31  ;;  %v5479_v61 = vsel %vm5223_vm7, %v6574_v36, %v5351_v51  ;;  %v7936_v0 = vpop.f32.mrb[19].mxu0  ;;  %v7938_v1 = vpop.f32.mrb[19].mxu1 }
 0x280   : > { %v6576_v42 = vadd.f32 %v4229_v63, %v7793_v34  ;;  %v5649_v3 = vmul.f32 %v7810_v44, %v5479_v61  ;;  %v5484_v6 = vsel %vm5228_vm8, %v6543_v37, %v5356_v55  ;;  %v6545_v9 = vadd.f32 %v3779_v41, %v7779_v27 }
 0x281   : > { %v5486_v8 = vsel %vm5230_vm9, %v6575_v47, %v5358_v56  ;;  %4605 = vmatmul.mubr.bf16.gmra.mrb[60].mxu0 %v7248_v10  ;;  %v5780_v13 = vadd.f32 %v5779_v59, %v5648_v45  ;;  %v5654_v14 = vmul.f32 %v7789_v32, %v5484_v6  ;;  %vm5229_vm10 = vcmp.gt.f32.partialorder %v6544_v62, 0.0  ;;  %5057 = vmatmul.mubr.bf16.gmra.mrb[60].mxu1 %v7248_v10 }
 0x282   : > { %v5656_v15 = vmul.f32 %v7800_v38, %v5486_v8  ;;  %4647 = vmatprep.mubr.bf16.mxu0 %v7425_v54  ;;  %v5357_v60 = vmul.f32 0.01, %v6544_v62  ;;  %vm5231_vm11 = vcmp.gt.f32.partialorder %v6576_v42, 0.0  ;;  %v5359_v63 = vmul.f32 0.01, %v6576_v42  ;;  %5099 = vmatprep.mubr.bf16.mxu1 %v7425_v54 }
 0x283   : > { %vm5236_vm12 = vcmp.gt.f32.partialorder %v6545_v9, 0.0  ;;  %v7947_v18 = vadd.f32 %v5780_v13, %v5649_v3  ;;  %v5364_v41 = vmul.f32 0.01, %v6545_v9  ;;  %v6577_v21 = vadd.f32 %v7901_v4, %v7781_v28  ;;  %v7249_v3 = vld [vmem:[%s7639_s9 + $0x18] ss:$28 sps:$4 sm:$0xff]  }
 0x284   : > { %v6546_v23 = vadd.f32 %v7903_v5, %v7791_v33  ;;  %v7953_v25 = vpop.f32.mrb[20].mxu0  ;;  %v5485_v26 = vsel %vm5229_vm10, %v6544_v62, %v5357_v60  ;;  %v5487_v22 = vsel %vm5231_vm11, %v6576_v42, %v5359_v63  ;;  %v6578_v30 = vadd.f32 %v7907_v12, %v7793_v34  ;;  %v7958_v35 = vpop.f32.mrb[20].mxu1 }
 0x285   : > { %v6547_v31 = vadd.f32 %v3785_v40, %v7779_v27  ;;  %v7960_v36 = vpop.f32.mrb[21].mxu0  ;;  %v5655_v37 = vmul.f32 %v7802_v39, %v5485_v26  ;;  %v5657_v4 = vmul.f32 %v7810_v44, %v5487_v22  ;;  %v5492_v43 = vsel %vm5236_vm12, %v6545_v9, %v5364_v41  ;;  %v7964_v5 = vpop.f32.mrb[21].mxu1 }
 0x286   : > { %vm5238_vm13 = vcmp.gt.f32.partialorder %v6577_v21, 0.0  ;;  %v7966_v45 = vpop.f32.mrb[22].mxu0  ;;  %v5662_v46 = vmul.f32 %v7789_v32, %v5492_v43  ;;  %v5366_v12 = vmul.f32 0.01, %v6577_v21  ;;  %vm5237_vm14 = vcmp.gt.f32.partialorder %v6546_v23, 0.0  ;;  %v7969_v47 = vpop.f32.mrb[22].mxu1 }
 0x287   : > { %v5365_v40 = vmul.f32 0.01, %v6546_v23  ;;  %v5788_v50 = vadd.f32 %v5655_v37, %v5654_v14  ;;  %vm5239_vm15 = vcmp.gt.f32.partialorder %v6578_v30, 0.0  ;;  %v5367_v51 = vmul.f32 0.01, %v6578_v30  ;;  %v7971_v55 = vpop.f32.mrb[23].mxu0 }
 0x288   : > { %vm5244_vm0 = vcmp.gt.f32.partialorder %v6547_v31, 0.0  ;;  %v7973_v56 = vpop.f32.mrb[23].mxu1  ;;  %v5494_v59 = vsel %vm5238_vm13, %v6577_v21, %v5366_v12  ;;  %v5372_v62 = vmul.f32 0.01, %v6547_v31  ;;  %v6579_v42 = vadd.f32 %v7921_v48, %v7781_v28 }
 0x289   : > { %v5493_v61 = vsel %vm5237_vm14, %v6546_v23, %v5365_v40  ;;  %4648 = vmatmul.mubr.bf16.vlgmr.msra.gmra.mrb[32].mxu0 %v7249_v3  ;;  %v5789_v6 = vadd.f32 %v5788_v50, %v5656_v15  ;;  %v5664_v8 = vmul.f32 %v7800_v38, %v5494_v59  ;;  %v5495_v10 = vsel %vm5239_vm15, %v6578_v30, %v5367_v51 }
 0x28a   : > { %v5663_v9 = vmul.f32 %v7802_v39, %v5493_v61  ;;  %5100 = vmatmul.mubr.bf16.vlgmr.msra.gmra.mrb[32].mxu1 %v7249_v3  ;;  %v5665_v13 = vmul.f32 %v7810_v44, %v5495_v10  ;;  %v5500_v14 = vsel %vm5244_vm0, %v6547_v31, %v5372_v62  ;;  %vm5246_vm1 = vcmp.gt.f32.partialorder %v6579_v42, 0.0  ;;  %4657 = vmatprep.mubr.bf16.mxu0 %v7425_v54 }
 0x28b   : > { %v5374_v60 = vmul.f32 0.01, %v6579_v42  ;;  %5109 = vmatprep.mubr.bf16.mxu1 %v7425_v54  ;;  %v7983_v63 = vadd.f32 %v5789_v6, %v5657_v4  ;;  %v5670_v15 = vmul.f32 %v7789_v32, %v5500_v14  ;;  %v6548_v41 = vadd.f32 %v7923_v49, %v7791_v33 }
 0x28c   : > { %v5797_v48 = vadd.f32 %v5663_v9, %v5662_v46  ;;  %v7988_v21 = vpop.f32.mrb[24].mxu0  ;;  %v6580_v26 = vadd.f32 %v7926_v52, %v7793_v34  ;;  %v6549_v22 = vadd.f32 %v7928_v29, %v7779_v27  ;;  %v6581_v30 = vadd.f32 %v7932_v57, %v7781_v28  ;;  %v7996_v31 = vpop.f32.mrb[24].mxu1 }
 0x28d   : > { %v5502_v23 = vsel %vm5246_vm1, %v6579_v42, %v5374_v60  ;;  %v7998_v37 = vpop.f32.mrb[25].mxu0  ;;  %vm5245_vm2 = vcmp.gt.f32.partialorder %v6548_v41, 0.0  ;;  %v5373_v49 = vmul.f32 0.01, %v6548_v41  ;;  %v8001_v46 = vpop.f32.mrb[25].mxu1  ;;  %v6550_v3 = vadd.f32 %v7936_v0, %v7791_v33 }
 0x28e   : > { %v5798_v4 = vadd.f32 %v5797_v48, %v5664_v8  ;;  %v5672_v43 = vmul.f32 %v7800_v38, %v5502_v23  ;;  %v8003_v12 = vpop.f32.mrb[26].mxu0  ;;  %vm5247_vm3 = vcmp.gt.f32.partialorder %v6580_v26, 0.0  ;;  %v5375_v52 = vmul.f32 0.01, %v6580_v26  ;;  %v8007_v51 = vpop.f32.mrb[26].mxu1 }
 0x28f   : > { %vm5252_vm4 = vcmp.gt.f32.partialorder %v6549_v22, 0.0  ;;  %v5380_v29 = vmul.f32 0.01, %v6549_v22  ;;  %v5501_v57 = vsel %vm5245_vm2, %v6548_v41, %v5373_v49  ;;  %vm5254_vm5 = vcmp.gt.f32.partialorder %v6581_v30, 0.0  ;;  %v8009_v59 = vpop.f32.mrb[27].mxu0  ;;  %v8014_v6 = vpop.f32.mrb[27].mxu1 }
 0x290   : > { %v8005_v40 = vadd.f32 %v5798_v4, %v5665_v13  ;;  %v5382_v50 = vmul.f32 0.01, %v6581_v30  ;;  %v5671_v61 = vmul.f32 %v7802_v39, %v5501_v57  ;;  %v5503_v62 = vsel %vm5247_vm3, %v6580_v26, %v5375_v52  ;;  %v7250_v8 = vld [vmem:[%s7639_s9 + $0x50] ss:$28 sps:$4 sm:$0xff]  }
 0x291   : > { %v5508_v42 = vsel %vm5252_vm4, %v6549_v22, %v5380_v29  ;;  %4658 = vmatmul.mubr.bf16.gmra.mrb[36].mxu0 %v7250_v8  ;;  %v5673_v9 = vmul.f32 %v7810_v44, %v5503_v62  ;;  %v6582_v14 = vadd.f32 %v7938_v1, %v7793_v34  ;;  %vm5253_vm6 = vcmp.gt.f32.partialorder %v6550_v3, 0.0 }
 0x292   : > { %v5678_v10 = vmul.f32 %v7789_v32, %v5508_v42  ;;  %v5510_v13 = vsel %vm5254_vm5, %v6581_v30, %v5382_v50  ;;  %5110 = vmatmul.mubr.bf16.gmra.mrb[36].mxu1 %v7250_v8  ;;  %v5806_v60 = vadd.f32 %v5671_v61, %v5670_v15  ;;  %v5381_v41 = vmul.f32 0.01, %v6550_v3  ;;  %4667 = vmatprep.mubr.bf16.mxu0 %v7425_v54 }
 0x293   : > { %v5680_v48 = vmul.f32 %v7800_v38, %v5510_v13  ;;  %5119 = vmatprep.mubr.bf16.mxu1 %v7425_v54  ;;  %vm5255_vm7 = vcmp.gt.f32.partialorder %v6582_v14, 0.0  ;;  %v5383_v0 = vmul.f32 0.01, %v6582_v14  ;;  %v6551_v23 = vadd.f32 %v7953_v25, %v7779_v27 }
 0x294   : > { %v6583_v26 = vadd.f32 %v7958_v35, %v7781_v28  ;;  %v8028_v22 = vpop.f32.mrb[28].mxu0  ;;  %v5807_v1 = vadd.f32 %v5806_v60, %v5672_v43  ;;  %v5509_v15 = vsel %vm5253_vm6, %v6550_v3, %v5381_v41  ;;  %v6552_v30 = vadd.f32 %v7960_v36, %v7791_v33  ;;  %v8034_v49 = vpop.f32.mrb[28].mxu1  ;;  %v7251_v41 = vld [vmem:[%s7639_s9 + $0x88] ss:$28 sps:$4 sm:$0xff]  }
 0x295   : > { %v6584_v4 = vadd.f32 %v7964_v5, %v7793_v34  ;;  %v8036_v52 = vpop.f32.mrb[29].mxu0  ;;  %v5679_v29 = vmul.f32 %v7802_v39, %v5509_v15  ;;  %v5511_v25 = vsel %vm5255_vm7, %v6582_v14, %v5383_v0  ;;  %vm5260_vm8 = vcmp.gt.f32.partialorder %v6551_v23, 0.0  ;;  %v8039_v35 = vpop.f32.mrb[29].mxu1 }
 0x296   : > { %v5388_v57 = vmul.f32 0.01, %v6551_v23  ;;  %v8041_v50 = vpop.f32.mrb[30].mxu0  ;;  %v8043_v43 = vadd.f32 %v5807_v1, %v5673_v9  ;;  %v5681_v36 = vmul.f32 %v7810_v44, %v5511_v25  ;;  %vm5262_vm9 = vcmp.gt.f32.partialorder %v6583_v26, 0.0  ;;  %v8046_v61 = vpop.f32.mrb[30].mxu1 }
 0x297   : > { %v5390_v5 = vmul.f32 0.01, %v6583_v26  ;;  %v8048_v62 = vpop.f32.mrb[31].mxu0  ;;  %v5815_v42 = vadd.f32 %v5679_v29, %v5678_v10  ;;  %vm5261_vm10 = vcmp.gt.f32.partialorder %v6552_v30, 0.0  ;;  %v5389_v8 = vmul.f32 0.01, %v6552_v30 }
 0x298   : > { %v5516_v3 = vsel %vm5260_vm8, %v6551_v23, %v5388_v57  ;;  %v8050_v13 = vpop.f32.mrb[31].mxu1  ;;  %vm5263_vm11 = vcmp.gt.f32.partialorder %v6584_v4, 0.0  ;;  %v5391_v9 = vmul.f32 0.01, %v6584_v4  ;;  %v6553_v25 = vadd.f32 %v7966_v45, %v7779_v27 }
 0x299   : > { %v5686_v14 = vmul.f32 %v7789_v32, %v5516_v3  ;;  %v5518_v60 = vsel %vm5262_vm9, %v6583_v26, %v5390_v5  ;;  %4668 = vmatmul.mubr.bf16.gmra.mrb[40].mxu0 %v7251_v41  ;;  %v5816_v0 = vadd.f32 %v5815_v42, %v5680_v48  ;;  %v5517_v15 = vsel %vm5261_vm10, %v6552_v30, %v5389_v8 }
 0x29a   : > { %v5688_v1 = vmul.f32 %v7800_v38, %v5518_v60  ;;  %5120 = vmatmul.mubr.bf16.gmra.mrb[40].mxu1 %v7251_v41  ;;  %v5687_v10 = vmul.f32 %v7802_v39, %v5517_v15  ;;  %v5519_v23 = vsel %vm5263_vm11, %v6584_v4, %v5391_v9  ;;  %v6585_v29 = vadd.f32 %v7969_v47, %v7781_v28 }
 0x29b   : > { %v6554_v26 = vadd.f32 %v7971_v55, %v7791_v33  ;;  %4677 = vmatprep.mubr.bf16.mxu0 %v7425_v54  ;;  %v8063_v57 = vadd.f32 %v5816_v0, %v5681_v36  ;;  %v5689_v48 = vmul.f32 %v7810_v44, %v5519_v23  ;;  %vm5268_vm12 = vcmp.gt.f32.partialorder %v6553_v25, 0.0  ;;  %5129 = vmatprep.mubr.bf16.mxu1 %v7425_v54 }
 0x29c   : > { %v5396_v30 = vmul.f32 0.01, %v6553_v25  ;;  %v5824_v45 = vadd.f32 %v5687_v10, %v5686_v14  ;;  %vm5270_vm13 = vcmp.gt.f32.partialorder %v6585_v29, 0.0  ;;  %v5398_v5 = vmul.f32 0.01, %v6585_v29 }
 0x29d   : > { %vm5269_vm14 = vcmp.gt.f32.partialorder %v6554_v26, 0.0  ;;  %v5397_v47 = vmul.f32 0.01, %v6554_v26  ;;  %v6586_v55 = vadd.f32 %v7973_v56, %v7793_v34  ;;  %v6555_v36 = vadd.f32 %v7988_v21, %v7779_v27 }
 0x29e   : > { %v5524_v4 = vsel %vm5268_vm12, %v6553_v25, %v5396_v30  ;;  %v5825_v42 = vadd.f32 %v5824_v45, %v5688_v1  ;;  %v5526_v8 = vsel %vm5270_vm13, %v6585_v29, %v5398_v5  ;;  %v6587_v60 = vadd.f32 %v7996_v31, %v7781_v28  ;;  %v7252_v25 = vld [vmem:[%s7639_s9 + $0xc0] ss:$28 sps:$4 sm:$0xff]  }
 0x29f   : > { %v5694_v3 = vmul.f32 %v7789_v32, %v5524_v4  ;;  %v5696_v14 = vmul.f32 %v7800_v38, %v5526_v8  ;;  %v5525_v9 = vsel %vm5269_vm14, %v6554_v26, %v5397_v47  ;;  %vm5271_vm15 = vcmp.gt.f32.partialorder %v6586_v55, 0.0 }
 0x2a0   : > { %v5399_v41 = vmul.f32 0.01, %v6586_v55  ;;  %v8075_v0 = vadd.f32 %v5825_v42, %v5689_v48  ;;  %v5695_v15 = vmul.f32 %v7802_v39, %v5525_v9  ;;  %vm5276_vm0 = vcmp.gt.f32.partialorder %v6555_v36, 0.0 }
 0x2a1   : > { %v5404_v56 = vmul.f32 0.01, %v6555_v36  ;;  %4678 = vmatmul.mubr.bf16.gmra.mrb[44].mxu0 %v7252_v25  ;;  %vm5278_vm1 = vcmp.gt.f32.partialorder %v6587_v60, 0.0  ;;  %v5406_v1 = vmul.f32 0.01, %v6587_v60  ;;  %v6556_v10 = vadd.f32 %v7998_v37, %v7791_v33 }
 0x2a2   : > { %v5527_v21 = vsel %vm5271_vm15, %v6586_v55, %v5399_v41  ;;  %5130 = vmatmul.mubr.bf16.gmra.mrb[44].mxu1 %v7252_v25  ;;  %4687 = vmatprep.mubr.bf16.mxu0 %v7425_v54  ;;  %v5833_v31 = vadd.f32 %v5695_v15, %v5694_v3  ;;  %v6588_v26 = vadd.f32 %v8001_v46, %v7793_v34  ;;  %v7253_v15 = vld [vmem:[%s7639_s9 + $0xf8] ss:$28 sps:$4 sm:$0xff]  }
 0x2a3   : > { %v5697_v23 = vmul.f32 %v7810_v44, %v5527_v21  ;;  %v5532_v29 = vsel %vm5276_vm0, %v6555_v36, %v5404_v56  ;;  %5139 = vmatprep.mubr.bf16.mxu1 %v7425_v54  ;;  %v5534_v30 = vsel %vm5278_vm1, %v6587_v60, %v5406_v1  ;;  %vm5277_vm2 = vcmp.gt.f32.partialorder %v6556_v10, 0.0 }
 0x2a4   : > { %v5702_v48 = vmul.f32 %v7789_v32, %v5532_v29  ;;  %v5405_v45 = vmul.f32 0.01, %v6556_v10  ;;  %v5834_v5 = vadd.f32 %v5833_v31, %v5696_v14  ;;  %v5704_v37 = vmul.f32 %v7800_v38, %v5534_v30 }
 0x2a5   : > { %vm5279_vm3 = vcmp.gt.f32.partialorder %v6588_v26, 0.0  ;;  %v5407_v4 = vmul.f32 0.01, %v6588_v26  ;;  %v6557_v55 = vadd.f32 %v8003_v12, %v7779_v27  ;;  %v6589_v46 = vadd.f32 %v8007_v51, %v7781_v28 }
 0x2a6   : > { %v5533_v47 = vsel %vm5277_vm2, %v6556_v10, %v5405_v45  ;;  %v6558_v36 = vadd.f32 %v8009_v59, %v7791_v33  ;;  %v8094_v42 = vadd.f32 %v5834_v5, %v5697_v23  ;;  %v6590_v60 = vadd.f32 %v8014_v6, %v7793_v34 }
 0x2a7   : > { %v5703_v3 = vmul.f32 %v7802_v39, %v5533_v47  ;;  %v5535_v8 = vsel %vm5279_vm3, %v6588_v26, %v5407_v4  ;;  %vm5284_vm4 = vcmp.gt.f32.partialorder %v6557_v55, 0.0  ;;  %v5412_v9 = vmul.f32 0.01, %v6557_v55 }
 0x2a8   : > { %v5705_v14 = vmul.f32 %v7810_v44, %v5535_v8  ;;  %vm5286_vm5 = vcmp.gt.f32.partialorder %v6589_v46, 0.0  ;;  %v5414_v41 = vmul.f32 0.01, %v6589_v46  ;;  %vm5285_vm6 = vcmp.gt.f32.partialorder %v6558_v36, 0.0 }
 0x2a9   : > { %v5842_v12 = vadd.f32 %v5703_v3, %v5702_v48  ;;  %v5413_v51 = vmul.f32 0.01, %v6558_v36  ;;  %4688 = vmatmul.mubr.bf16.gmra.mrb[48].mxu0 %v7253_v15  ;;  %v5540_v59 = vsel %vm5284_vm4, %v6557_v55, %v5412_v9  ;;  %vm5287_vm7 = vcmp.gt.f32.partialorder %v6590_v60, 0.0 }
 0x2aa   : > { %v5415_v56 = vmul.f32 0.01, %v6590_v60  ;;  %v6559_v25 = vadd.f32 %v8028_v22, %v7779_v27  ;;  %5140 = vmatmul.mubr.bf16.gmra.mrb[48].mxu1 %v7253_v15  ;;  %4697 = vmatprep.mubr.bf16.mxu0 %v7425_v54  ;;  %v5710_v21 = vmul.f32 %v7789_v32, %v5540_v59  ;;  %v5542_v1 = vsel %vm5286_vm5, %v6589_v46, %v5414_v41 }
 0x2ab   : > { %v5843_v6 = vadd.f32 %v5842_v12, %v5704_v37  ;;  %v5541_v10 = vsel %vm5285_vm6, %v6558_v36, %v5413_v51  ;;  %5149 = vmatprep.mubr.bf16.mxu1 %v7425_v54  ;;  %v5712_v31 = vmul.f32 %v7800_v38, %v5542_v1  ;;  %v6591_v30 = vadd.f32 %v8034_v49, %v7781_v28 }
 0x2ac   : > { %v5711_v23 = vmul.f32 %v7802_v39, %v5541_v10  ;;  %v5543_v29 = vsel %vm5287_vm7, %v6590_v60, %v5415_v56  ;;  %vm5292_vm8 = vcmp.gt.f32.partialorder %v6559_v25, 0.0  ;;  %v5420_v48 = vmul.f32 0.01, %v6559_v25  ;;  %v7254_v60 = vld [vmem:[%s7639_s9 + $0x130] ss:$28 sps:$4 sm:$0xff]  }
 0x2ad   : > { %v8108_v26 = vadd.f32 %v5843_v6, %v5705_v14  ;;  %v5713_v22 = vmul.f32 %v7810_v44, %v5543_v29  ;;  %v6560_v5 = vadd.f32 %v8036_v52, %v7791_v33  ;;  %v6592_v37 = vadd.f32 %v8039_v35, %v7793_v34 }
 0x2ae   : > { %v5851_v45 = vadd.f32 %v5711_v23, %v5710_v21  ;;  %v6561_v4 = vadd.f32 %v8041_v50, %v7779_v27  ;;  %v5548_v47 = vsel %vm5292_vm8, %v6559_v25, %v5420_v48  ;;  %vm5294_vm9 = vcmp.gt.f32.partialorder %v6591_v30, 0.0  ;;  %v7256_v48 = vld [vmem:[%s7639_s9 + $0x1a0] ss:$28 sps:$4 sm:$0xff]  }
 0x2af   : > { %8751 = vst [vmem:[#allocation13_spill] sm:$0xff] %v8108_v26  ;;  %v5422_v55 = vmul.f32 0.01, %v6591_v30  ;;  %v6593_v46 = vadd.f32 %v8046_v61, %v7781_v28  ;;  %v5718_v49 = vmul.f32 %v7789_v32, %v5548_v47  ;;  %vm5293_vm10 = vcmp.gt.f32.partialorder %v6560_v5, 0.0 }
 0x2b0   : > { %v5852_v36 = vadd.f32 %v5851_v45, %v5712_v31  ;;  %v5421_v3 = vmul.f32 0.01, %v6560_v5  ;;  %vm5295_vm11 = vcmp.gt.f32.partialorder %v6592_v37, 0.0  ;;  %v5423_v52 = vmul.f32 0.01, %v6592_v37 }
 0x2b1   : > { %v5550_v8 = vsel %vm5294_vm9, %v6591_v30, %v5422_v55  ;;  %vm5300_vm12 = vcmp.gt.f32.partialorder %v6561_v4, 0.0  ;;  %4698 = vmatmul.mubr.bf16.gmra.mrb[52].mxu0 %v7254_v60  ;;  %v5624_v27 = vmul.f32 %v7800_v38, %v7873_v7  ;;  %v5428_v14 = vmul.f32 0.01, %v6561_v4 }
 0x2b2   : > { %v8125_v35 = vadd.f32 %v5852_v36, %v5713_v22  ;;  %v5549_v50 = vsel %vm5293_vm10, %v6560_v5, %v5421_v3  ;;  %5150 = vmatmul.mubr.bf16.gmra.mrb[52].mxu1 %v7254_v60  ;;  %4707 = vmatprep.mubr.bf16.mxu0 %v7425_v54  ;;  %v5625_v28 = vmul.f32 %v7810_v44, %v7876_v11  ;;  %v5430_v51 = vmul.f32 0.01, %v6593_v46 }
 0x2b3   : > { %v5720_v61 = vmul.f32 %v7800_v38, %v5550_v8  ;;  %v5719_v9 = vmul.f32 %v7802_v39, %v5549_v50  ;;  %v5551_v12 = vsel %vm5295_vm11, %v6592_v37, %v5423_v52  ;;  %5159 = vmatprep.mubr.bf16.mxu1 %v7425_v54  ;;  %v5556_v41 = vsel %vm5300_vm12, %v6561_v4, %v5428_v14 }
 0x2b4   : > { %8752 = vst [vmem:[#allocation14_spill] sm:$0xff] %v8125_v35  ;;  %v6562_v7 = vadd.f32 %v8048_v62, %v7791_v33  ;;  %v6594_v15 = vadd.f32 %v8050_v13, %v7793_v34  ;;  %v5721_v56 = vmul.f32 %v7810_v44, %v5551_v12  ;;  %vm5302_vm13 = vcmp.gt.f32.partialorder %v6593_v46, 0.0 }
 0x2b5   : > { %v5860_v59 = vadd.f32 %v5719_v9, %v5718_v49  ;;  %v5735_v11 = vadd.f32 %v7850_v24, %v7845_v19  ;;  %v5726_v25 = vmul.f32 %v7789_v32, %v5556_v41  ;;  %v5753_v34 = vadd.f32 %v7881_v17, %v5624_v27  ;;  %v7255_v19 = vld [vmem:[%s7639_s9 + $0x168] ss:$28 sps:$4 sm:$0xff]  }
 0x2b6   : > { %vm5301_vm14 = vcmp.gt.f32.partialorder %v6562_v7, 0.0  ;;  %v5429_v6 = vmul.f32 0.01, %v6562_v7  ;;  %vm5303_vm15 = vcmp.gt.f32.partialorder %v6594_v15, 0.0  ;;  %v5431_v1 = vmul.f32 0.01, %v6594_v15 }
 0x2b7   : > { %v5861_v21 = vadd.f32 %v5860_v59, %v5720_v61  ;;  %v8142_v33 = vadd.f32 %v5735_v11, %v7867_v58  ;;  %v5558_v62 = vsel %vm5302_vm13, %v6593_v46, %v5430_v51  ;;  %v8149_v32 = vadd.f32 %v5753_v34, %v5625_v28  ;;  %v7258_v61 = vld [vmem:[#allocation8] sm:$0xff] }
 0x2b8   : > { %v5557_v13 = vsel %vm5301_vm14, %v6562_v7, %v5429_v6  ;;  %v5559_v24 = vsel %vm5303_vm15, %v6594_v15, %v5431_v1  ;;  %v5728_v58 = vmul.f32 %v7800_v38, %v5558_v62  ;;  %v830_v30 = vsub.s32 6, %v7761_v2  ;;  %v7257_v38 = vld [vmem:[#allocation7] sm:$0xff] }
 0x2b9   : > { %v8145_v10 = vadd.f32 %v5861_v21, %v5721_v56  ;;  %v5727_v31 = vmul.f32 %v7802_v39, %v5557_v13  ;;  %4708 = vmatmul.mubr.bf16.gmra.mrb[56].mxu0 %v7255_v19  ;;  %v5729_v17 = vmul.f32 %v7810_v44, %v5559_v24  ;;  %v822_v39 = vsub.s32 4, %v7761_v2 }
 0x2ba   : > { %5160 = vmatmul.mubr.bf16.gmra.mrb[56].mxu1 %v7255_v19  ;;  %4717 = vmatprep.mubr.bf16.mxu0 %v7425_v54  ;;  %v826_v45 = vsub.s32 5, %v7761_v2  ;;  %v834_v5 = vsub.s32 7, %v7761_v2  ;;  %v8164_v4 = vrot.slane %v7257_v38, %v830_v30  ;;  %v8181_v21 = vrot.slane %v7258_v61, %v830_v30 }
 0x2bb   : > { %8753 = vst [vmem:[#allocation15_spill] sm:$0xff] %v8145_v10  ;;  %v5869_v23 = vadd.f32 %v5727_v31, %v5726_v25  ;;  %5169 = vmatprep.mubr.bf16.mxu1 %v7425_v54  ;;  %v8162_v37 = vrot.slane %v7257_v38, %v822_v39  ;;  %v8175_v9 = vrot.slane %v7258_v61, %v822_v39 }
 0x2bc   : > { %v8166_v44 = vrot.slane %v7257_v38, %v826_v45  ;;  %v8168_v46 = vrot.slane %v7257_v38, %v834_v5  ;;  %v8179_v11 = vrot.slane %v7258_v61, %v826_v45  ;;  %v8183_v13 = vrot.slane %v7258_v61, %v834_v5 }
 0x2bd   : > { %v5870_v29 = vadd.f32 %v5869_v23, %v5728_v58 }
 0x2bf   : > { %v8155_v22 = vadd.f32 %v5870_v29, %v5729_v17 }
 0x2c1   : > { %8754 = vst [vmem:[#allocation16_spill] sm:$0xff] %v8155_v22  ;;  %4718 = vmatmul.mubr.bf16.gmra.mrb[60].mxu0 %v7256_v48 }
 0x2c2   : > { %5170 = vmatmul.mubr.bf16.gmra.mrb[60].mxu1 %v7256_v48 }
 0x35c   : > { %v4649_v54 = vpop.f32.mrb[32].mxu0 }
 0x35d   : > { %v5101_v47 = vpop.f32.mrb[32].mxu1  ;;  %v4651_v55 = vpop.f32.mrb[33].mxu0  ;;  %v6595_v3 = vadd.f32 %v4649_v54, %v8162_v37 }
 0x35e   : > { %v5103_v36 = vpop.f32.mrb[33].mxu1  ;;  %v4653_v49 = vpop.f32.mrb[34].mxu0  ;;  %v6627_v2 = vadd.f32 %v5101_v47, %v8164_v4  ;;  %v6596_v60 = vadd.f32 %v4651_v55, %v8166_v44 }
 0x35f   : > { %v5105_v8 = vpop.f32.mrb[34].mxu1  ;;  %v4655_v52 = vpop.f32.mrb[35].mxu0  ;;  %v6628_v27 = vadd.f32 %v5103_v36, %v8168_v46  ;;  %v6597_v50 = vadd.f32 %v4653_v49, %v8162_v37  ;;  %vm5184_vm0 = vcmp.gt.f32.partialorder %v6595_v3, 0.0  ;;  %v5312_v28 = vmul.f32 0.01, %v6595_v3 }
 0x360   : > { %v5107_v14 = vpop.f32.mrb[35].mxu1  ;;  %v6598_v12 = vadd.f32 %v4655_v52, %v8166_v44  ;;  %v5314_v41 = vmul.f32 0.01, %v6627_v2  ;;  %vm5185_vm1 = vcmp.gt.f32.partialorder %v6596_v60, 0.0  ;;  %v5313_v51 = vmul.f32 0.01, %v6596_v60 }
 0x361   : > { %v6629_v7 = vadd.f32 %v5105_v8, %v8164_v4  ;;  %v5315_v59 = vmul.f32 0.01, %v6628_v27  ;;  %v5320_v56 = vmul.f32 0.01, %v6597_v50  ;;  %vm5186_vm2 = vcmp.gt.f32.partialorder %v6627_v2, 0.0 }
 0x362   : > { %vm5192_vm3 = vcmp.gt.f32.partialorder %v6597_v50, 0.0  ;;  %v5321_v1 = vmul.f32 0.01, %v6598_v12  ;;  %v5440_v31 = vsel %vm5184_vm0, %v6595_v3, %v5312_v28  ;;  %vm5187_vm4 = vcmp.gt.f32.partialorder %v6628_v27, 0.0 }
 0x363   : > { %vm5193_vm5 = vcmp.gt.f32.partialorder %v6598_v12, 0.0  ;;  %v8187_v19 = vadd.f32 %v5107_v14, %v8168_v46  ;;  %v5441_v23 = vsel %vm5185_vm1, %v6596_v60, %v5313_v51  ;;  %v5322_v17 = vmul.f32 0.01, %v6629_v7 }
 0x364   : > { %v4659_v15 = vpop.f32.mrb[36].mxu0  ;;  %v5448_v30 = vsel %vm5192_vm3, %v6597_v50, %v5320_v56  ;;  %vm5194_vm6 = vcmp.gt.f32.partialorder %v6629_v7, 0.0  ;;  %v5610_v38 = vmul.f32 %v8175_v9, %v5440_v31  ;;  %v5449_v54 = vsel %vm5193_vm5, %v6598_v12, %v5321_v1 }
 0x365   : > { %v5111_v25 = vpop.f32.mrb[36].mxu1  ;;  %v4661_v6 = vpop.f32.mrb[37].mxu0  ;;  %v6599_v29 = vadd.f32 %v4659_v15, %v8162_v37  ;;  %v5442_v47 = vsel %vm5186_vm2, %v6627_v2, %v5314_v41  ;;  %v5443_v55 = vsel %vm5187_vm4, %v6628_v27, %v5315_v59  ;;  %v8203_v36 = vmul.f32 0.01, %v8187_v19 }
 0x366   : > { %v5113_v34 = vpop.f32.mrb[37].mxu1  ;;  %v4663_v62 = vpop.f32.mrb[38].mxu0  ;;  %v8192_v48 = vadd.f32 %v5111_v25, %v8164_v4  ;;  %v8196_v45 = vadd.f32 %v4661_v6, %v8166_v44  ;;  %v5611_v8 = vmul.f32 %v8179_v11, %v5441_v23  ;;  %v8211_v52 = vmul.f32 %v8175_v9, %v5448_v30 }
 0x367   : > { %v5115_v24 = vpop.f32.mrb[38].mxu1  ;;  %v4665_v58 = vpop.f32.mrb[39].mxu0  ;;  %v6601_v5 = vadd.f32 %v4663_v62, %v8162_v37  ;;  %v8206_v49 = vadd.f32 %v5113_v34, %v8168_v46  ;;  %v8213_v60 = vsel %vm5194_vm6, %v6629_v7, %v5322_v17  ;;  %v5328_v50 = vmul.f32 0.01, %v6599_v29 }
 0x368   : > { %v5117_v39 = vpop.f32.mrb[39].mxu1  ;;  %v6602_v3 = vadd.f32 %v4665_v58, %v8166_v44  ;;  %v8216_v2 = vmul.f32 0.01, %v8192_v48  ;;  %v8219_v14 = vmul.f32 %v8179_v11, %v5449_v54  ;;  %vm5195_vm7 = vcmp.gt.f32.partialorder %v8187_v19, 0.0 }
 0x369   : > { %vm5200_vm8 = vcmp.gt.f32.partialorder %v6599_v29, 0.0  ;;  %vm5201_vm9 = vcmp.gt.f32.partialorder %v8196_v45, 0.0  ;;  %v5336_v28 = vmul.f32 0.01, %v6601_v5  ;;  %v5329_v41 = vmul.f32 0.01, %v8196_v45 }
 0x36a   : > { %vm5208_vm10 = vcmp.gt.f32.partialorder %v6601_v5, 0.0  ;;  %v6633_v51 = vadd.f32 %v5115_v24, %v8164_v4  ;;  %v8227_v59 = vmul.f32 0.01, %v8206_v49  ;;  %v5337_v56 = vmul.f32 0.01, %v6602_v3 }
 0x36b   : > { %v5737_v6 = vadd.f32 %v8142_v33, %v5610_v38  ;;  %v5456_v62 = vsel %vm5200_vm8, %v6599_v29, %v5328_v50  ;;  %vm5202_vm11 = vcmp.gt.f32.partialorder %v8192_v48, 0.0  ;;  %vm5209_vm12 = vcmp.gt.f32.partialorder %v6602_v3, 0.0 }
 0x36c   : > { %v4669_v27 = vpop.f32.mrb[40].mxu0  ;;  %vm5203_vm13 = vcmp.gt.f32.partialorder %v8206_v49, 0.0  ;;  %v5464_v17 = vsel %vm5208_vm10, %v6601_v5, %v5336_v28  ;;  %v5612_v30 = vmul.f32 %v8181_v21, %v5442_v47  ;;  %vm5210_vm15 = vcmp.gt.f32.partialorder %v6633_v51, 0.0 }
 0x36d   : > { %v5121_v61 = vpop.f32.mrb[40].mxu1  ;;  %v4671_v12 = vpop.f32.mrb[41].mxu0  ;;  %v6603_v7 = vadd.f32 %v4669_v27, %v8162_v37  ;;  %v5738_v33 = vadd.f32 %v5737_v6, %v5611_v8  ;;  %v5338_v38 = vmul.f32 0.01, %v6633_v51  ;;  %v8238_v29 = vadd.f32 %v5117_v39, %v8168_v46 }
 0x36e   : > { %v5123_v15 = vpop.f32.mrb[41].mxu1  ;;  %v6635_v25 = vadd.f32 %v5121_v61, %v8164_v4  ;;  %v4673_v1 = vpop.f32.mrb[42].mxu0  ;;  %v6604_v24 = vadd.f32 %v4671_v12, %v8166_v44  ;;  %v5613_v54 = vmul.f32 %v8183_v13, %v5443_v55  ;;  %v5465_v50 = vsel %vm5209_vm12, %v6602_v3, %v5337_v56 }
 0x36f   : > { %v5125_v34 = vpop.f32.mrb[42].mxu1  ;;  %v5344_v31 = vmul.f32 0.01, %v6603_v7  ;;  %v4675_v58 = vpop.f32.mrb[43].mxu0  ;;  %vm5216_vm14 = vcmp.gt.f32.partialorder %v6603_v7, 0.0  ;;  %v5739_v61 = vadd.f32 %v5738_v33, %v5612_v30  ;;  %v8242_v12 = vadd.f32 %v5123_v15, %v8168_v46 }
 0x370   : > { %v5127_v23 = vpop.f32.mrb[43].mxu1  ;;  %v5346_v27 = vmul.f32 0.01, %v6635_v25  ;;  %vm5218_vm0 = vcmp.gt.f32.partialorder %v6635_v25, 0.0  ;;  %v5345_v5 = vmul.f32 0.01, %v6604_v24  ;;  %v6605_v28 = vadd.f32 %v4673_v1, %v8162_v37 }
 0x371   : > { %v5472_v22 = vsel %vm5216_vm14, %v6603_v7, %v5344_v31  ;;  %v5626_v8 = vmul.f32 %v8175_v9, %v5456_v62  ;;  %v5740_v6 = vadd.f32 %v5739_v61, %v5613_v54  ;;  %vm5217_vm1 = vcmp.gt.f32.partialorder %v6604_v24, 0.0 }
 0x372   : > { %v8247_v39 = vadd.f32 %v5125_v34, %v8164_v4  ;;  %v5457_v15 = vsel %vm5201_vm9, %v8196_v45, %v5329_v41  ;;  %v8253_v7 = vmul.f32 %v8175_v9, %v5464_v17  ;;  %v8256_v56 = vmul.f32 0.01, %v8238_v29 }
 0x373   : > { %v6606_v1 = vadd.f32 %v4675_v58, %v8166_v44  ;;  %v8260_v62 = vsel %vm5210_vm15, %v6633_v51, %v5338_v38  ;;  %v8263_v34 = vmul.f32 %v8179_v11, %v5465_v50  ;;  %v8266_v31 = vmul.f32 %v8175_v9, %v5472_v22  ;;  %5741 = vadd.xlane.f32.xlu0 %v5740_v6 }
 0x374   : > { %v4679_v47 = vpop.f32.mrb[44].mxu0  ;;  %v8269_v30 = vsel %vm5218_vm0, %v6635_v25, %v5346_v27  ;;  %v5473_v45 = vsel %vm5217_vm1, %v6604_v24, %v5345_v5  ;;  %v8272_v41 = vmul.f32 0.01, %v8242_v12  ;;  %v5352_v17 = vmul.f32 0.01, %v6605_v28 }
 0x375   : > { %v5131_v55 = vpop.f32.mrb[44].mxu1  ;;  %v4681_v3 = vpop.f32.mrb[45].mxu0  ;;  %v5451_v51 = vsel %vm5195_vm7, %v8187_v19, %v8203_v36  ;;  %vm5224_vm2 = vcmp.gt.f32.partialorder %v6605_v28, 0.0  ;;  %vm5226_vm3 = vcmp.gt.f32.partialorder %v8247_v39, 0.0  ;;  %v5746_v22 = vadd.f32 %v7879_v16, %v8211_v52 }
 0x376   : > { %v5133_v58 = vpop.f32.mrb[45].mxu1  ;;  %v4683_v33 = vpop.f32.mrb[46].mxu0  ;;  %v6607_v25 = vadd.f32 %v4679_v47, %v8162_v37  ;;  %vm5211_vm4 = vcmp.gt.f32.partialorder %v8238_v29, 0.0  ;;  %v5354_v54 = vmul.f32 0.01, %v8247_v39  ;;  %vm5225_vm5 = vcmp.gt.f32.partialorder %v6606_v1, 0.0 }
 0x377   : > { %v5135_v24 = vpop.f32.mrb[46].mxu1  ;;  %v4685_v38 = vpop.f32.mrb[47].mxu0  ;;  %v5353_v50 = vmul.f32 0.01, %v6606_v1  ;;  %v8285_v19 = vadd.f32 %v5127_v23, %v8168_v46  ;;  %v5620_v27 = vmul.f32 %v8181_v21, %v8213_v60  ;;  %v5747_v61 = vadd.f32 %v5746_v22, %v8219_v14 }
 0x378   : > { %v5137_v36 = vpop.f32.mrb[47].mxu1  ;;  %v5458_v16 = vsel %vm5202_vm11, %v8192_v48, %v8216_v2  ;;  %v5627_v52 = vmul.f32 %v8179_v11, %v5457_v15  ;;  %v5480_v5 = vsel %vm5224_vm2, %v6605_v28, %v5352_v17  ;;  %v5621_v47 = vmul.f32 %v8183_v13, %v5451_v51 }
 0x379   : > { %v6639_v23 = vadd.f32 %v5131_v55, %v8164_v4  ;;  %v5459_v60 = vsel %vm5203_vm13, %v8206_v49, %v8227_v59  ;;  %v5748_v14 = vadd.f32 %v5747_v61, %v5620_v27  ;;  %v5360_v22 = vmul.f32 0.01, %v6607_v25 }
 0x37a   : > { %v5755_v10 = vadd.f32 %v8149_v32, %v5626_v8  ;;  %v6608_v48 = vadd.f32 %v4681_v3, %v8166_v44  ;;  %v5481_v28 = vsel %vm5225_vm5, %v6606_v1, %v5353_v50  ;;  %vm5232_vm6 = vcmp.gt.f32.partialorder %v6607_v25, 0.0 }
 0x37b   : > { %v5628_v55 = vmul.f32 %v8181_v21, %v5458_v16  ;;  %v6609_v17 = vadd.f32 %v4683_v33, %v8162_v37  ;;  %vm5219_vm7 = vcmp.gt.f32.partialorder %v8242_v12, 0.0  ;;  %v5749_v59 = vadd.f32 %v5748_v14, %v5621_v47 }
 0x37c   : > { %v4689_v6 = vpop.f32.mrb[48].mxu0  ;;  %v5756_v32 = vadd.f32 %v5755_v10, %v5627_v52  ;;  %vm5233_vm8 = vcmp.gt.f32.partialorder %v6608_v48, 0.0  ;;  %v5361_v8 = vmul.f32 0.01, %v6608_v48  ;;  %vm5234_vm9 = vcmp.gt.f32.partialorder %v6639_v23, 0.0 }
 0x37d   : > { %v5141_v2 = vpop.f32.mrb[48].mxu1  ;;  %v8304_v15 = vpop.f32.mrb[49].mxu0  ;;  %v5362_v1 = vmul.f32 0.01, %v6639_v23  ;;  %v5629_v50 = vmul.f32 %v8183_v13, %v5459_v60  ;;  %v5368_v61 = vmul.f32 0.01, %v6609_v17  ;;  %5750 = vadd.xlane.f32.xlu0 %v5749_v59  ;;  %v5488_v33 = vsel %vm5232_vm6, %v6607_v25, %v5360_v22 }
 0x37e   : > { %v8309_v51 = vpop.f32.mrb[49].mxu1  ;;  %v8311_v49 = vpop.f32.mrb[50].mxu0  ;;  %v5757_v16 = vadd.f32 %v5756_v32, %v5628_v55  ;;  %v8321_v35 = vadd.f32 %v5133_v58, %v8168_v46  ;;  %vm5240_vm10 = vcmp.gt.f32.partialorder %v6609_v17, 0.0  ;;  %v5643_v52 = vmul.f32 %v8179_v11, %v5473_v45 }
 0x37f   : > { %v8314_v3 = vpop.f32.mrb[50].mxu1  ;;  %v8316_v27 = vpop.f32.mrb[51].mxu0  ;;  %v8327_v47 = vmul.f32 0.01, %v8285_v19  ;;  %v5489_v14 = vsel %vm5233_vm8, %v6608_v48, %v5361_v8  ;;  %v6610_v60 = vadd.f32 %v4685_v38, %v8166_v44  ;;  %v5650_v59 = vmul.f32 %v8175_v9, %v5480_v5 }
 0x380   : > { %v8323_v10 = vpop.f32.mrb[51].mxu1  ;;  %v8335_v25 = vsel %vm5226_vm3, %v8247_v39, %v5354_v54  ;;  %v8338_v58 = vmul.f32 %v8179_v11, %v5481_v28  ;;  %v5758_v22 = vadd.f32 %v5757_v16, %v5629_v50  ;;  %vm5227_vm11 = vcmp.gt.f32.partialorder %v8285_v19, 0.0 }
 0x381   : > { %v8342_v45 = vmul.f32 %v8175_v9, %v5488_v33  ;;  %v8345_v48 = vsel %vm5234_vm9, %v6639_v23, %v5362_v1  ;;  %v5496_v38 = vsel %vm5240_vm10, %v6609_v17, %v5368_v61  ;;  %v6641_v5 = vadd.f32 %v5135_v24, %v8164_v4 }
 0x382   : > { %5759 = vadd.xlane.f32.xlu1 %v5758_v22  ;;  %v8349_v55 = vmul.f32 %v8179_v11, %v5489_v14  ;;  %v8352_v39 = vmul.f32 0.01, %v8321_v35  ;;  %v5467_v54 = vsel %vm5211_vm4, %v8238_v29, %v8256_v56  ;;  %v5764_v28 = vadd.f32 %v7911_v20, %v8253_v7 }
 0x383   : > { %v5369_v24 = vmul.f32 0.01, %v6610_v60  ;;  %v8365_v32 = vadd.f32 %v5137_v36, %v8168_v46  ;;  %v6611_v8 = vadd.f32 %v4689_v6, %v8162_v37  ;;  %v6643_v1 = vadd.f32 %v5141_v2, %v8164_v4 }
 0x384   : > { %v8360_v23 = vpop.f32.mrb[52].mxu0  ;;  %v8374_v29 = vmul.f32 %v8175_v9, %v5496_v38  ;;  %vm5241_vm12 = vcmp.gt.f32.partialorder %v6610_v60, 0.0  ;;  %v5636_v20 = vmul.f32 %v8181_v21, %v8260_v62  ;;  %v5765_v7 = vadd.f32 %v5764_v28, %v8263_v34 }
 0x385   : > { %v8362_v17 = vpop.f32.mrb[52].mxu1  ;;  %v8369_v50 = vpop.f32.mrb[53].mxu0  ;;  %vm5242_vm13 = vcmp.gt.f32.partialorder %v6641_v5, 0.0  ;;  %v5370_v6 = vmul.f32 0.01, %v6641_v5  ;;  %v5637_v2 = vmul.f32 %v8183_v13, %v5467_v54  ;;  %vm5248_vm14 = vcmp.gt.f32.partialorder %v6611_v8, 0.0 }
 0x386   : > { %v8371_v61 = vpop.f32.mrb[53].mxu1  ;;  %v8379_v56 = vpop.f32.mrb[54].mxu0  ;;  %v5376_v33 = vmul.f32 0.01, %v6611_v8  ;;  %v5766_v16 = vadd.f32 %v5765_v7, %v5636_v20  ;;  %v5773_v14 = vadd.f32 %v7930_v53, %v8266_v31  ;;  %v6612_v22 = vadd.f32 %v8304_v15, %v8166_v44 }
 0x387   : > { %v8381_v36 = vpop.f32.mrb[54].mxu1  ;;  %v8388_v62 = vpop.f32.mrb[55].mxu0  ;;  %vm5235_vm15 = vcmp.gt.f32.partialorder %v8321_v35, 0.0  ;;  %v5497_v38 = vsel %vm5241_vm12, %v6610_v60, %v5369_v24  ;;  %v5378_v28 = vmul.f32 0.01, %v6643_v1  ;;  %v5475_v54 = vsel %vm5219_vm7, %v8242_v12, %v8272_v41 }
 0x388   : > { %v8390_v34 = vpop.f32.mrb[55].mxu1  ;;  %v5644_v53 = vmul.f32 %v8181_v21, %v8269_v30  ;;  %v5767_v31 = vadd.f32 %v5766_v16, %v5637_v2  ;;  %vm5250_vm0 = vcmp.gt.f32.partialorder %v6643_v1, 0.0  ;;  %v5774_v15 = vadd.f32 %v5773_v14, %v5643_v52 }
 0x389   : > { %v6613_v20 = vadd.f32 %v8311_v49, %v8162_v37  ;;  %v8403_v7 = vsel %vm5242_vm13, %v6641_v5, %v5370_v6  ;;  %v8406_v60 = vmul.f32 0.01, %v8365_v32  ;;  %v5504_v24 = vsel %vm5248_vm14, %v6611_v8, %v5376_v33 }
 0x38a   : > { %v5377_v26 = vmul.f32 0.01, %v6612_v22  ;;  %5768 = vadd.xlane.f32.xlu1 %v5767_v31  ;;  %v5645_v12 = vmul.f32 %v8183_v13, %v5475_v54  ;;  %v5775_v41 = vadd.f32 %v5774_v15, %v5644_v53  ;;  %vm5249_vm1 = vcmp.gt.f32.partialorder %v6612_v22, 0.0 }
 0x38b   : > { %v6645_v30 = vadd.f32 %v8314_v3, %v8164_v4  ;;  %v8415_v49 = vmul.f32 %v8179_v11, %v5497_v38  ;;  %v8417_v5 = vsel %vm5250_vm0, %v6643_v1, %v5378_v28  ;;  %v8421_v6 = vadd.f32 %v8309_v51, %v8168_v46 }
 0x38c   : > { %v8412_v52 = vpop.f32.mrb[56].mxu0  ;;  %v5782_v8 = vadd.f32 %v7947_v18, %v5650_v59  ;;  %v8429_v16 = vmul.f32 %v8175_v9, %v5504_v24  ;;  %v5776_v3 = vadd.f32 %v5775_v41, %v5645_v12  ;;  %v5384_v14 = vmul.f32 0.01, %v6613_v20 }
 0x38d   : > { %v8424_v2 = vpop.f32.mrb[56].mxu1  ;;  %v8426_v33 = vpop.f32.mrb[57].mxu0  ;;  %v5483_v1 = vsel %vm5227_vm11, %v8285_v19, %v8327_v47  ;;  %vm5243_vm2 = vcmp.gt.f32.partialorder %v8365_v32, 0.0  ;;  %v5505_v18 = vsel %vm5249_vm1, %v6612_v22, %v5377_v26  ;;  %v5652_v59 = vmul.f32 %v8181_v21, %v8335_v25 }
 0x38e   : > { %v8435_v38 = vpop.f32.mrb[57].mxu1  ;;  %v8437_v51 = vpop.f32.mrb[58].mxu0  ;;  %v5783_v28 = vadd.f32 %v5782_v8, %v8338_v58  ;;  %v6614_v54 = vadd.f32 %v8316_v27, %v8166_v44  ;;  %5777 = vadd.xlane.f32.xlu0 %v5776_v3  ;;  %vm5256_vm3 = vcmp.gt.f32.partialorder %v6613_v20, 0.0  ;;  %vm5258_vm4 = vcmp.gt.f32.partialorder %v6645_v30, 0.0 }
 0x38f   : > { %v8446_v53 = vpop.f32.mrb[58].mxu1  ;;  %v8448_v31 = vpop.f32.mrb[59].mxu0  ;;  %v5386_v19 = vmul.f32 0.01, %v6645_v30  ;;  %v6615_v47 = vadd.f32 %v8360_v23, %v8162_v37  ;;  %v5653_v25 = vmul.f32 %v8183_v13, %v5483_v1  ;;  %v6647_v27 = vadd.f32 %v8362_v17, %v8164_v4 }
 0x390   : > { %v8452_v26 = vpop.f32.mrb[59].mxu1  ;;  %v5784_v22 = vadd.f32 %v5783_v28, %v5652_v59  ;;  %v5385_v58 = vmul.f32 0.01, %v6614_v54  ;;  %v8458_v15 = vmul.f32 %v8179_v11, %v5505_v18  ;;  %v8461_v24 = vmul.f32 0.01, %v8421_v6 }
 0x391   : > { %vm5257_vm5 = vcmp.gt.f32.partialorder %v6614_v54, 0.0  ;;  %v5392_v12 = vmul.f32 0.01, %v6615_v47  ;;  %v5512_v41 = vsel %vm5256_vm3, %v6613_v20, %v5384_v14  ;;  %v8465_v23 = vadd.f32 %v8323_v10, %v8168_v46 }
 0x392   : > { %v5785_v8 = vadd.f32 %v5784_v22, %v5653_v25  ;;  %vm5264_vm6 = vcmp.gt.f32.partialorder %v6615_v47, 0.0  ;;  %vm5251_vm7 = vcmp.gt.f32.partialorder %v8421_v6, 0.0  ;;  %v8471_v17 = vsel %vm5258_vm4, %v6645_v30, %v5386_v19 }
 0x393   : > { %v5491_v1 = vsel %vm5235_vm15, %v8321_v35, %v8352_v39  ;;  %v5660_v20 = vmul.f32 %v8181_v21, %v8345_v48  ;;  %v5791_v10 = vadd.f32 %v7983_v63, %v8342_v45  ;;  %v5513_v59 = vsel %vm5257_vm5, %v6614_v54, %v5385_v58 }
 0x394   : > { %v8467_v3 = vpop.f32.mrb[60].mxu0  ;;  %5786 = vadd.xlane.f32.xlu1 %v5785_v8  ;;  %vm5266_vm8 = vcmp.gt.f32.partialorder %v6647_v27, 0.0  ;;  %v5394_v30 = vmul.f32 0.01, %v6647_v27  ;;  %v6616_v28 = vadd.f32 %v8369_v50, %v8166_v44  ;;  %v5520_v48 = vsel %vm5264_vm6, %v6615_v47, %v5392_v12 }
 0x395   : > { %v8481_v14 = vpop.f32.mrb[60].mxu1  ;;  %v8483_v18 = vpop.f32.mrb[61].mxu0  ;;  %v5792_v39 = vadd.f32 %v5791_v10, %v8349_v55  ;;  %v6617_v63 = vadd.f32 %v8379_v56, %v8162_v37  ;;  %v6649_v45 = vadd.f32 %v8381_v36, %v8164_v4  ;;  %v8502_v50 = vmul.f32 %v8175_v9, %v5512_v41 }
 0x396   : > { %v8487_v19 = vpop.f32.mrb[61].mxu1  ;;  %v8489_v35 = vpop.f32.mrb[62].mxu0  ;;  %v8505_v22 = vmul.f32 0.01, %v8465_v23  ;;  %v5661_v47 = vmul.f32 %v8183_v13, %v5491_v1  ;;  %v5393_v58 = vmul.f32 0.01, %v6616_v28  ;;  %v8511_v36 = vmul.f32 %v8179_v11, %v5513_v59 }
 0x397   : > { %v8497_v54 = vpop.f32.mrb[62].mxu1  ;;  %v8499_v25 = vpop.f32.mrb[63].mxu0  ;;  %v5793_v55 = vadd.f32 %v5792_v39, %v5660_v20  ;;  %vm5265_vm9 = vcmp.gt.f32.partialorder %v6616_v28, 0.0  ;;  %vm5272_vm10 = vcmp.gt.f32.partialorder %v6617_v63, 0.0  ;;  %v5400_v56 = vmul.f32 0.01, %v6617_v63 }
 0x398   : > { %v8508_v12 = vpop.f32.mrb[63].mxu1  ;;  %v8514_v8 = vmul.f32 %v8175_v9, %v5520_v48  ;;  %v8517_v41 = vsel %vm5266_vm8, %v6647_v27, %v5394_v30  ;;  %v8521_v10 = vadd.f32 %v8371_v61, %v8168_v46  ;;  %vm5259_vm11 = vcmp.gt.f32.partialorder %v8465_v23, 0.0 }
 0x399   : > { %v5794_v1 = vadd.f32 %v5793_v55, %v5661_v47  ;;  %vm5274_vm12 = vcmp.gt.f32.partialorder %v6649_v45, 0.0  ;;  %v5499_v20 = vsel %vm5243_vm2, %v8365_v32, %v8406_v60  ;;  %v5800_v59 = vadd.f32 %v8005_v40, %v8374_v29 }
 0x39a   : > { %v5521_v48 = vsel %vm5265_vm9, %v6616_v28, %v5393_v58  ;;  %v5528_v39 = vsel %vm5272_vm10, %v6617_v63, %v5400_v56  ;;  %v5402_v27 = vmul.f32 0.01, %v6649_v45  ;;  %v6618_v30 = vadd.f32 %v8388_v62, %v8166_v44 }
 0x39b   : > { %5795 = vadd.xlane.f32.xlu0 %v5794_v1  ;;  %v5668_v61 = vmul.f32 %v8181_v21, %v8403_v7  ;;  %v5801_v47 = vadd.f32 %v5800_v59, %v8415_v49  ;;  %v6619_v55 = vadd.f32 %v8412_v52, %v8162_v37  ;;  %v6651_v32 = vadd.f32 %v8424_v2, %v8164_v4 }
 0x39c   : > { %v8540_v40 = vmul.f32 0.01, %v8521_v10  ;;  %v5669_v29 = vmul.f32 %v8183_v13, %v5499_v20  ;;  %vm5273_vm13 = vcmp.gt.f32.partialorder %v6618_v30, 0.0  ;;  %v5401_v60 = vmul.f32 0.01, %v6618_v30 }
 0x39d   : > { %v8544_v62 = vmul.f32 %v8179_v11, %v5521_v48  ;;  %v8547_v7 = vmul.f32 %v8175_v9, %v5528_v39  ;;  %v5802_v49 = vadd.f32 %v5801_v47, %v5668_v61  ;;  %v5408_v28 = vmul.f32 0.01, %v6619_v55 }
 0x39e   : > { %v8550_v52 = vsel %vm5274_vm12, %v6649_v45, %v5402_v27  ;;  %v8554_v2 = vadd.f32 %v8390_v34, %v8168_v46  ;;  %vm5280_vm14 = vcmp.gt.f32.partialorder %v6619_v55, 0.0  ;;  %v5507_v63 = vsel %vm5251_vm7, %v8421_v6, %v8461_v24 }
 0x39f   : > { %vm5267_vm15 = vcmp.gt.f32.partialorder %v8521_v10, 0.0  ;;  %v5803_v58 = vadd.f32 %v5802_v49, %v5669_v29  ;;  %v5529_v56 = vsel %vm5273_vm13, %v6618_v30, %v5401_v60  ;;  %vm5282_vm0 = vcmp.gt.f32.partialorder %v6651_v32, 0.0 }
 0x3a0   : > { %v5809_v1 = vadd.f32 %v8043_v43, %v8429_v16  ;;  %v5410_v45 = vmul.f32 0.01, %v6651_v32  ;;  %v5676_v20 = vmul.f32 %v8181_v21, %v8417_v5  ;;  %v6620_v34 = vadd.f32 %v8426_v33, %v8166_v44 }
 0x3a1   : > { %v8569_v59 = vadd.f32 %v8435_v38, %v8168_v46  ;;  %5804 = vadd.xlane.f32.xlu1 %v5803_v58  ;;  %v5536_v6 = vsel %vm5280_vm14, %v6619_v55, %v5408_v28  ;;  %v6621_v48 = vadd.f32 %v8437_v51, %v8162_v37  ;;  %v6653_v43 = vadd.f32 %v8446_v53, %v8164_v4 }
 0x3a2   : > { %v5810_v24 = vadd.f32 %v5809_v1, %v8458_v15  ;;  %v8577_v16 = vmul.f32 0.01, %v8554_v2  ;;  %v5677_v5 = vmul.f32 %v8183_v13, %v5507_v63  ;;  %vm5281_vm1 = vcmp.gt.f32.partialorder %v6620_v34, 0.0 }
 0x3a3   : > { %v5409_v33 = vmul.f32 0.01, %v6620_v34  ;;  %v8581_v38 = vmul.f32 %v8179_v11, %v5529_v56  ;;  %vm5288_vm2 = vcmp.gt.f32.partialorder %v6621_v48, 0.0  ;;  %v5416_v27 = vmul.f32 0.01, %v6621_v48 }
 0x3a4   : > { %v5811_v39 = vadd.f32 %v5810_v24, %v5676_v20  ;;  %v8584_v15 = vmul.f32 %v8175_v9, %v5536_v6  ;;  %v8587_v51 = vsel %vm5282_vm0, %v6651_v32, %v5410_v45  ;;  %v8590_v53 = vmul.f32 0.01, %v8569_v59 }
 0x3a5   : > { %v5515_v30 = vsel %vm5259_vm11, %v8465_v23, %v8505_v22  ;;  %vm5275_vm3 = vcmp.gt.f32.partialorder %v8554_v2, 0.0  ;;  %v5537_v47 = vsel %vm5281_vm1, %v6620_v34, %v5409_v33  ;;  %vm5290_vm4 = vcmp.gt.f32.partialorder %v6653_v43, 0.0 }
 0x3a6   : > { %v5812_v61 = vadd.f32 %v5811_v39, %v5677_v5  ;;  %v5818_v55 = vadd.f32 %v8063_v57, %v8502_v50  ;;  %v5544_v29 = vsel %vm5288_vm2, %v6621_v48, %v5416_v27  ;;  %v5418_v60 = vmul.f32 0.01, %v6653_v43 }
 0x3a7   : > { %v6622_v32 = vadd.f32 %v8448_v31, %v8166_v44  ;;  %v8603_v49 = vadd.f32 %v8452_v26, %v8168_v46  ;;  %v5684_v23 = vmul.f32 %v8181_v21, %v8471_v17  ;;  %v6623_v28 = vadd.f32 %v8467_v3, %v8162_v37 }
 0x3a8   : > { %5813 = vadd.xlane.f32.xlu0 %v5812_v61  ;;  %v5819_v22 = vadd.f32 %v5818_v55, %v8511_v36  ;;  %v6655_v57 = vadd.f32 %v8481_v14, %v8164_v4  ;;  %v5707_v50 = vmul.f32 %v8179_v11, %v5537_v47  ;;  %v5685_v31 = vmul.f32 %v8183_v13, %v5515_v30 }
 0x3a9   : > { %vm5289_vm5 = vcmp.gt.f32.partialorder %v6622_v32, 0.0  ;;  %v5417_v63 = vmul.f32 0.01, %v6622_v32  ;;  %vm5283_vm6 = vcmp.gt.f32.partialorder %v8569_v59, 0.0  ;;  %v5714_v26 = vmul.f32 %v8175_v9, %v5544_v29  ;;  %v8755_v29 = vld [vmem:[#allocation13_spill] sm:$0xff] }
 0x3aa   : > { %v5820_v58 = vadd.f32 %v5819_v22, %v5684_v23  ;;  %vm5296_vm7 = vcmp.gt.f32.partialorder %v6623_v28, 0.0  ;;  %v5424_v17 = vmul.f32 0.01, %v6623_v28  ;;  %v5546_v36 = vsel %vm5290_vm4, %v6653_v43, %v5418_v60 }
 0x3ab   : > { %v5545_v56 = vsel %vm5289_vm5, %v6622_v32, %v5417_v63  ;;  %v5419_v3 = vmul.f32 0.01, %v8603_v49  ;;  %v5523_v14 = vsel %vm5267_vm15, %v8521_v10, %v8540_v40  ;;  %vm5291_vm8 = vcmp.gt.f32.partialorder %v8603_v49, 0.0 }
 0x3ac   : > { %v5821_v1 = vadd.f32 %v5820_v58, %v5685_v31  ;;  %v5552_v45 = vsel %vm5296_vm7, %v6623_v28, %v5424_v17  ;;  %v5426_v20 = vmul.f32 0.01, %v6655_v57  ;;  %v5827_v34 = vadd.f32 %v8075_v0, %v8514_v8 }
 0x3ad   : > { %vm5298_vm9 = vcmp.gt.f32.partialorder %v6655_v57, 0.0  ;;  %v5692_v6 = vmul.f32 %v8181_v21, %v8517_v41  ;;  %v6624_v24 = vadd.f32 %v8483_v18, %v8166_v44  ;;  %v6656_v48 = vadd.f32 %v8487_v19, %v8168_v46 }
 0x3ae   : > { %5822 = vadd.xlane.f32.xlu1 %v5821_v1  ;;  %v5693_v10 = vmul.f32 %v8183_v13, %v5523_v14  ;;  %v5828_v40 = vadd.f32 %v5827_v34, %v8544_v62  ;;  %v6625_v43 = vadd.f32 %v8489_v35, %v8162_v37  ;;  %v6657_v0 = vadd.f32 %v8497_v54, %v8164_v4 }
 0x3af   : > { %v5715_v8 = vmul.f32 %v8179_v11, %v5545_v56  ;;  %v5722_v41 = vmul.f32 %v8175_v9, %v5552_v45  ;;  %vm5297_vm10 = vcmp.gt.f32.partialorder %v6624_v24, 0.0  ;;  %v5425_v18 = vmul.f32 0.01, %v6624_v24 }
 0x3b0   : > { %v5554_v5 = vsel %vm5298_vm9, %v6655_v57, %v5426_v20  ;;  %v5829_v33 = vadd.f32 %v5828_v40, %v5692_v6  ;;  %vm5304_vm11 = vcmp.gt.f32.partialorder %v6625_v43, 0.0  ;;  %v5432_v19 = vmul.f32 0.01, %v6625_v43 }
 0x3b1   : > { %v5553_v39 = vsel %vm5297_vm10, %v6624_v24, %v5425_v18  ;;  %vm5299_vm12 = vcmp.gt.f32.partialorder %v6656_v48, 0.0  ;;  %v5427_v27 = vmul.f32 0.01, %v6656_v48  ;;  %v5531_v37 = vsel %vm5275_vm3, %v8554_v2, %v8577_v16 }
 0x3b2   : > { %v5830_v35 = vadd.f32 %v5829_v33, %v5693_v10  ;;  %v5560_v4 = vsel %vm5304_vm11, %v6625_v43, %v5432_v19  ;;  %vm5306_vm13 = vcmp.gt.f32.partialorder %v6657_v0, 0.0  ;;  %v5836_v54 = vadd.f32 %v8094_v42, %v8547_v7 }
 0x3b3   : > { %v5434_v62 = vmul.f32 0.01, %v6657_v0  ;;  %v5700_v30 = vmul.f32 %v8181_v21, %v8550_v52  ;;  %v6626_v61 = vadd.f32 %v8499_v25, %v8166_v44  ;;  %v6658_v47 = vadd.f32 %v8508_v12, %v8168_v46 }
 0x3b4   : > { %5831 = vadd.xlane.f32.xlu0 %v5830_v35  ;;  %v5723_v55 = vmul.f32 %v8179_v11, %v5553_v39  ;;  %v5701_v2 = vmul.f32 %v8183_v13, %v5531_v37  ;;  %v5837_v16 = vadd.f32 %v5836_v54, %v8581_v38  ;;  %v5845_v42 = vadd.f32 %v8755_v29, %v8584_v15 }
 0x3b5   : > { %v5730_v7 = vmul.f32 %v8175_v9, %v5560_v4  ;;  %vm5305_vm14 = vcmp.gt.f32.partialorder %v6626_v61, 0.0  ;;  %v5433_v52 = vmul.f32 0.01, %v6626_v61  ;;  %v5539_v44 = vsel %vm5283_vm6, %v8569_v59, %v8590_v53  ;;  %v8756_v9 = vld [vmem:[#allocation14_spill] sm:$0xff] }
 0x3b6   : > { %v5838_v46 = vadd.f32 %v5837_v16, %v5700_v30  ;;  %vm5307_vm15 = vcmp.gt.f32.partialorder %v6658_v47, 0.0  ;;  %v5708_v25 = vmul.f32 %v8181_v21, %v8587_v51  ;;  %v5846_v12 = vadd.f32 %v5845_v42, %v5707_v50  ;;  %v8757_v50 = vld [vmem:[#allocation15_spill] sm:$0xff] }
 0x3b7   : > { %v5561_v60 = vsel %vm5305_vm14, %v6626_v61, %v5433_v52  ;;  %v5435_v38 = vmul.f32 0.01, %v6658_v47  ;;  %v5547_v15 = vsel %vm5291_vm8, %v8603_v49, %v5419_v3  ;;  %v5854_v32 = vadd.f32 %v8756_v9, %v5714_v26  ;;  %v8758_v26 = vld [vmem:[#allocation16_spill] sm:$0xff] }
 0x3b8   : > { %v5839_v23 = vadd.f32 %v5838_v46, %v5701_v2  ;;  %v5731_v22 = vmul.f32 %v8179_v11, %v5561_v60  ;;  %v5709_v28 = vmul.f32 %v8183_v13, %v5539_v44  ;;  %v5847_v59 = vadd.f32 %v5846_v12, %v5708_v25 }
 0x3b9   : > { %v5562_v53 = vsel %vm5306_vm13, %v6657_v0, %v5434_v62  ;;  %v5716_v57 = vmul.f32 %v8181_v21, %v5546_v36  ;;  %v5855_v51 = vadd.f32 %v5854_v32, %v5715_v8  ;;  %v5863_v31 = vadd.f32 %v8757_v50, %v5722_v41 }
 0x3ba   : > { %5840 = vadd.xlane.f32.xlu1 %v5839_v23  ;;  %v5848_v63 = vadd.f32 %v5847_v59, %v5709_v28  ;;  %v5717_v58 = vmul.f32 %v8183_v13, %v5547_v15  ;;  %v5555_v49 = vsel %vm5299_vm12, %v6656_v48, %v5427_v27  ;;  %v5872_v17 = vadd.f32 %v8758_v26, %v5730_v7 }
 0x3bb   : > { %v5856_v56 = vadd.f32 %v5855_v51, %v5716_v57  ;;  %v5724_v11 = vmul.f32 %v8181_v21, %v5554_v5  ;;  %v5864_v3 = vadd.f32 %v5863_v31, %v5723_v55  ;;  %v5563_v14 = vsel %vm5307_vm15, %v6658_v47, %v5435_v38 }
 0x3bc   : > { %5849 = vadd.xlane.f32.xlu0 %v5848_v63  ;;  %v5732_v36 = vmul.f32 %v8181_v21, %v5562_v53  ;;  %v5873_v1 = vadd.f32 %v5872_v17, %v5731_v22  ;;  %v5725_v20 = vmul.f32 %v8183_v13, %v5555_v49  ;;  %v5733_v6 = vmul.f32 %v8183_v13, %v5563_v14 }
 0x3bd   : > { %v5857_v45 = vadd.f32 %v5856_v56, %v5717_v58  ;;  %v5865_v34 = vadd.f32 %v5864_v3, %v5724_v11  ;;  %v5879_v21 = vstv %s5878_s25  ;;  %vm5896_vm0 = vcmask 7168  }
 0x3be   : > { %v5874_v24 = vadd.f32 %v5873_v1, %v5732_v36 }
 0x3bf   : > { %5858 = vadd.xlane.f32.xlu1 %v5857_v45  ;;  %v5866_v48 = vadd.f32 %v5865_v34, %v5725_v20 }
 0x3c0   : > { %v5875_v10 = vadd.f32 %v5874_v24, %v5733_v6 }
 0x3c1   : > { %5867 = vadd.xlane.f32.xlu0 %v5866_v48 }
 0x3c3   : > { %5876 = vadd.xlane.f32.xlu1 %v5875_v10 }
 0x400   : > { %v5742_v13 = vpop.xlane.xlu0 %5741 }
 0x401   : > { %v5880_v40 = vadd.f32 %v5879_v21, %v5742_v13 }
 0x403   : > { %5897 = vst.msk [vmem:[%s8685_s20] sm:$0xff] %vm5896_vm0, %v5880_v40 }
 0x40a   : > { %v5751_v43 = vpop.xlane.xlu0 %5750 }
 0x40b   : > { %v5881_v0 = vadd.f32 %v5879_v21, %v5751_v43 }
 0x40d   : > { %5898 = vst.msk [vmem:[%s8685_s20 + $0x8] sm:$0xff] %vm5896_vm0, %v5881_v0 }
 0x40f   : > { %v5760_v8 = vpop.xlane.xlu1 %5759 }
 0x410   : > { %v5882_v41 = vadd.f32 %v5879_v21, %v5760_v8 }
 0x412   : > { %5899 = vst.msk [vmem:[%s8685_s20 + $0x10] sm:$0xff] %vm5896_vm0, %v5882_v41 }
 0x417   : > { %v5769_v18 = vpop.xlane.xlu1 %5768 }
 0x418   : > { %v5883_v5 = vadd.f32 %v5879_v21, %v5769_v18 }
 0x41a   : > { %5900 = vst.msk [vmem:[%s8685_s20 + $0x18] sm:$0xff] %vm5896_vm0, %v5883_v5 }
 0x41b   : > { %v5778_v33 = vpop.xlane.xlu0 %5777 }
 0x41c   : > { %v5884_v19 = vadd.f32 %v5879_v21, %v5778_v33 }
 0x41e   : > { %5901 = vst.msk [vmem:[%s8685_s20 + $0x20] sm:$0xff] %vm5896_vm0, %v5884_v19 }
 0x421   : > { %v5787_v39 = vpop.xlane.xlu1 %5786 }
 0x422   : > { %v5885_v27 = vadd.f32 %v5879_v21, %v5787_v39 }
 0x424   : > { %5902 = vst.msk [vmem:[%s8685_s20 + $0x28] sm:$0xff] %vm5896_vm0, %v5885_v27 }
 0x428   : > { %v5796_v37 = vpop.xlane.xlu0 %5795 }
 0x429   : > { %v5886_v35 = vadd.f32 %v5879_v21, %v5796_v37 }
 0x42b   : > { %5903 = vst.msk [vmem:[%s8685_s20 + $0x30] sm:$0xff] %vm5896_vm0, %v5886_v35 }
 0x42e   : > { %v5805_v4 = vpop.xlane.xlu1 %5804 }
 0x42f   : > { %v5887_v54 = vadd.f32 %v5879_v21, %v5805_v4 }
 0x431   : > { %5904 = vst.msk [vmem:[%s8685_s20 + $0x38] sm:$0xff] %vm5896_vm0, %v5887_v54 }
 0x435   : > { %v5814_v62 = vpop.xlane.xlu0 %5813 }
 0x436   : > { %v5888_v30 = vadd.f32 %v5879_v21, %v5814_v62 }
 0x438   : > { %5905 = vst.msk [vmem:[%s8685_s20 + $0x40] sm:$0xff] %vm5896_vm0, %v5888_v30 }
 0x43b   : > { %v5823_v61 = vpop.xlane.xlu1 %5822 }
 0x43c   : > { %v5889_v47 = vadd.f32 %v5879_v21, %v5823_v61 }
 0x43e   : > { %5906 = vst.msk [vmem:[%s8685_s20 + $0x48] sm:$0xff] %vm5896_vm0, %v5889_v47 }
 0x441   : > { %v5832_v55 = vpop.xlane.xlu0 %5831 }
 0x442   : > { %v5890_v2 = vadd.f32 %v5879_v21, %v5832_v55 }
 0x444   : > { %5907 = vst.msk [vmem:[%s8685_s20 + $0x50] sm:$0xff] %vm5896_vm0, %v5890_v2 }
 0x447   : > { %v5841_v16 = vpop.xlane.xlu1 %5840 }
 0x448   : > { %v5891_v29 = vadd.f32 %v5879_v21, %v5841_v16 }
 0x449   : > { %v5850_v42 = vpop.xlane.xlu0 %5849 }
 0x44a   : > { %5908 = vst.msk [vmem:[%s8685_s20 + $0x58] sm:$0xff] %vm5896_vm0, %v5891_v29  ;;  %v5892_v7 = vadd.f32 %v5879_v21, %v5850_v42 }
 0x44c   : > { %5909 = vst.msk [vmem:[%s8685_s20 + $0x60] sm:$0xff] %vm5896_vm0, %v5892_v7  ;;  %v5859_v52 = vpop.xlane.xlu1 %5858 }
 0x44d   : > { %v5893_v44 = vadd.f32 %v5879_v21, %v5859_v52 }
 0x44e   : > { %v5868_v46 = vpop.xlane.xlu0 %5867 }
 0x44f   : > { %5910 = vst.msk [vmem:[%s8685_s20 + $0x68] sm:$0xff] %vm5896_vm0, %v5893_v44  ;;  %v5894_v25 = vadd.f32 %v5879_v21, %v5868_v46 }
 0x450   : > { %v5877_v12 = vpop.xlane.xlu1 %5876 }
 0x451   : > { %5911 = vst.msk [vmem:[%s8685_s20 + $0x70] sm:$0xff] %vm5896_vm0, %v5894_v25  ;;  %v5895_v60 = vadd.f32 %v5879_v21, %v5877_v12 }
 0x453   : > { %5912 = vst.msk [vmem:[%s8685_s20 + $0x78] sm:$0xff] %vm5896_vm0, %v5895_v60 }
 0x454 PF: > { %p18_p11 = scmp.ge.s32.totalorder %s7583_s14, 4   ;;  %s8759_s20 = smov %s7407_s21 }
 0x455   : > { %s8760_s21 = smov %s7411_s22  ;;  %s8761_s22 = smov %s7593_s29 }
 0x456   : > { %s8762_s23 = smov %s7583_s14  ;;  %20 = sbr.rel (!%p18_p11) target bundleno = 7 (0x7), region = 92 }
 0x45d   :  { %5935 = vsyncpa [#allocation4], 1 }
 0x45e   :  { %5937 = vsyncpa [#allocation4 + $0x1], 1 }
 0x45f   :  { %5938 = vsyncpa [#allocation6], 1 }
 0x460   :  { %5939 = vsyncpa [#allocation9], 1 }

</bundles_post_ra>
